<compile_context>
chip_gen: v7x
topology: tpu7x:2x2x1
jax: 0.10.0
libtpu: 0.0.40
codegen_flags: <defaults>
</compile_context>

<pallas_src>
import jax
import jax.numpy as jnp
from jax import lax
from jax.experimental import pallas as pl
from jax.experimental.pallas import tpu as pltpu


def _hardswish(x):
    # x * relu6(x + 3) / 6  (PyTorch Hardswish), computed in f32 on the VPU.
    return x * jnp.clip(x + 3.0, 0.0, 6.0) * (1.0 / 6.0)


# ----------------------------- Pallas kernels ------------------------------

def _stem_conv_kernel(x_ref, w_ref, b_ref, o_ref, xpad_scr):
    # Dense 3x3 conv, stride 1, pad 1, + Hardswish, one batch element.
    # x_ref: (1, H, W, Cin) bf16    w_ref: (9*Cin, Cout) bf16  ((kh,kw,ci) rows)
    # b_ref: (1, Cout) f32          o_ref: (1, H, W, Cout) bf16
    # xpad_scr: (H+2, W+2, Cin) f32 -- zero-haloed copy of the input
    _, H, W, Cin = x_ref.shape
    Cout = o_ref.shape[-1]

    # Zero only the 1-px border (the interior is fully overwritten below).
    # Runs every grid step, so persistent scratch stays correct.
    zrow = jnp.zeros((1, W + 2, Cin), jnp.float32)
    zcol = jnp.zeros((H + 2, 1, Cin), jnp.float32)
    xpad_scr[0:1, :, :] = zrow
    xpad_scr[H + 1:H + 2, :, :] = zrow
    xpad_scr[:, 0:1, :] = zcol
    xpad_scr[:, W + 1:W + 2, :] = zcol
    xpad_scr[pl.ds(1, H), pl.ds(1, W), :] = x_ref[0].astype(jnp.float32)

    # im2col: 9 shifted patches concatenated along the contraction axis, then
    # ONE MXU matmul with K = 9*Cin (accumulation happens inside the MXU).
    patches = [xpad_scr[pl.ds(kh, H), pl.ds(kw, W), :]
               for kh in range(3) for kw in range(3)]        # 9 x (H, W, Cin)
    col = jnp.concatenate(patches, axis=-1)                  # (H, W, 9*Cin)
    acc = jnp.dot(col.reshape(H * W, 9 * Cin).astype(jnp.bfloat16), w_ref[...],
                  preferred_element_type=jnp.float32)        # (H*W, Cout)
    # Bias + Hardswish directly on the MXU accumulator.
    acc = _hardswish(acc + b_ref[...])
    o_ref[0] = acc.reshape(H, W, Cout).astype(o_ref.dtype)


def _down_block_kernel(x_ref, ew_ref, eb_ref, dw_ref, db_ref, pw_ref, pb_ref,
                       o_ref, e_scr):
    # Fused inverted-residual downsample for one batch element.
    # x_ref:  (1, Ho, 2, Wo, 2*Cin) bf16  -- free reshape of (1, H, W, Cin):
    #         x_ref[0, r, pi, c, pj*Cin+ch] == x[2r+pi, 2c+pj, ch]
    # ew_ref: (Cin, hid)  bf16   eb_ref: (1, hid)  f32
    # dw_ref: (9, hid)    f32    db_ref: (1, hid)  f32
    # pw_ref: (hid, Cout) bf16   pb_ref: (1, Cout) f32
    # o_ref:  (1, Ho, Wo, Cout) bf16
    # e_scr:  (4, Ho+1, Wo+1, hid) f32 -- expanded parity planes, top/left halo
    _, Ho, _, Wo, C2 = x_ref.shape
    Cin = C2 // 2
    hid = ew_ref.shape[-1]
    Cout = o_ref.shape[-1]

    # Zero only the halo (row 0 / col 0 of every parity plane), every step.
    e_scr[:, 0:1, :, :] = jnp.zeros((4, 1, Wo + 1, hid), jnp.float32)
    e_scr[:, :, 0:1, :] = jnp.zeros((4, Ho + 1, 1, hid), jnp.float32)

    # -- 1x1 expand + Hardswish, per input parity plane, resident in VMEM ----
    ew = ew_ref[...]
    eb = eb_ref[...]
    for pi in range(2):
        for pj in range(2):
            # Static scalar index on the H-parity dim + contiguous lane slice
            # on the W-parity dim: no strided access anywhere.
            xpl = x_ref[0, :, pi, :, pj * Cin:(pj + 1) * Cin]  # (Ho, Wo, Cin)
            a = jnp.dot(xpl.reshape(Ho * Wo, Cin), ew,
                        preferred_element_type=jnp.float32)
            a = _hardswish(a + eb)                            # on the MXU acc
            e_scr[2 * pi + pj, pl.ds(1, Ho), pl.ds(1, Wo), :] = (
                a.reshape(Ho, Wo, hid))

    # -- 3x3 depthwise conv, stride 2, pad 1, + Hardswish ---------------------
    # Output (oh, ow), tap (kh, kw) reads input (2*oh+kh-1, 2*ow+kw-1), i.e.
    # parity plane ((kh+1)%2, (kw+1)%2) at offset ((kh+1)//2, (kw+1)//2) in
    # the 0-haloed scratch: plain contiguous slices, no wasted MACs.
    dw = dw_ref[...]                                          # (9, hid)
    acc = jnp.zeros((Ho, Wo, hid), jnp.float32)
    for kh in range(3):
        pi, rh = (kh + 1) % 2, (kh + 1) // 2
        for kw in range(3):
            pj, rw = (kw + 1) % 2, (kw + 1) // 2
            k = 3 * kh + kw
            tap = e_scr[2 * pi + pj, pl.ds(rh, Ho), pl.ds(rw, Wo), :]
            acc = acc + tap * dw[k:k + 1]                     # (1, hid) bcast
    acc = _hardswish(acc + db_ref[...])

    # -- 1x1 linear projection (no activation) --------------------------------
    out = jnp.dot(acc.reshape(Ho * Wo, hid).astype(jnp.bfloat16), pw_ref[...],
                  preferred_element_type=jnp.float32)
    out = out + pb_ref[...]
    o_ref[0] = out.reshape(Ho, Wo, Cout).astype(o_ref.dtype)


# ------------------------------ op wrappers ---------------------------------

_VMEM_LIMIT = 64 * 1024 * 1024


def stem_conv(x, w, b):
    # x: (N, H, W, Cin) bf16;  w: (3, 3, Cin, Cout) f32;  b: (1, Cout) f32
    N, H, W, Cin = x.shape
    Cout = w.shape[-1]
    w9 = w.reshape(9 * Cin, Cout).astype(jnp.bfloat16)
    return pl.pallas_call(
        _stem_conv_kernel,
        out_shape=jax.ShapeDtypeStruct((N, H, W, Cout), jnp.bfloat16),
        grid=(N,),
        in_specs=[
            pl.BlockSpec((1, H, W, Cin), lambda n: (n, 0, 0, 0)),
            pl.BlockSpec((9 * Cin, Cout), lambda n: (0, 0)),
            pl.BlockSpec((1, Cout), lambda n: (0, 0)),
        ],
        out_specs=pl.BlockSpec((1, H, W, Cout), lambda n: (n, 0, 0, 0)),
        scratch_shapes=[pltpu.VMEM((H + 2, W + 2, Cin), jnp.float32)],
        compiler_params=pltpu.CompilerParams(
            dimension_semantics=("parallel",),
            vmem_limit_bytes=_VMEM_LIMIT),
    )(x.astype(jnp.bfloat16), w9, b)


def down_block(x, blk):
    # x: (N, H, W, Cin) bf16 -> (N, H//2, W//2, Cout) bf16, fused:
    #   1x1 expand + hardswish -> 3x3 dw stride-2 + hardswish -> 1x1 project.
    N, H, W, Cin = x.shape
    assert H % 2 == 0 and W % 2 == 0, (H, W)
    Ho, Wo = H // 2, W // 2
    hid = blk["exp_w"].shape[-1]
    Cout = blk["proj_w"].shape[-1]

    # FREE (copy-less, row-major) reshape replacing the old HBM transpose:
    # x5[n, r, pi, c, pj*Cin+ch] == x[n, 2r+pi, 2c+pj, ch].
    x5 = x.reshape(N, Ho, 2, Wo, 2 * Cin)

    return pl.pallas_call(
        _down_block_kernel,
        out_shape=jax.ShapeDtypeStruct((N, Ho, Wo, Cout), jnp.bfloat16),
        grid=(N,),
        in_specs=[
            pl.BlockSpec((1, Ho, 2, Wo, 2 * Cin), lambda n: (n, 0, 0, 0, 0)),
            pl.BlockSpec((Cin, hid), lambda n: (0, 0)),
            pl.BlockSpec((1, hid), lambda n: (0, 0)),
            pl.BlockSpec((9, hid), lambda n: (0, 0)),
            pl.BlockSpec((1, hid), lambda n: (0, 0)),
            pl.BlockSpec((hid, Cout), lambda n: (0, 0)),
            pl.BlockSpec((1, Cout), lambda n: (0, 0)),
        ],
        out_specs=pl.BlockSpec((1, Ho, Wo, Cout), lambda n: (n, 0, 0, 0)),
        scratch_shapes=[pltpu.VMEM((4, Ho + 1, Wo + 1, hid), jnp.float32)],
        compiler_params=pltpu.CompilerParams(
            dimension_semantics=("parallel",),
            vmem_limit_bytes=_VMEM_LIMIT),
    )(x5.astype(jnp.bfloat16),
      blk["exp_w"].astype(jnp.bfloat16), blk["exp_b"],
      blk["dw_w"].reshape(9, hid), blk["dw_b"],
      blk["proj_w"].astype(jnp.bfloat16), blk["proj_b"])


# ----------------------------- Encoder forward ------------------------------

@jax.jit
def encoder_forward(x_nchw, params):
    # NCHW (PyTorch) -> NHWC once at the boundary; bf16 activations between
    # kernels; no per-block layout passes (parity split is a free reshape).
    x = jnp.transpose(x_nchw, (0, 2, 3, 1)).astype(jnp.bfloat16)
    x = stem_conv(x, params["stem"]["w"], params["stem"]["b"])
    for blk in params["blocks"]:
        x = down_block(x, blk)
    return jnp.transpose(x, (0, 3, 1, 2)).astype(jnp.float32)  # back to NCHW


# ----------------------------- parameters ------------------------------------

def init_params(key, img_channels, down_channels, expand_factor):
    def he_uniform(k, shape, fan_in):
        bound = (6.0 / fan_in) ** 0.5
        return jax.random.uniform(k, shape, jnp.float32, -bound, bound)

    keys = iter(jax.random.split(key, 64))
    c0 = down_channels[0] // 2
    params = {
        "stem": {
            "w": he_uniform(next(keys), (3, 3, img_channels, c0), 9 * img_channels),
            "b": jnp.ones((1, c0), jnp.float32),  # ones_(bias) per _reset_parameters
        },
        "blocks": [],
    }
    in_c = c0
    for out_c in down_channels:
        hid = in_c * expand_factor
        params["blocks"].append({
            "exp_w": he_uniform(next(keys), (in_c, hid), in_c),
            "exp_b": jnp.zeros((1, hid), jnp.float32),
            "dw_w": he_uniform(next(keys), (3, 3, 1, hid), 9),
            "dw_b": jnp.zeros((1, hid), jnp.float32),
            "proj_w": he_uniform(next(keys), (hid, out_c), hid),
            "proj_b": jnp.zeros((1, out_c), jnp.float32),
        })
        in_c = out_c
    return params


# ----------------------------- pure-JAX reference ----------------------------

def ref_forward(x_nchw, params):
    # Pure-XLA reference mirroring the kernel's precision choices
    # (bf16 MXU operands, f32 accumulation, f32 depthwise + hardswish).
    x = jnp.transpose(x_nchw, (0, 2, 3, 1)).astype(jnp.bfloat16)

    def conv(x, w, b, stride, groups):
        dn = lax.conv_dimension_numbers(x.shape, w.shape, ("NHWC", "HWIO", "NHWC"))
        y = lax.conv_general_dilated(
            x, w, (stride, stride), ((1, 1), (1, 1)), dimension_numbers=dn,
            feature_group_count=groups, preferred_element_type=jnp.float32,
            precision=lax.Precision.HIGHEST)
        return y + b.reshape(1, 1, 1, -1)

    h = _hardswish(conv(x, params["stem"]["w"].astype(jnp.bfloat16),
                        params["stem"]["b"], 1, 1))
    x = h.astype(jnp.bfloat16)
    for blk in params["blocks"]:
        e = _hardswish(
            jnp.einsum("nhwc,cd->nhwd", x, blk["exp_w"].astype(jnp.bfloat16),
                       preferred_element_type=jnp.float32)
            + blk["exp_b"].reshape(1, 1, 1, -1))
        d = _hardswish(conv(e, blk["dw_w"], blk["dw_b"], 2, e.shape[-1]))
        p = (jnp.einsum("nhwc,cd->nhwd", d.astype(jnp.bfloat16),
                        blk["proj_w"].astype(jnp.bfloat16),
                        preferred_element_type=jnp.float32)
             + blk["proj_b"].reshape(1, 1, 1, -1))
        x = p.astype(jnp.bfloat16)
    return jnp.transpose(x, (0, 3, 1, 2)).astype(jnp.float32)


if __name__ == "__main__":
    img_channels = 4
    down_channels = (8, 16)
    expand_factor = 2

    x = jax.random.normal(jax.random.PRNGKey(0),
                          (2, img_channels, 16, 16), jnp.float32)
    params = init_params(jax.random.PRNGKey(1), img_channels, down_channels,
                         expand_factor)

    y = jax.block_until_ready(encoder_forward(x, params))
    assert y.shape == (2, down_channels[-1], 4, 4), y.shape

    y_ref = jax.block_until_ready(ref_forward(x, params))
    err = float(jnp.max(jnp.abs(y - y_ref)))
    assert jnp.allclose(y, y_ref, rtol=2e-2, atol=2e-2), err

    print("KERNEL_OK")
</pallas_src>

<mosaic_0001>
module attributes {stable_mosaic.version = 11 : i64} {
  func.func @_stem_conv_kernel(%arg0: i32, %arg1: memref<1x16x16x4xbf16, #tpu.memory_space<vmem>>, %arg2: memref<36x4xbf16, #tpu.memory_space<vmem>>, %arg3: memref<1x4xf32, #tpu.memory_space<vmem>>, %arg4: memref<1x16x16x4xbf16, #tpu.memory_space<vmem>>, %arg5: memref<18x18x4xf32, #tpu.memory_space<vmem>>) attributes {dimension_semantics = [#tpu.dimension_semantics<parallel>], iteration_bounds = array<i64: 2>, scalar_prefetch = 0 : i64, scratch_operands = 1 : i64, tpu.core_type = #tpu.core_type<tc>, window_params = [{transform_indices = @transform_0, window_bounds = array<i64: 1, 16, 16, 4>}, {pipeline_mode = #tpu.pipeline_mode<synchronous>, transform_indices = @transform_1, window_bounds = array<i64: 36, 4>}, {pipeline_mode = #tpu.pipeline_mode<synchronous>, transform_indices = @transform_2, window_bounds = array<i64: 1, 4>}, {transform_indices = @transform_3, window_bounds = array<i64: 1, 16, 16, 4>}]} {
    %cst = arith.constant 0.000000e+00 : f32
    %0 = vector.broadcast %cst : f32 to vector<1x18x4xf32>
    %cst_0 = arith.constant 0.000000e+00 : f32
    %1 = vector.broadcast %cst_0 : f32 to vector<18x1x4xf32>
    %c0 = arith.constant 0 : index
    %c0_1 = arith.constant 0 : index
    %c0_2 = arith.constant 0 : index
    %2 = vector.load %arg5[%c0, %c0_1, %c0_2] : memref<18x18x4xf32, #tpu.memory_space<vmem>>, vector<1x18x4xf32>
    tpu.vector_store %arg5[%c0, %c0_1, %c0_2], %0 {strides = array<i32>} : memref<18x18x4xf32, #tpu.memory_space<vmem>>, vector<1x18x4xf32>,
    %c17 = arith.constant 17 : index
    %c0_3 = arith.constant 0 : index
    %c0_4 = arith.constant 0 : index
    %3 = vector.load %arg5[%c17, %c0_3, %c0_4] : memref<18x18x4xf32, #tpu.memory_space<vmem>>, vector<1x18x4xf32>
    tpu.vector_store %arg5[%c17, %c0_3, %c0_4], %0 {strides = array<i32>} : memref<18x18x4xf32, #tpu.memory_space<vmem>>, vector<1x18x4xf32>,
    %c0_5 = arith.constant 0 : index
    %c0_6 = arith.constant 0 : index
    %c0_7 = arith.constant 0 : index
    %4 = vector.load %arg5[%c0_5, %c0_6, %c0_7] : memref<18x18x4xf32, #tpu.memory_space<vmem>>, vector<18x1x4xf32>
    tpu.vector_store %arg5[%c0_5, %c0_6, %c0_7], %1 {strides = array<i32>} : memref<18x18x4xf32, #tpu.memory_space<vmem>>, vector<18x1x4xf32>,
    %c0_8 = arith.constant 0 : index
    %c17_9 = arith.constant 17 : index
    %c0_10 = arith.constant 0 : index
    %5 = vector.load %arg5[%c0_8, %c17_9, %c0_10] : memref<18x18x4xf32, #tpu.memory_space<vmem>>, vector<18x1x4xf32>
    tpu.vector_store %arg5[%c0_8, %c17_9, %c0_10], %1 {strides = array<i32>} : memref<18x18x4xf32, #tpu.memory_space<vmem>>, vector<18x1x4xf32>,
    %c0_11 = arith.constant 0 : index
    %c0_12 = arith.constant 0 : index
    %c0_13 = arith.constant 0 : index
    %c0_14 = arith.constant 0 : index
    %6 = vector.load %arg1[%c0_11, %c0_12, %c0_13, %c0_14] : memref<1x16x16x4xbf16, #tpu.memory_space<vmem>>, vector<1x16x16x4xbf16>
    %7 = vector.shape_cast %6 : vector<1x16x16x4xbf16> to vector<16x16x4xbf16>
    %8 = arith.extf %7 : vector<16x16x4xbf16> to vector<16x16x4xf32>
    %c1 = arith.constant 1 : index
    %c1_15 = arith.constant 1 : index
    %c0_16 = arith.constant 0 : index
    %9 = vector.load %arg5[%c1, %c1_15, %c0_16] : memref<18x18x4xf32, #tpu.memory_space<vmem>>, vector<16x16x4xf32>
    tpu.vector_store %arg5[%c1, %c1_15, %c0_16], %8 {strides = array<i32>} : memref<18x18x4xf32, #tpu.memory_space<vmem>>, vector<16x16x4xf32>,
    %c0_17 = arith.constant 0 : index
    %c0_18 = arith.constant 0 : index
    %c0_19 = arith.constant 0 : index
    %10 = vector.load %arg5[%c0_17, %c0_18, %c0_19] : memref<18x18x4xf32, #tpu.memory_space<vmem>>, vector<16x16x4xf32>
    %c0_20 = arith.constant 0 : index
    %c1_21 = arith.constant 1 : index
    %c0_22 = arith.constant 0 : index
    %11 = vector.load %arg5[%c0_20, %c1_21, %c0_22] : memref<18x18x4xf32, #tpu.memory_space<vmem>>, vector<16x16x4xf32>
    %c0_23 = arith.constant 0 : index
    %c2 = arith.constant 2 : index
    %c0_24 = arith.constant 0 : index
    %12 = vector.load %arg5[%c0_23, %c2, %c0_24] : memref<18x18x4xf32, #tpu.memory_space<vmem>>, vector<16x16x4xf32>
    %c1_25 = arith.constant 1 : index
    %c0_26 = arith.constant 0 : index
    %c0_27 = arith.constant 0 : index
    %13 = vector.load %arg5[%c1_25, %c0_26, %c0_27] : memref<18x18x4xf32, #tpu.memory_space<vmem>>, vector<16x16x4xf32>
    %c1_28 = arith.constant 1 : index
    %c1_29 = arith.constant 1 : index
    %c0_30 = arith.constant 0 : index
    %14 = vector.load %arg5[%c1_28, %c1_29, %c0_30] : memref<18x18x4xf32, #tpu.memory_space<vmem>>, vector<16x16x4xf32>
    %c1_31 = arith.constant 1 : index
    %c2_32 = arith.constant 2 : index
    %c0_33 = arith.constant 0 : index
    %15 = vector.load %arg5[%c1_31, %c2_32, %c0_33] : memref<18x18x4xf32, #tpu.memory_space<vmem>>, vector<16x16x4xf32>
    %c2_34 = arith.constant 2 : index
    %c0_35 = arith.constant 0 : index
    %c0_36 = arith.constant 0 : index
    %16 = vector.load %arg5[%c2_34, %c0_35, %c0_36] : memref<18x18x4xf32, #tpu.memory_space<vmem>>, vector<16x16x4xf32>
    %c2_37 = arith.constant 2 : index
    %c1_38 = arith.constant 1 : index
    %c0_39 = arith.constant 0 : index
    %17 = vector.load %arg5[%c2_37, %c1_38, %c0_39] : memref<18x18x4xf32, #tpu.memory_space<vmem>>, vector<16x16x4xf32>
    %c2_40 = arith.constant 2 : index
    %c2_41 = arith.constant 2 : index
    %c0_42 = arith.constant 0 : index
    %18 = vector.load %arg5[%c2_40, %c2_41, %c0_42] : memref<18x18x4xf32, #tpu.memory_space<vmem>>, vector<16x16x4xf32>
    %19 = tpu.concatenate %10, %11, %12, %13, %14, %15, %16, %17, %18 in 2 : vector<16x16x4xf32>, vector<16x16x4xf32>, vector<16x16x4xf32>, vector<16x16x4xf32>, vector<16x16x4xf32>, vector<16x16x4xf32>, vector<16x16x4xf32>, vector<16x16x4xf32>, vector<16x16x4xf32> -> vector<16x16x36xf32>
    %20 = vector.shape_cast %19 : vector<16x16x36xf32> to vector<256x36xf32>
    %21 = arith.truncf %20 : vector<256x36xf32> to vector<256x36xbf16>
    %c0_43 = arith.constant 0 : index
    %c0_44 = arith.constant 0 : index
    %22 = vector.load %arg2[%c0_43, %c0_44] : memref<36x4xbf16, #tpu.memory_space<vmem>>, vector<36x4xbf16>
    %cst_45 = arith.constant dense<0.000000e+00> : vector<256x4xf32>
    %23 = tpu.matmul %21, %22, %cst_45 {dimension_numbers = #tpu.dot_dimension_numbers<[1], [0], [0], [1], [0, 0, 1, 1], [], []>} : vector<256x36xbf16>, vector<36x4xbf16>, vector<256x4xf32> -> vector<256x4xf32>
    %c0_46 = arith.constant 0 : index
    %c0_47 = arith.constant 0 : index
    %24 = vector.load %arg3[%c0_46, %c0_47] : memref<1x4xf32, #tpu.memory_space<vmem>>, vector<1x4xf32>
    %25 = vector.broadcast %24 : vector<1x4xf32> to vector<256x4xf32>
    %26 = arith.addf %23, %25 : vector<256x4xf32>
    %cst_48 = arith.constant 3.000000e+00 : f32
    %27 = vector.broadcast %cst_48 : f32 to vector<256x4xf32>
    %28 = arith.addf %26, %27 : vector<256x4xf32>
    %cst_49 = arith.constant 0.000000e+00 : f32
    %cst_50 = arith.constant 6.000000e+00 : f32
    %29 = vector.broadcast %cst_49 : f32 to vector<256x4xf32>
    %30 = arith.maximumf %29, %28 : vector<256x4xf32>
    %31 = vector.broadcast %cst_50 : f32 to vector<256x4xf32>
    %32 = arith.minimumf %31, %30 : vector<256x4xf32>
    %33 = arith.mulf %26, %32 : vector<256x4xf32>
    %cst_51 = arith.constant 0.166666672 : f32
    %34 = vector.broadcast %cst_51 : f32 to vector<256x4xf32>
    %35 = arith.mulf %33, %34 : vector<256x4xf32>
    %36 = vector.shape_cast %35 : vector<256x4xf32> to vector<16x16x4xf32>
    %37 = arith.truncf %36 : vector<16x16x4xf32> to vector<16x16x4xbf16>
    %c0_52 = arith.constant 0 : index
    %c0_53 = arith.constant 0 : index
    %c0_54 = arith.constant 0 : index
    %c0_55 = arith.constant 0 : index
    %38 = vector.load %arg4[%c0_52, %c0_53, %c0_54, %c0_55] : memref<1x16x16x4xbf16, #tpu.memory_space<vmem>>, vector<1x16x16x4xbf16>
    %39 = vector.shape_cast %38 : vector<1x16x16x4xbf16> to vector<16x16x4xbf16>
    %40 = vector.shape_cast %37 : vector<16x16x4xbf16> to vector<1x16x16x4xbf16>
    tpu.vector_store %arg4[%c0_52, %c0_53, %c0_54, %c0_55], %40 {strides = array<i32>} : memref<1x16x16x4xbf16, #tpu.memory_space<vmem>>, vector<1x16x16x4xbf16>,
    return
  }
  func.func @transform_0(%arg0: i32) -> (i32, i32, i32, i32) {
    %c0_i32 = arith.constant 0 : i32
    %c0_i32_0 = arith.constant 0 : i32
    %c0_i32_1 = arith.constant 0 : i32
    %c0_i32_2 = arith.constant 0 : i32
    return %arg0, %c0_i32, %c0_i32_0, %c0_i32_1 : i32, i32, i32, i32
  }
  func.func @transform_1(%arg0: i32) -> (i32, i32) {
    %c0_i32 = arith.constant 0 : i32
    %c0_i32_0 = arith.constant 0 : i32
    %c0_i32_1 = arith.constant 0 : i32
    return %c0_i32, %c0_i32_0 : i32, i32
  }
  func.func @transform_2(%arg0: i32) -> (i32, i32) {
    %c0_i32 = arith.constant 0 : i32
    %c0_i32_0 = arith.constant 0 : i32
    %c0_i32_1 = arith.constant 0 : i32
    return %c0_i32, %c0_i32_0 : i32, i32
  }
  func.func @transform_3(%arg0: i32) -> (i32, i32, i32, i32) {
    %c0_i32 = arith.constant 0 : i32
    %c0_i32_0 = arith.constant 0 : i32
    %c0_i32_1 = arith.constant 0 : i32
    %c0_i32_2 = arith.constant 0 : i32
    return %arg0, %c0_i32, %c0_i32_0, %c0_i32_1 : i32, i32, i32, i32
  }
}

module attributes {stable_mosaic.version = 11 : i64} {
  func.func @_down_block_kernel(%arg0: i32, %arg1: memref<1x8x2x8x8xbf16, #tpu.memory_space<vmem>>, %arg2: memref<4x8xbf16, #tpu.memory_space<vmem>>, %arg3: memref<1x8xf32, #tpu.memory_space<vmem>>, %arg4: memref<9x8xf32, #tpu.memory_space<vmem>>, %arg5: memref<1x8xf32, #tpu.memory_space<vmem>>, %arg6: memref<8x8xbf16, #tpu.memory_space<vmem>>, %arg7: memref<1x8xf32, #tpu.memory_space<vmem>>, %arg8: memref<1x8x8x8xbf16, #tpu.memory_space<vmem>>, %arg9: memref<4x9x9x8xf32, #tpu.memory_space<vmem>>) attributes {dimension_semantics = [#tpu.dimension_semantics<parallel>], iteration_bounds = array<i64: 2>, scalar_prefetch = 0 : i64, scratch_operands = 1 : i64, tpu.core_type = #tpu.core_type<tc>, window_params = [{transform_indices = @transform_0, window_bounds = array<i64: 1, 8, 2, 8, 8>}, {pipeline_mode = #tpu.pipeline_mode<synchronous>, transform_indices = @transform_1, window_bounds = array<i64: 4, 8>}, {pipeline_mode = #tpu.pipeline_mode<synchronous>, transform_indices = @transform_2, window_bounds = array<i64: 1, 8>}, {pipeline_mode = #tpu.pipeline_mode<synchronous>, transform_indices = @transform_3, window_bounds = array<i64: 9, 8>}, {pipeline_mode = #tpu.pipeline_mode<synchronous>, transform_indices = @transform_4, window_bounds = array<i64: 1, 8>}, {pipeline_mode = #tpu.pipeline_mode<synchronous>, transform_indices = @transform_5, window_bounds = array<i64: 8, 8>}, {pipeline_mode = #tpu.pipeline_mode<synchronous>, transform_indices = @transform_6, window_bounds = array<i64: 1, 8>}, {transform_indices = @transform_7, window_bounds = array<i64: 1, 8, 8, 8>}]} {
    %cst = arith.constant 0.000000e+00 : f32
    %0 = vector.broadcast %cst : f32 to vector<4x1x9x8xf32>
    %c0 = arith.constant 0 : index
    %c0_0 = arith.constant 0 : index
    %c0_1 = arith.constant 0 : index
    %c0_2 = arith.constant 0 : index
    %1 = vector.load %arg9[%c0, %c0_0, %c0_1, %c0_2] : memref<4x9x9x8xf32, #tpu.memory_space<vmem>>, vector<4x1x9x8xf32>
    tpu.vector_store %arg9[%c0, %c0_0, %c0_1, %c0_2], %0 {strides = array<i32>} : memref<4x9x9x8xf32, #tpu.memory_space<vmem>>, vector<4x1x9x8xf32>,
    %cst_3 = arith.constant 0.000000e+00 : f32
    %2 = vector.broadcast %cst_3 : f32 to vector<4x9x1x8xf32>
    %c0_4 = arith.constant 0 : index
    %c0_5 = arith.constant 0 : index
    %c0_6 = arith.constant 0 : index
    %c0_7 = arith.constant 0 : index
    %3 = vector.load %arg9[%c0_4, %c0_5, %c0_6, %c0_7] : memref<4x9x9x8xf32, #tpu.memory_space<vmem>>, vector<4x9x1x8xf32>
    tpu.vector_store %arg9[%c0_4, %c0_5, %c0_6, %c0_7], %2 {strides = array<i32>} : memref<4x9x9x8xf32, #tpu.memory_space<vmem>>, vector<4x9x1x8xf32>,
    %c0_8 = arith.constant 0 : index
    %c0_9 = arith.constant 0 : index
    %4 = vector.load %arg2[%c0_8, %c0_9] : memref<4x8xbf16, #tpu.memory_space<vmem>>, vector<4x8xbf16>
    %c0_10 = arith.constant 0 : index
    %c0_11 = arith.constant 0 : index
    %5 = vector.load %arg3[%c0_10, %c0_11] : memref<1x8xf32, #tpu.memory_space<vmem>>, vector<1x8xf32>
    %c0_12 = arith.constant 0 : index
    %c0_13 = arith.constant 0 : index
    %c0_14 = arith.constant 0 : index
    %c0_15 = arith.constant 0 : index
    %c0_16 = arith.constant 0 : index
    %6 = vector.load %arg1[%c0_12, %c0_13, %c0_14, %c0_15, %c0_16] : memref<1x8x2x8x8xbf16, #tpu.memory_space<vmem>>, vector<1x8x1x8x4xbf16>
    %7 = vector.shape_cast %6 : vector<1x8x1x8x4xbf16> to vector<8x8x4xbf16>
    %8 = vector.shape_cast %7 : vector<8x8x4xbf16> to vector<64x4xbf16>
    %cst_17 = arith.constant dense<0.000000e+00> : vector<64x8xf32>
    %9 = tpu.matmul %8, %4, %cst_17 {dimension_numbers = #tpu.dot_dimension_numbers<[1], [0], [0], [1], [0, 0, 1, 1], [], []>} : vector<64x4xbf16>, vector<4x8xbf16>, vector<64x8xf32> -> vector<64x8xf32>
    %10 = vector.broadcast %5 : vector<1x8xf32> to vector<64x8xf32>
    %11 = arith.addf %9, %10 : vector<64x8xf32>
    %cst_18 = arith.constant 3.000000e+00 : f32
    %12 = vector.broadcast %cst_18 : f32 to vector<64x8xf32>
    %13 = arith.addf %11, %12 : vector<64x8xf32>
    %cst_19 = arith.constant 0.000000e+00 : f32
    %cst_20 = arith.constant 6.000000e+00 : f32
    %14 = vector.broadcast %cst_19 : f32 to vector<64x8xf32>
    %15 = arith.maximumf %14, %13 : vector<64x8xf32>
    %16 = vector.broadcast %cst_20 : f32 to vector<64x8xf32>
    %17 = arith.minimumf %16, %15 : vector<64x8xf32>
    %18 = arith.mulf %11, %17 : vector<64x8xf32>
    %cst_21 = arith.constant 0.166666672 : f32
    %19 = vector.broadcast %cst_21 : f32 to vector<64x8xf32>
    %20 = arith.mulf %18, %19 : vector<64x8xf32>
    %21 = vector.shape_cast %20 : vector<64x8xf32> to vector<8x8x8xf32>
    %c0_22 = arith.constant 0 : index
    %c1 = arith.constant 1 : index
    %c1_23 = arith.constant 1 : index
    %c0_24 = arith.constant 0 : index
    %22 = vector.load %arg9[%c0_22, %c1, %c1_23, %c0_24] : memref<4x9x9x8xf32, #tpu.memory_space<vmem>>, vector<1x8x8x8xf32>
    %23 = vector.shape_cast %22 : vector<1x8x8x8xf32> to vector<8x8x8xf32>
    %24 = vector.shape_cast %21 : vector<8x8x8xf32> to vector<1x8x8x8xf32>
    tpu.vector_store %arg9[%c0_22, %c1, %c1_23, %c0_24], %24 {strides = array<i32>} : memref<4x9x9x8xf32, #tpu.memory_space<vmem>>, vector<1x8x8x8xf32>,
    %c0_25 = arith.constant 0 : index
    %c0_26 = arith.constant 0 : index
    %c0_27 = arith.constant 0 : index
    %c0_28 = arith.constant 0 : index
    %c4 = arith.constant 4 : index
    %25 = vector.load %arg1[%c0_25, %c0_26, %c0_27, %c0_28, %c4] : memref<1x8x2x8x8xbf16, #tpu.memory_space<vmem>>, vector<1x8x1x8x4xbf16>
    %26 = vector.shape_cast %25 : vector<1x8x1x8x4xbf16> to vector<8x8x4xbf16>
    %27 = vector.shape_cast %26 : vector<8x8x4xbf16> to vector<64x4xbf16>
    %cst_29 = arith.constant dense<0.000000e+00> : vector<64x8xf32>
    %28 = tpu.matmul %27, %4, %cst_29 {dimension_numbers = #tpu.dot_dimension_numbers<[1], [0], [0], [1], [0, 0, 1, 1], [], []>} : vector<64x4xbf16>, vector<4x8xbf16>, vector<64x8xf32> -> vector<64x8xf32>
    %29 = vector.broadcast %5 : vector<1x8xf32> to vector<64x8xf32>
    %30 = arith.addf %28, %29 : vector<64x8xf32>
    %cst_30 = arith.constant 3.000000e+00 : f32
    %31 = vector.broadcast %cst_30 : f32 to vector<64x8xf32>
    %32 = arith.addf %30, %31 : vector<64x8xf32>
    %cst_31 = arith.constant 0.000000e+00 : f32
    %cst_32 = arith.constant 6.000000e+00 : f32
    %33 = vector.broadcast %cst_31 : f32 to vector<64x8xf32>
    %34 = arith.maximumf %33, %32 : vector<64x8xf32>
    %35 = vector.broadcast %cst_32 : f32 to vector<64x8xf32>
    %36 = arith.minimumf %35, %34 : vector<64x8xf32>
    %37 = arith.mulf %30, %36 : vector<64x8xf32>
    %cst_33 = arith.constant 0.166666672 : f32
    %38 = vector.broadcast %cst_33 : f32 to vector<64x8xf32>
    %39 = arith.mulf %37, %38 : vector<64x8xf32>
    %40 = vector.shape_cast %39 : vector<64x8xf32> to vector<8x8x8xf32>
    %c1_34 = arith.constant 1 : index
    %c1_35 = arith.constant 1 : index
    %c1_36 = arith.constant 1 : index
    %c0_37 = arith.constant 0 : index
    %41 = vector.load %arg9[%c1_34, %c1_35, %c1_36, %c0_37] : memref<4x9x9x8xf32, #tpu.memory_space<vmem>>, vector<1x8x8x8xf32>
    %42 = vector.shape_cast %41 : vector<1x8x8x8xf32> to vector<8x8x8xf32>
    %43 = vector.shape_cast %40 : vector<8x8x8xf32> to vector<1x8x8x8xf32>
    tpu.vector_store %arg9[%c1_34, %c1_35, %c1_36, %c0_37], %43 {strides = array<i32>} : memref<4x9x9x8xf32, #tpu.memory_space<vmem>>, vector<1x8x8x8xf32>,
    %c0_38 = arith.constant 0 : index
    %c0_39 = arith.constant 0 : index
    %c1_40 = arith.constant 1 : index
    %c0_41 = arith.constant 0 : index
    %c0_42 = arith.constant 0 : index
    %44 = vector.load %arg1[%c0_38, %c0_39, %c1_40, %c0_41, %c0_42] : memref<1x8x2x8x8xbf16, #tpu.memory_space<vmem>>, vector<1x8x1x8x4xbf16>
    %45 = vector.shape_cast %44 : vector<1x8x1x8x4xbf16> to vector<8x8x4xbf16>
    %46 = vector.shape_cast %45 : vector<8x8x4xbf16> to vector<64x4xbf16>
    %cst_43 = arith.constant dense<0.000000e+00> : vector<64x8xf32>
    %47 = tpu.matmul %46, %4, %cst_43 {dimension_numbers = #tpu.dot_dimension_numbers<[1], [0], [0], [1], [0, 0, 1, 1], [], []>} : vector<64x4xbf16>, vector<4x8xbf16>, vector<64x8xf32> -> vector<64x8xf32>
    %48 = vector.broadcast %5 : vector<1x8xf32> to vector<64x8xf32>
    %49 = arith.addf %47, %48 : vector<64x8xf32>
    %cst_44 = arith.constant 3.000000e+00 : f32
    %50 = vector.broadcast %cst_44 : f32 to vector<64x8xf32>
    %51 = arith.addf %49, %50 : vector<64x8xf32>
    %cst_45 = arith.constant 0.000000e+00 : f32
    %cst_46 = arith.constant 6.000000e+00 : f32
    %52 = vector.broadcast %cst_45 : f32 to vector<64x8xf32>
    %53 = arith.maximumf %52, %51 : vector<64x8xf32>
    %54 = vector.broadcast %cst_46 : f32 to vector<64x8xf32>
    %55 = arith.minimumf %54, %53 : vector<64x8xf32>
    %56 = arith.mulf %49, %55 : vector<64x8xf32>
    %cst_47 = arith.constant 0.166666672 : f32
    %57 = vector.broadcast %cst_47 : f32 to vector<64x8xf32>
    %58 = arith.mulf %56, %57 : vector<64x8xf32>
    %59 = vector.shape_cast %58 : vector<64x8xf32> to vector<8x8x8xf32>
    %c2 = arith.constant 2 : index
    %c1_48 = arith.constant 1 : index
    %c1_49 = arith.constant 1 : index
    %c0_50 = arith.constant 0 : index
    %60 = vector.load %arg9[%c2, %c1_48, %c1_49, %c0_50] : memref<4x9x9x8xf32, #tpu.memory_space<vmem>>, vector<1x8x8x8xf32>
    %61 = vector.shape_cast %60 : vector<1x8x8x8xf32> to vector<8x8x8xf32>
    %62 = vector.shape_cast %59 : vector<8x8x8xf32> to vector<1x8x8x8xf32>
    tpu.vector_store %arg9[%c2, %c1_48, %c1_49, %c0_50], %62 {strides = array<i32>} : memref<4x9x9x8xf32, #tpu.memory_space<vmem>>, vector<1x8x8x8xf32>,
    %c0_51 = arith.constant 0 : index
    %c0_52 = arith.constant 0 : index
    %c1_53 = arith.constant 1 : index
    %c0_54 = arith.constant 0 : index
    %c4_55 = arith.constant 4 : index
    %63 = vector.load %arg1[%c0_51, %c0_52, %c1_53, %c0_54, %c4_55] : memref<1x8x2x8x8xbf16, #tpu.memory_space<vmem>>, vector<1x8x1x8x4xbf16>
    %64 = vector.shape_cast %63 : vector<1x8x1x8x4xbf16> to vector<8x8x4xbf16>
    %65 = vector.shape_cast %64 : vector<8x8x4xbf16> to vector<64x4xbf16>
    %cst_56 = arith.constant dense<0.000000e+00> : vector<64x8xf32>
    %66 = tpu.matmul %65, %4, %cst_56 {dimension_numbers = #tpu.dot_dimension_numbers<[1], [0], [0], [1], [0, 0, 1, 1], [], []>} : vector<64x4xbf16>, vector<4x8xbf16>, vector<64x8xf32> -> vector<64x8xf32>
    %67 = vector.broadcast %5 : vector<1x8xf32> to vector<64x8xf32>
    %68 = arith.addf %66, %67 : vector<64x8xf32>
    %cst_57 = arith.constant 3.000000e+00 : f32
    %69 = vector.broadcast %cst_57 : f32 to vector<64x8xf32>
    %70 = arith.addf %68, %69 : vector<64x8xf32>
    %cst_58 = arith.constant 0.000000e+00 : f32
    %cst_59 = arith.constant 6.000000e+00 : f32
    %71 = vector.broadcast %cst_58 : f32 to vector<64x8xf32>
    %72 = arith.maximumf %71, %70 : vector<64x8xf32>
    %73 = vector.broadcast %cst_59 : f32 to vector<64x8xf32>
    %74 = arith.minimumf %73, %72 : vector<64x8xf32>
    %75 = arith.mulf %68, %74 : vector<64x8xf32>
    %cst_60 = arith.constant 0.166666672 : f32
    %76 = vector.broadcast %cst_60 : f32 to vector<64x8xf32>
    %77 = arith.mulf %75, %76 : vector<64x8xf32>
    %78 = vector.shape_cast %77 : vector<64x8xf32> to vector<8x8x8xf32>
    %c3 = arith.constant 3 : index
    %c1_61 = arith.constant 1 : index
    %c1_62 = arith.constant 1 : index
    %c0_63 = arith.constant 0 : index
    %79 = vector.load %arg9[%c3, %c1_61, %c1_62, %c0_63] : memref<4x9x9x8xf32, #tpu.memory_space<vmem>>, vector<1x8x8x8xf32>
    %80 = vector.shape_cast %79 : vector<1x8x8x8xf32> to vector<8x8x8xf32>
    %81 = vector.shape_cast %78 : vector<8x8x8xf32> to vector<1x8x8x8xf32>
    tpu.vector_store %arg9[%c3, %c1_61, %c1_62, %c0_63], %81 {strides = array<i32>} : memref<4x9x9x8xf32, #tpu.memory_space<vmem>>, vector<1x8x8x8xf32>,
    %c0_64 = arith.constant 0 : index
    %c0_65 = arith.constant 0 : index
    %82 = vector.load %arg4[%c0_64, %c0_65] : memref<9x8xf32, #tpu.memory_space<vmem>>, vector<9x8xf32>
    %cst_66 = arith.constant 0.000000e+00 : f32
    %83 = vector.broadcast %cst_66 : f32 to vector<8x8x8xf32>
    %c3_67 = arith.constant 3 : index
    %c0_68 = arith.constant 0 : index
    %c0_69 = arith.constant 0 : index
    %c0_70 = arith.constant 0 : index
    %84 = vector.load %arg9[%c3_67, %c0_68, %c0_69, %c0_70] : memref<4x9x9x8xf32, #tpu.memory_space<vmem>>, vector<1x8x8x8xf32>
    %85 = vector.shape_cast %84 : vector<1x8x8x8xf32> to vector<8x8x8xf32>
    %86 = vector.extract_strided_slice %82 {offsets = [0, 0], sizes = [1, 8], strides = [1, 1]} : vector<9x8xf32> to vector<1x8xf32>
    %87 = vector.shape_cast %86 : vector<1x8xf32> to vector<1x1x8xf32>
    %88 = vector.broadcast %87 : vector<1x1x8xf32> to vector<8x8x8xf32>
    %89 = arith.mulf %85, %88 : vector<8x8x8xf32>
    %90 = arith.addf %83, %89 : vector<8x8x8xf32>
    %c2_71 = arith.constant 2 : index
    %c0_72 = arith.constant 0 : index
    %c1_73 = arith.constant 1 : index
    %c0_74 = arith.constant 0 : index
    %91 = vector.load %arg9[%c2_71, %c0_72, %c1_73, %c0_74] : memref<4x9x9x8xf32, #tpu.memory_space<vmem>>, vector<1x8x8x8xf32>
    %92 = vector.shape_cast %91 : vector<1x8x8x8xf32> to vector<8x8x8xf32>
    %93 = vector.extract_strided_slice %82 {offsets = [1, 0], sizes = [1, 8], strides = [1, 1]} : vector<9x8xf32> to vector<1x8xf32>
    %94 = vector.shape_cast %93 : vector<1x8xf32> to vector<1x1x8xf32>
    %95 = vector.broadcast %94 : vector<1x1x8xf32> to vector<8x8x8xf32>
    %96 = arith.mulf %92, %95 : vector<8x8x8xf32>
    %97 = arith.addf %90, %96 : vector<8x8x8xf32>
    %c3_75 = arith.constant 3 : index
    %c0_76 = arith.constant 0 : index
    %c1_77 = arith.constant 1 : index
    %c0_78 = arith.constant 0 : index
    %98 = vector.load %arg9[%c3_75, %c0_76, %c1_77, %c0_78] : memref<4x9x9x8xf32, #tpu.memory_space<vmem>>, vector<1x8x8x8xf32>
    %99 = vector.shape_cast %98 : vector<1x8x8x8xf32> to vector<8x8x8xf32>
    %100 = vector.extract_strided_slice %82 {offsets = [2, 0], sizes = [1, 8], strides = [1, 1]} : vector<9x8xf32> to vector<1x8xf32>
    %101 = vector.shape_cast %100 : vector<1x8xf32> to vector<1x1x8xf32>
    %102 = vector.broadcast %101 : vector<1x1x8xf32> to vector<8x8x8xf32>
    %103 = arith.mulf %99, %102 : vector<8x8x8xf32>
    %104 = arith.addf %97, %103 : vector<8x8x8xf32>
    %c1_79 = arith.constant 1 : index
    %c1_80 = arith.constant 1 : index
    %c0_81 = arith.constant 0 : index
    %c0_82 = arith.constant 0 : index
    %105 = vector.load %arg9[%c1_79, %c1_80, %c0_81, %c0_82] : memref<4x9x9x8xf32, #tpu.memory_space<vmem>>, vector<1x8x8x8xf32>
    %106 = vector.shape_cast %105 : vector<1x8x8x8xf32> to vector<8x8x8xf32>
    %107 = vector.extract_strided_slice %82 {offsets = [3, 0], sizes = [1, 8], strides = [1, 1]} : vector<9x8xf32> to vector<1x8xf32>
    %108 = vector.shape_cast %107 : vector<1x8xf32> to vector<1x1x8xf32>
    %109 = vector.broadcast %108 : vector<1x1x8xf32> to vector<8x8x8xf32>
    %110 = arith.mulf %106, %109 : vector<8x8x8xf32>
    %111 = arith.addf %104, %110 : vector<8x8x8xf32>
    %c0_83 = arith.constant 0 : index
    %c1_84 = arith.constant 1 : index
    %c1_85 = arith.constant 1 : index
    %c0_86 = arith.constant 0 : index
    %112 = vector.load %arg9[%c0_83, %c1_84, %c1_85, %c0_86] : memref<4x9x9x8xf32, #tpu.memory_space<vmem>>, vector<1x8x8x8xf32>
    %113 = vector.shape_cast %112 : vector<1x8x8x8xf32> to vector<8x8x8xf32>
    %114 = vector.extract_strided_slice %82 {offsets = [4, 0], sizes = [1, 8], strides = [1, 1]} : vector<9x8xf32> to vector<1x8xf32>
    %115 = vector.shape_cast %114 : vector<1x8xf32> to vector<1x1x8xf32>
    %116 = vector.broadcast %115 : vector<1x1x8xf32> to vector<8x8x8xf32>
    %117 = arith.mulf %113, %116 : vector<8x8x8xf32>
    %118 = arith.addf %111, %117 : vector<8x8x8xf32>
    %c1_87 = arith.constant 1 : index
    %c1_88 = arith.constant 1 : index
    %c1_89 = arith.constant 1 : index
    %c0_90 = arith.constant 0 : index
    %119 = vector.load %arg9[%c1_87, %c1_88, %c1_89, %c0_90] : memref<4x9x9x8xf32, #tpu.memory_space<vmem>>, vector<1x8x8x8xf32>
    %120 = vector.shape_cast %119 : vector<1x8x8x8xf32> to vector<8x8x8xf32>
    %121 = vector.extract_strided_slice %82 {offsets = [5, 0], sizes = [1, 8], strides = [1, 1]} : vector<9x8xf32> to vector<1x8xf32>
    %122 = vector.shape_cast %121 : vector<1x8xf32> to vector<1x1x8xf32>
    %123 = vector.broadcast %122 : vector<1x1x8xf32> to vector<8x8x8xf32>
    %124 = arith.mulf %120, %123 : vector<8x8x8xf32>
    %125 = arith.addf %118, %124 : vector<8x8x8xf32>
    %c3_91 = arith.constant 3 : index
    %c1_92 = arith.constant 1 : index
    %c0_93 = arith.constant 0 : index
    %c0_94 = arith.constant 0 : index
    %126 = vector.load %arg9[%c3_91, %c1_92, %c0_93, %c0_94] : memref<4x9x9x8xf32, #tpu.memory_space<vmem>>, vector<1x8x8x8xf32>
    %127 = vector.shape_cast %126 : vector<1x8x8x8xf32> to vector<8x8x8xf32>
    %128 = vector.extract_strided_slice %82 {offsets = [6, 0], sizes = [1, 8], strides = [1, 1]} : vector<9x8xf32> to vector<1x8xf32>
    %129 = vector.shape_cast %128 : vector<1x8xf32> to vector<1x1x8xf32>
    %130 = vector.broadcast %129 : vector<1x1x8xf32> to vector<8x8x8xf32>
    %131 = arith.mulf %127, %130 : vector<8x8x8xf32>
    %132 = arith.addf %125, %131 : vector<8x8x8xf32>
    %c2_95 = arith.constant 2 : index
    %c1_96 = arith.constant 1 : index
    %c1_97 = arith.constant 1 : index
    %c0_98 = arith.constant 0 : index
    %133 = vector.load %arg9[%c2_95, %c1_96, %c1_97, %c0_98] : memref<4x9x9x8xf32, #tpu.memory_space<vmem>>, vector<1x8x8x8xf32>
    %134 = vector.shape_cast %133 : vector<1x8x8x8xf32> to vector<8x8x8xf32>
    %135 = vector.extract_strided_slice %82 {offsets = [7, 0], sizes = [1, 8], strides = [1, 1]} : vector<9x8xf32> to vector<1x8xf32>
    %136 = vector.shape_cast %135 : vector<1x8xf32> to vector<1x1x8xf32>
    %137 = vector.broadcast %136 : vector<1x1x8xf32> to vector<8x8x8xf32>
    %138 = arith.mulf %134, %137 : vector<8x8x8xf32>
    %139 = arith.addf %132, %138 : vector<8x8x8xf32>
    %c3_99 = arith.constant 3 : index
    %c1_100 = arith.constant 1 : index
    %c1_101 = arith.constant 1 : index
    %c0_102 = arith.constant 0 : index
    %140 = vector.load %arg9[%c3_99, %c1_100, %c1_101, %c0_102] : memref<4x9x9x8xf32, #tpu.memory_space<vmem>>, vector<1x8x8x8xf32>
    %141 = vector.shape_cast %140 : vector<1x8x8x8xf32> to vector<8x8x8xf32>
    %142 = vector.extract_strided_slice %82 {offsets = [8, 0], sizes = [1, 8], strides = [1, 1]} : vector<9x8xf32> to vector<1x8xf32>
    %143 = vector.shape_cast %142 : vector<1x8xf32> to vector<1x1x8xf32>
    %144 = vector.broadcast %143 : vector<1x1x8xf32> to vector<8x8x8xf32>
    %145 = arith.mulf %141, %144 : vector<8x8x8xf32>
    %146 = arith.addf %139, %145 : vector<8x8x8xf32>
    %c0_103 = arith.constant 0 : index
    %c0_104 = arith.constant 0 : index
    %147 = vector.load %arg5[%c0_103, %c0_104] : memref<1x8xf32, #tpu.memory_space<vmem>>, vector<1x8xf32>
    %148 = vector.shape_cast %147 : vector<1x8xf32> to vector<1x1x8xf32>
    %149 = vector.broadcast %148 : vector<1x1x8xf32> to vector<8x8x8xf32>
    %150 = arith.addf %146, %149 : vector<8x8x8xf32>
    %cst_105 = arith.constant 3.000000e+00 : f32
    %151 = vector.broadcast %cst_105 : f32 to vector<8x8x8xf32>
    %152 = arith.addf %150, %151 : vector<8x8x8xf32>
    %cst_106 = arith.constant 0.000000e+00 : f32
    %cst_107 = arith.constant 6.000000e+00 : f32
    %153 = vector.broadcast %cst_106 : f32 to vector<8x8x8xf32>
    %154 = arith.maximumf %153, %152 : vector<8x8x8xf32>
    %155 = vector.broadcast %cst_107 : f32 to vector<8x8x8xf32>
    %156 = arith.minimumf %155, %154 : vector<8x8x8xf32>
    %157 = arith.mulf %150, %156 : vector<8x8x8xf32>
    %cst_108 = arith.constant 0.166666672 : f32
    %158 = vector.broadcast %cst_108 : f32 to vector<8x8x8xf32>
    %159 = arith.mulf %157, %158 : vector<8x8x8xf32>
    %160 = vector.shape_cast %159 : vector<8x8x8xf32> to vector<64x8xf32>
    %161 = arith.truncf %160 : vector<64x8xf32> to vector<64x8xbf16>
    %c0_109 = arith.constant 0 : index
    %c0_110 = arith.constant 0 : index
    %162 = vector.load %arg6[%c0_109, %c0_110] : memref<8x8xbf16, #tpu.memory_space<vmem>>, vector<8x8xbf16>
    %cst_111 = arith.constant dense<0.000000e+00> : vector<64x8xf32>
    %163 = tpu.matmul %161, %162, %cst_111 {dimension_numbers = #tpu.dot_dimension_numbers<[1], [0], [0], [1], [0, 0, 1, 1], [], []>} : vector<64x8xbf16>, vector<8x8xbf16>, vector<64x8xf32> -> vector<64x8xf32>
    %c0_112 = arith.constant 0 : index
    %c0_113 = arith.constant 0 : index
    %164 = vector.load %arg7[%c0_112, %c0_113] : memref<1x8xf32, #tpu.memory_space<vmem>>, vector<1x8xf32>
    %165 = vector.broadcast %164 : vector<1x8xf32> to vector<64x8xf32>
    %166 = arith.addf %163, %165 : vector<64x8xf32>
    %167 = vector.shape_cast %166 : vector<64x8xf32> to vector<8x8x8xf32>
    %168 = arith.truncf %167 : vector<8x8x8xf32> to vector<8x8x8xbf16>
    %c0_114 = arith.constant 0 : index
    %c0_115 = arith.constant 0 : index
    %c0_116 = arith.constant 0 : index
    %c0_117 = arith.constant 0 : index
    %169 = vector.load %arg8[%c0_114, %c0_115, %c0_116, %c0_117] : memref<1x8x8x8xbf16, #tpu.memory_space<vmem>>, vector<1x8x8x8xbf16>
    %170 = vector.shape_cast %169 : vector<1x8x8x8xbf16> to vector<8x8x8xbf16>
    %171 = vector.shape_cast %168 : vector<8x8x8xbf16> to vector<1x8x8x8xbf16>
    tpu.vector_store %arg8[%c0_114, %c0_115, %c0_116, %c0_117], %171 {strides = array<i32>} : memref<1x8x8x8xbf16, #tpu.memory_space<vmem>>, vector<1x8x8x8xbf16>,
    return
  }
  func.func @transform_0(%arg0: i32) -> (i32, i32, i32, i32, i32) {
    %c0_i32 = arith.constant 0 : i32
    %c0_i32_0 = arith.constant 0 : i32
    %c0_i32_1 = arith.constant 0 : i32
    %c0_i32_2 = arith.constant 0 : i32
    %c0_i32_3 = arith.constant 0 : i32
    return %arg0, %c0_i32, %c0_i32_0, %c0_i32_1, %c0_i32_2 : i32, i32, i32, i32, i32
  }
  func.func @transform_1(%arg0: i32) -> (i32, i32) {
    %c0_i32 = arith.constant 0 : i32
    %c0_i32_0 = arith.constant 0 : i32
    %c0_i32_1 = arith.constant 0 : i32
    return %c0_i32, %c0_i32_0 : i32, i32
  }
  func.func @transform_2(%arg0: i32) -> (i32, i32) {
    %c0_i32 = arith.constant 0 : i32
    %c0_i32_0 = arith.constant 0 : i32
    %c0_i32_1 = arith.constant 0 : i32
    return %c0_i32, %c0_i32_0 : i32, i32
  }
  func.func @transform_3(%arg0: i32) -> (i32, i32) {
    %c0_i32 = arith.constant 0 : i32
    %c0_i32_0 = arith.constant 0 : i32
    %c0_i32_1 = arith.constant 0 : i32
    return %c0_i32, %c0_i32_0 : i32, i32
  }
  func.func @transform_4(%arg0: i32) -> (i32, i32) {
    %c0_i32 = arith.constant 0 : i32
    %c0_i32_0 = arith.constant 0 : i32
    %c0_i32_1 = arith.constant 0 : i32
    return %c0_i32, %c0_i32_0 : i32, i32
  }
  func.func @transform_5(%arg0: i32) -> (i32, i32) {
    %c0_i32 = arith.constant 0 : i32
    %c0_i32_0 = arith.constant 0 : i32
    %c0_i32_1 = arith.constant 0 : i32
    return %c0_i32, %c0_i32_0 : i32, i32
  }
  func.func @transform_6(%arg0: i32) -> (i32, i32) {
    %c0_i32 = arith.constant 0 : i32
    %c0_i32_0 = arith.constant 0 : i32
    %c0_i32_1 = arith.constant 0 : i32
    return %c0_i32, %c0_i32_0 : i32, i32
  }
  func.func @transform_7(%arg0: i32) -> (i32, i32, i32, i32) {
    %c0_i32 = arith.constant 0 : i32
    %c0_i32_0 = arith.constant 0 : i32
    %c0_i32_1 = arith.constant 0 : i32
    %c0_i32_2 = arith.constant 0 : i32
    return %arg0, %c0_i32, %c0_i32_0, %c0_i32_1 : i32, i32, i32, i32
  }
}

module attributes {stable_mosaic.version = 11 : i64} {
  func.func @_down_block_kernel(%arg0: i32, %arg1: memref<1x4x2x4x16xbf16, #tpu.memory_space<vmem>>, %arg2: memref<8x16xbf16, #tpu.memory_space<vmem>>, %arg3: memref<1x16xf32, #tpu.memory_space<vmem>>, %arg4: memref<9x16xf32, #tpu.memory_space<vmem>>, %arg5: memref<1x16xf32, #tpu.memory_space<vmem>>, %arg6: memref<16x16xbf16, #tpu.memory_space<vmem>>, %arg7: memref<1x16xf32, #tpu.memory_space<vmem>>, %arg8: memref<1x4x4x16xbf16, #tpu.memory_space<vmem>>, %arg9: memref<4x5x5x16xf32, #tpu.memory_space<vmem>>) attributes {dimension_semantics = [#tpu.dimension_semantics<parallel>], iteration_bounds = array<i64: 2>, scalar_prefetch = 0 : i64, scratch_operands = 1 : i64, tpu.core_type = #tpu.core_type<tc>, window_params = [{transform_indices = @transform_0, window_bounds = array<i64: 1, 4, 2, 4, 16>}, {pipeline_mode = #tpu.pipeline_mode<synchronous>, transform_indices = @transform_1, window_bounds = array<i64: 8, 16>}, {pipeline_mode = #tpu.pipeline_mode<synchronous>, transform_indices = @transform_2, window_bounds = array<i64: 1, 16>}, {pipeline_mode = #tpu.pipeline_mode<synchronous>, transform_indices = @transform_3, window_bounds = array<i64: 9, 16>}, {pipeline_mode = #tpu.pipeline_mode<synchronous>, transform_indices = @transform_4, window_bounds = array<i64: 1, 16>}, {pipeline_mode = #tpu.pipeline_mode<synchronous>, transform_indices = @transform_5, window_bounds = array<i64: 16, 16>}, {pipeline_mode = #tpu.pipeline_mode<synchronous>, transform_indices = @transform_6, window_bounds = array<i64: 1, 16>}, {transform_indices = @transform_7, window_bounds = array<i64: 1, 4, 4, 16>}]} {
    %cst = arith.constant 0.000000e+00 : f32
    %0 = vector.broadcast %cst : f32 to vector<4x1x5x16xf32>
    %c0 = arith.constant 0 : index
    %c0_0 = arith.constant 0 : index
    %c0_1 = arith.constant 0 : index
    %c0_2 = arith.constant 0 : index
    %1 = vector.load %arg9[%c0, %c0_0, %c0_1, %c0_2] : memref<4x5x5x16xf32, #tpu.memory_space<vmem>>, vector<4x1x5x16xf32>
    tpu.vector_store %arg9[%c0, %c0_0, %c0_1, %c0_2], %0 {strides = array<i32>} : memref<4x5x5x16xf32, #tpu.memory_space<vmem>>, vector<4x1x5x16xf32>,
    %cst_3 = arith.constant 0.000000e+00 : f32
    %2 = vector.broadcast %cst_3 : f32 to vector<4x5x1x16xf32>
    %c0_4 = arith.constant 0 : index
    %c0_5 = arith.constant 0 : index
    %c0_6 = arith.constant 0 : index
    %c0_7 = arith.constant 0 : index
    %3 = vector.load %arg9[%c0_4, %c0_5, %c0_6, %c0_7] : memref<4x5x5x16xf32, #tpu.memory_space<vmem>>, vector<4x5x1x16xf32>
    tpu.vector_store %arg9[%c0_4, %c0_5, %c0_6, %c0_7], %2 {strides = array<i32>} : memref<4x5x5x16xf32, #tpu.memory_space<vmem>>, vector<4x5x1x16xf32>,
    %c0_8 = arith.constant 0 : index
    %c0_9 = arith.constant 0 : index
    %4 = vector.load %arg2[%c0_8, %c0_9] : memref<8x16xbf16, #tpu.memory_space<vmem>>, vector<8x16xbf16>
    %c0_10 = arith.constant 0 : index
    %c0_11 = arith.constant 0 : index
    %5 = vector.load %arg3[%c0_10, %c0_11] : memref<1x16xf32, #tpu.memory_space<vmem>>, vector<1x16xf32>
    %c0_12 = arith.constant 0 : index
    %c0_13 = arith.constant 0 : index
    %c0_14 = arith.constant 0 : index
    %c0_15 = arith.constant 0 : index
    %c0_16 = arith.constant 0 : index
    %6 = vector.load %arg1[%c0_12, %c0_13, %c0_14, %c0_15, %c0_16] : memref<1x4x2x4x16xbf16, #tpu.memory_space<vmem>>, vector<1x4x1x4x8xbf16>
    %7 = vector.shape_cast %6 : vector<1x4x1x4x8xbf16> to vector<4x4x8xbf16>
    %8 = vector.shape_cast %7 : vector<4x4x8xbf16> to vector<16x8xbf16>
    %cst_17 = arith.constant dense<0.000000e+00> : vector<16x16xf32>
    %9 = tpu.matmul %8, %4, %cst_17 {dimension_numbers = #tpu.dot_dimension_numbers<[1], [0], [0], [1], [0, 0, 1, 1], [], []>} : vector<16x8xbf16>, vector<8x16xbf16>, vector<16x16xf32> -> vector<16x16xf32>
    %10 = vector.broadcast %5 : vector<1x16xf32> to vector<16x16xf32>
    %11 = arith.addf %9, %10 : vector<16x16xf32>
    %cst_18 = arith.constant 3.000000e+00 : f32
    %12 = vector.broadcast %cst_18 : f32 to vector<16x16xf32>
    %13 = arith.addf %11, %12 : vector<16x16xf32>
    %cst_19 = arith.constant 0.000000e+00 : f32
    %cst_20 = arith.constant 6.000000e+00 : f32
    %14 = vector.broadcast %cst_19 : f32 to vector<16x16xf32>
    %15 = arith.maximumf %14, %13 : vector<16x16xf32>
    %16 = vector.broadcast %cst_20 : f32 to vector<16x16xf32>
    %17 = arith.minimumf %16, %15 : vector<16x16xf32>
    %18 = arith.mulf %11, %17 : vector<16x16xf32>
    %cst_21 = arith.constant 0.166666672 : f32
    %19 = vector.broadcast %cst_21 : f32 to vector<16x16xf32>
    %20 = arith.mulf %18, %19 : vector<16x16xf32>
    %21 = vector.shape_cast %20 : vector<16x16xf32> to vector<4x4x16xf32>
    %c0_22 = arith.constant 0 : index
    %c1 = arith.constant 1 : index
    %c1_23 = arith.constant 1 : index
    %c0_24 = arith.constant 0 : index
    %22 = vector.load %arg9[%c0_22, %c1, %c1_23, %c0_24] : memref<4x5x5x16xf32, #tpu.memory_space<vmem>>, vector<1x4x4x16xf32>
    %23 = vector.shape_cast %22 : vector<1x4x4x16xf32> to vector<4x4x16xf32>
    %24 = vector.shape_cast %21 : vector<4x4x16xf32> to vector<1x4x4x16xf32>
    tpu.vector_store %arg9[%c0_22, %c1, %c1_23, %c0_24], %24 {strides = array<i32>} : memref<4x5x5x16xf32, #tpu.memory_space<vmem>>, vector<1x4x4x16xf32>,
    %c0_25 = arith.constant 0 : index
    %c0_26 = arith.constant 0 : index
    %c0_27 = arith.constant 0 : index
    %c0_28 = arith.constant 0 : index
    %c8 = arith.constant 8 : index
    %25 = vector.load %arg1[%c0_25, %c0_26, %c0_27, %c0_28, %c8] : memref<1x4x2x4x16xbf16, #tpu.memory_space<vmem>>, vector<1x4x1x4x8xbf16>
    %26 = vector.shape_cast %25 : vector<1x4x1x4x8xbf16> to vector<4x4x8xbf16>
    %27 = vector.shape_cast %26 : vector<4x4x8xbf16> to vector<16x8xbf16>
    %cst_29 = arith.constant dense<0.000000e+00> : vector<16x16xf32>
    %28 = tpu.matmul %27, %4, %cst_29 {dimension_numbers = #tpu.dot_dimension_numbers<[1], [0], [0], [1], [0, 0, 1, 1], [], []>} : vector<16x8xbf16>, vector<8x16xbf16>, vector<16x16xf32> -> vector<16x16xf32>
    %29 = vector.broadcast %5 : vector<1x16xf32> to vector<16x16xf32>
    %30 = arith.addf %28, %29 : vector<16x16xf32>
    %cst_30 = arith.constant 3.000000e+00 : f32
    %31 = vector.broadcast %cst_30 : f32 to vector<16x16xf32>
    %32 = arith.addf %30, %31 : vector<16x16xf32>
    %cst_31 = arith.constant 0.000000e+00 : f32
    %cst_32 = arith.constant 6.000000e+00 : f32
    %33 = vector.broadcast %cst_31 : f32 to vector<16x16xf32>
    %34 = arith.maximumf %33, %32 : vector<16x16xf32>
    %35 = vector.broadcast %cst_32 : f32 to vector<16x16xf32>
    %36 = arith.minimumf %35, %34 : vector<16x16xf32>
    %37 = arith.mulf %30, %36 : vector<16x16xf32>
    %cst_33 = arith.constant 0.166666672 : f32
    %38 = vector.broadcast %cst_33 : f32 to vector<16x16xf32>
    %39 = arith.mulf %37, %38 : vector<16x16xf32>
    %40 = vector.shape_cast %39 : vector<16x16xf32> to vector<4x4x16xf32>
    %c1_34 = arith.constant 1 : index
    %c1_35 = arith.constant 1 : index
    %c1_36 = arith.constant 1 : index
    %c0_37 = arith.constant 0 : index
    %41 = vector.load %arg9[%c1_34, %c1_35, %c1_36, %c0_37] : memref<4x5x5x16xf32, #tpu.memory_space<vmem>>, vector<1x4x4x16xf32>
    %42 = vector.shape_cast %41 : vector<1x4x4x16xf32> to vector<4x4x16xf32>
    %43 = vector.shape_cast %40 : vector<4x4x16xf32> to vector<1x4x4x16xf32>
    tpu.vector_store %arg9[%c1_34, %c1_35, %c1_36, %c0_37], %43 {strides = array<i32>} : memref<4x5x5x16xf32, #tpu.memory_space<vmem>>, vector<1x4x4x16xf32>,
    %c0_38 = arith.constant 0 : index
    %c0_39 = arith.constant 0 : index
    %c1_40 = arith.constant 1 : index
    %c0_41 = arith.constant 0 : index
    %c0_42 = arith.constant 0 : index
    %44 = vector.load %arg1[%c0_38, %c0_39, %c1_40, %c0_41, %c0_42] : memref<1x4x2x4x16xbf16, #tpu.memory_space<vmem>>, vector<1x4x1x4x8xbf16>
    %45 = vector.shape_cast %44 : vector<1x4x1x4x8xbf16> to vector<4x4x8xbf16>
    %46 = vector.shape_cast %45 : vector<4x4x8xbf16> to vector<16x8xbf16>
    %cst_43 = arith.constant dense<0.000000e+00> : vector<16x16xf32>
    %47 = tpu.matmul %46, %4, %cst_43 {dimension_numbers = #tpu.dot_dimension_numbers<[1], [0], [0], [1], [0, 0, 1, 1], [], []>} : vector<16x8xbf16>, vector<8x16xbf16>, vector<16x16xf32> -> vector<16x16xf32>
    %48 = vector.broadcast %5 : vector<1x16xf32> to vector<16x16xf32>
    %49 = arith.addf %47, %48 : vector<16x16xf32>
    %cst_44 = arith.constant 3.000000e+00 : f32
    %50 = vector.broadcast %cst_44 : f32 to vector<16x16xf32>
    %51 = arith.addf %49, %50 : vector<16x16xf32>
    %cst_45 = arith.constant 0.000000e+00 : f32
    %cst_46 = arith.constant 6.000000e+00 : f32
    %52 = vector.broadcast %cst_45 : f32 to vector<16x16xf32>
    %53 = arith.maximumf %52, %51 : vector<16x16xf32>
    %54 = vector.broadcast %cst_46 : f32 to vector<16x16xf32>
    %55 = arith.minimumf %54, %53 : vector<16x16xf32>
    %56 = arith.mulf %49, %55 : vector<16x16xf32>
    %cst_47 = arith.constant 0.166666672 : f32
    %57 = vector.broadcast %cst_47 : f32 to vector<16x16xf32>
    %58 = arith.mulf %56, %57 : vector<16x16xf32>
    %59 = vector.shape_cast %58 : vector<16x16xf32> to vector<4x4x16xf32>
    %c2 = arith.constant 2 : index
    %c1_48 = arith.constant 1 : index
    %c1_49 = arith.constant 1 : index
    %c0_50 = arith.constant 0 : index
    %60 = vector.load %arg9[%c2, %c1_48, %c1_49, %c0_50] : memref<4x5x5x16xf32, #tpu.memory_space<vmem>>, vector<1x4x4x16xf32>
    %61 = vector.shape_cast %60 : vector<1x4x4x16xf32> to vector<4x4x16xf32>
    %62 = vector.shape_cast %59 : vector<4x4x16xf32> to vector<1x4x4x16xf32>
    tpu.vector_store %arg9[%c2, %c1_48, %c1_49, %c0_50], %62 {strides = array<i32>} : memref<4x5x5x16xf32, #tpu.memory_space<vmem>>, vector<1x4x4x16xf32>,
    %c0_51 = arith.constant 0 : index
    %c0_52 = arith.constant 0 : index
    %c1_53 = arith.constant 1 : index
    %c0_54 = arith.constant 0 : index
    %c8_55 = arith.constant 8 : index
    %63 = vector.load %arg1[%c0_51, %c0_52, %c1_53, %c0_54, %c8_55] : memref<1x4x2x4x16xbf16, #tpu.memory_space<vmem>>, vector<1x4x1x4x8xbf16>
    %64 = vector.shape_cast %63 : vector<1x4x1x4x8xbf16> to vector<4x4x8xbf16>
    %65 = vector.shape_cast %64 : vector<4x4x8xbf16> to vector<16x8xbf16>
    %cst_56 = arith.constant dense<0.000000e+00> : vector<16x16xf32>
    %66 = tpu.matmul %65, %4, %cst_56 {dimension_numbers = #tpu.dot_dimension_numbers<[1], [0], [0], [1], [0, 0, 1, 1], [], []>} : vector<16x8xbf16>, vector<8x16xbf16>, vector<16x16xf32> -> vector<16x16xf32>
    %67 = vector.broadcast %5 : vector<1x16xf32> to vector<16x16xf32>
    %68 = arith.addf %66, %67 : vector<16x16xf32>
    %cst_57 = arith.constant 3.000000e+00 : f32
    %69 = vector.broadcast %cst_57 : f32 to vector<16x16xf32>
    %70 = arith.addf %68, %69 : vector<16x16xf32>
    %cst_58 = arith.constant 0.000000e+00 : f32
    %cst_59 = arith.constant 6.000000e+00 : f32
    %71 = vector.broadcast %cst_58 : f32 to vector<16x16xf32>
    %72 = arith.maximumf %71, %70 : vector<16x16xf32>
    %73 = vector.broadcast %cst_59 : f32 to vector<16x16xf32>
    %74 = arith.minimumf %73, %72 : vector<16x16xf32>
    %75 = arith.mulf %68, %74 : vector<16x16xf32>
    %cst_60 = arith.constant 0.166666672 : f32
    %76 = vector.broadcast %cst_60 : f32 to vector<16x16xf32>
    %77 = arith.mulf %75, %76 : vector<16x16xf32>
    %78 = vector.shape_cast %77 : vector<16x16xf32> to vector<4x4x16xf32>
    %c3 = arith.constant 3 : index
    %c1_61 = arith.constant 1 : index
    %c1_62 = arith.constant 1 : index
    %c0_63 = arith.constant 0 : index
    %79 = vector.load %arg9[%c3, %c1_61, %c1_62, %c0_63] : memref<4x5x5x16xf32, #tpu.memory_space<vmem>>, vector<1x4x4x16xf32>
    %80 = vector.shape_cast %79 : vector<1x4x4x16xf32> to vector<4x4x16xf32>
    %81 = vector.shape_cast %78 : vector<4x4x16xf32> to vector<1x4x4x16xf32>
    tpu.vector_store %arg9[%c3, %c1_61, %c1_62, %c0_63], %81 {strides = array<i32>} : memref<4x5x5x16xf32, #tpu.memory_space<vmem>>, vector<1x4x4x16xf32>,
    %c0_64 = arith.constant 0 : index
    %c0_65 = arith.constant 0 : index
    %82 = vector.load %arg4[%c0_64, %c0_65] : memref<9x16xf32, #tpu.memory_space<vmem>>, vector<9x16xf32>
    %cst_66 = arith.constant 0.000000e+00 : f32
    %83 = vector.broadcast %cst_66 : f32 to vector<4x4x16xf32>
    %c3_67 = arith.constant 3 : index
    %c0_68 = arith.constant 0 : index
    %c0_69 = arith.constant 0 : index
    %c0_70 = arith.constant 0 : index
    %84 = vector.load %arg9[%c3_67, %c0_68, %c0_69, %c0_70] : memref<4x5x5x16xf32, #tpu.memory_space<vmem>>, vector<1x4x4x16xf32>
    %85 = vector.shape_cast %84 : vector<1x4x4x16xf32> to vector<4x4x16xf32>
    %86 = vector.extract_strided_slice %82 {offsets = [0, 0], sizes = [1, 16], strides = [1, 1]} : vector<9x16xf32> to vector<1x16xf32>
    %87 = vector.shape_cast %86 : vector<1x16xf32> to vector<1x1x16xf32>
    %88 = vector.broadcast %87 : vector<1x1x16xf32> to vector<4x4x16xf32>
    %89 = arith.mulf %85, %88 : vector<4x4x16xf32>
    %90 = arith.addf %83, %89 : vector<4x4x16xf32>
    %c2_71 = arith.constant 2 : index
    %c0_72 = arith.constant 0 : index
    %c1_73 = arith.constant 1 : index
    %c0_74 = arith.constant 0 : index
    %91 = vector.load %arg9[%c2_71, %c0_72, %c1_73, %c0_74] : memref<4x5x5x16xf32, #tpu.memory_space<vmem>>, vector<1x4x4x16xf32>
    %92 = vector.shape_cast %91 : vector<1x4x4x16xf32> to vector<4x4x16xf32>
    %93 = vector.extract_strided_slice %82 {offsets = [1, 0], sizes = [1, 16], strides = [1, 1]} : vector<9x16xf32> to vector<1x16xf32>
    %94 = vector.shape_cast %93 : vector<1x16xf32> to vector<1x1x16xf32>
    %95 = vector.broadcast %94 : vector<1x1x16xf32> to vector<4x4x16xf32>
    %96 = arith.mulf %92, %95 : vector<4x4x16xf32>
    %97 = arith.addf %90, %96 : vector<4x4x16xf32>
    %c3_75 = arith.constant 3 : index
    %c0_76 = arith.constant 0 : index
    %c1_77 = arith.constant 1 : index
    %c0_78 = arith.constant 0 : index
    %98 = vector.load %arg9[%c3_75, %c0_76, %c1_77, %c0_78] : memref<4x5x5x16xf32, #tpu.memory_space<vmem>>, vector<1x4x4x16xf32>
    %99 = vector.shape_cast %98 : vector<1x4x4x16xf32> to vector<4x4x16xf32>
    %100 = vector.extract_strided_slice %82 {offsets = [2, 0], sizes = [1, 16], strides = [1, 1]} : vector<9x16xf32> to vector<1x16xf32>
    %101 = vector.shape_cast %100 : vector<1x16xf32> to vector<1x1x16xf32>
    %102 = vector.broadcast %101 : vector<1x1x16xf32> to vector<4x4x16xf32>
    %103 = arith.mulf %99, %102 : vector<4x4x16xf32>
    %104 = arith.addf %97, %103 : vector<4x4x16xf32>
    %c1_79 = arith.constant 1 : index
    %c1_80 = arith.constant 1 : index
    %c0_81 = arith.constant 0 : index
    %c0_82 = arith.constant 0 : index
    %105 = vector.load %arg9[%c1_79, %c1_80, %c0_81, %c0_82] : memref<4x5x5x16xf32, #tpu.memory_space<vmem>>, vector<1x4x4x16xf32>
    %106 = vector.shape_cast %105 : vector<1x4x4x16xf32> to vector<4x4x16xf32>
    %107 = vector.extract_strided_slice %82 {offsets = [3, 0], sizes = [1, 16], strides = [1, 1]} : vector<9x16xf32> to vector<1x16xf32>
    %108 = vector.shape_cast %107 : vector<1x16xf32> to vector<1x1x16xf32>
    %109 = vector.broadcast %108 : vector<1x1x16xf32> to vector<4x4x16xf32>
    %110 = arith.mulf %106, %109 : vector<4x4x16xf32>
    %111 = arith.addf %104, %110 : vector<4x4x16xf32>
    %c0_83 = arith.constant 0 : index
    %c1_84 = arith.constant 1 : index
    %c1_85 = arith.constant 1 : index
    %c0_86 = arith.constant 0 : index
    %112 = vector.load %arg9[%c0_83, %c1_84, %c1_85, %c0_86] : memref<4x5x5x16xf32, #tpu.memory_space<vmem>>, vector<1x4x4x16xf32>
    %113 = vector.shape_cast %112 : vector<1x4x4x16xf32> to vector<4x4x16xf32>
    %114 = vector.extract_strided_slice %82 {offsets = [4, 0], sizes = [1, 16], strides = [1, 1]} : vector<9x16xf32> to vector<1x16xf32>
    %115 = vector.shape_cast %114 : vector<1x16xf32> to vector<1x1x16xf32>
    %116 = vector.broadcast %115 : vector<1x1x16xf32> to vector<4x4x16xf32>
    %117 = arith.mulf %113, %116 : vector<4x4x16xf32>
    %118 = arith.addf %111, %117 : vector<4x4x16xf32>
    %c1_87 = arith.constant 1 : index
    %c1_88 = arith.constant 1 : index
    %c1_89 = arith.constant 1 : index
    %c0_90 = arith.constant 0 : index
    %119 = vector.load %arg9[%c1_87, %c1_88, %c1_89, %c0_90] : memref<4x5x5x16xf32, #tpu.memory_space<vmem>>, vector<1x4x4x16xf32>
    %120 = vector.shape_cast %119 : vector<1x4x4x16xf32> to vector<4x4x16xf32>
    %121 = vector.extract_strided_slice %82 {offsets = [5, 0], sizes = [1, 16], strides = [1, 1]} : vector<9x16xf32> to vector<1x16xf32>
    %122 = vector.shape_cast %121 : vector<1x16xf32> to vector<1x1x16xf32>
    %123 = vector.broadcast %122 : vector<1x1x16xf32> to vector<4x4x16xf32>
    %124 = arith.mulf %120, %123 : vector<4x4x16xf32>
    %125 = arith.addf %118, %124 : vector<4x4x16xf32>
    %c3_91 = arith.constant 3 : index
    %c1_92 = arith.constant 1 : index
    %c0_93 = arith.constant 0 : index
    %c0_94 = arith.constant 0 : index
    %126 = vector.load %arg9[%c3_91, %c1_92, %c0_93, %c0_94] : memref<4x5x5x16xf32, #tpu.memory_space<vmem>>, vector<1x4x4x16xf32>
    %127 = vector.shape_cast %126 : vector<1x4x4x16xf32> to vector<4x4x16xf32>
    %128 = vector.extract_strided_slice %82 {offsets = [6, 0], sizes = [1, 16], strides = [1, 1]} : vector<9x16xf32> to vector<1x16xf32>
    %129 = vector.shape_cast %128 : vector<1x16xf32> to vector<1x1x16xf32>
    %130 = vector.broadcast %129 : vector<1x1x16xf32> to vector<4x4x16xf32>
    %131 = arith.mulf %127, %130 : vector<4x4x16xf32>
    %132 = arith.addf %125, %131 : vector<4x4x16xf32>
    %c2_95 = arith.constant 2 : index
    %c1_96 = arith.constant 1 : index
    %c1_97 = arith.constant 1 : index
    %c0_98 = arith.constant 0 : index
    %133 = vector.load %arg9[%c2_95, %c1_96, %c1_97, %c0_98] : memref<4x5x5x16xf32, #tpu.memory_space<vmem>>, vector<1x4x4x16xf32>
    %134 = vector.shape_cast %133 : vector<1x4x4x16xf32> to vector<4x4x16xf32>
    %135 = vector.extract_strided_slice %82 {offsets = [7, 0], sizes = [1, 16], strides = [1, 1]} : vector<9x16xf32> to vector<1x16xf32>
    %136 = vector.shape_cast %135 : vector<1x16xf32> to vector<1x1x16xf32>
    %137 = vector.broadcast %136 : vector<1x1x16xf32> to vector<4x4x16xf32>
    %138 = arith.mulf %134, %137 : vector<4x4x16xf32>
    %139 = arith.addf %132, %138 : vector<4x4x16xf32>
    %c3_99 = arith.constant 3 : index
    %c1_100 = arith.constant 1 : index
    %c1_101 = arith.constant 1 : index
    %c0_102 = arith.constant 0 : index
    %140 = vector.load %arg9[%c3_99, %c1_100, %c1_101, %c0_102] : memref<4x5x5x16xf32, #tpu.memory_space<vmem>>, vector<1x4x4x16xf32>
    %141 = vector.shape_cast %140 : vector<1x4x4x16xf32> to vector<4x4x16xf32>
    %142 = vector.extract_strided_slice %82 {offsets = [8, 0], sizes = [1, 16], strides = [1, 1]} : vector<9x16xf32> to vector<1x16xf32>
    %143 = vector.shape_cast %142 : vector<1x16xf32> to vector<1x1x16xf32>
    %144 = vector.broadcast %143 : vector<1x1x16xf32> to vector<4x4x16xf32>
    %145 = arith.mulf %141, %144 : vector<4x4x16xf32>
    %146 = arith.addf %139, %145 : vector<4x4x16xf32>
    %c0_103 = arith.constant 0 : index
    %c0_104 = arith.constant 0 : index
    %147 = vector.load %arg5[%c0_103, %c0_104] : memref<1x16xf32, #tpu.memory_space<vmem>>, vector<1x16xf32>
    %148 = vector.shape_cast %147 : vector<1x16xf32> to vector<1x1x16xf32>
    %149 = vector.broadcast %148 : vector<1x1x16xf32> to vector<4x4x16xf32>
    %150 = arith.addf %146, %149 : vector<4x4x16xf32>
    %cst_105 = arith.constant 3.000000e+00 : f32
    %151 = vector.broadcast %cst_105 : f32 to vector<4x4x16xf32>
    %152 = arith.addf %150, %151 : vector<4x4x16xf32>
    %cst_106 = arith.constant 0.000000e+00 : f32
    %cst_107 = arith.constant 6.000000e+00 : f32
    %153 = vector.broadcast %cst_106 : f32 to vector<4x4x16xf32>
    %154 = arith.maximumf %153, %152 : vector<4x4x16xf32>
    %155 = vector.broadcast %cst_107 : f32 to vector<4x4x16xf32>
    %156 = arith.minimumf %155, %154 : vector<4x4x16xf32>
    %157 = arith.mulf %150, %156 : vector<4x4x16xf32>
    %cst_108 = arith.constant 0.166666672 : f32
    %158 = vector.broadcast %cst_108 : f32 to vector<4x4x16xf32>
    %159 = arith.mulf %157, %158 : vector<4x4x16xf32>
    %160 = vector.shape_cast %159 : vector<4x4x16xf32> to vector<16x16xf32>
    %161 = arith.truncf %160 : vector<16x16xf32> to vector<16x16xbf16>
    %c0_109 = arith.constant 0 : index
    %c0_110 = arith.constant 0 : index
    %162 = vector.load %arg6[%c0_109, %c0_110] : memref<16x16xbf16, #tpu.memory_space<vmem>>, vector<16x16xbf16>
    %cst_111 = arith.constant dense<0.000000e+00> : vector<16x16xf32>
    %163 = tpu.matmul %161, %162, %cst_111 {dimension_numbers = #tpu.dot_dimension_numbers<[1], [0], [0], [1], [0, 0, 1, 1], [], []>} : vector<16x16xbf16>, vector<16x16xbf16>, vector<16x16xf32> -> vector<16x16xf32>
    %c0_112 = arith.constant 0 : index
    %c0_113 = arith.constant 0 : index
    %164 = vector.load %arg7[%c0_112, %c0_113] : memref<1x16xf32, #tpu.memory_space<vmem>>, vector<1x16xf32>
    %165 = vector.broadcast %164 : vector<1x16xf32> to vector<16x16xf32>
    %166 = arith.addf %163, %165 : vector<16x16xf32>
    %167 = vector.shape_cast %166 : vector<16x16xf32> to vector<4x4x16xf32>
    %168 = arith.truncf %167 : vector<4x4x16xf32> to vector<4x4x16xbf16>
    %c0_114 = arith.constant 0 : index
    %c0_115 = arith.constant 0 : index
    %c0_116 = arith.constant 0 : index
    %c0_117 = arith.constant 0 : index
    %169 = vector.load %arg8[%c0_114, %c0_115, %c0_116, %c0_117] : memref<1x4x4x16xbf16, #tpu.memory_space<vmem>>, vector<1x4x4x16xbf16>
    %170 = vector.shape_cast %169 : vector<1x4x4x16xbf16> to vector<4x4x16xbf16>
    %171 = vector.shape_cast %168 : vector<4x4x16xbf16> to vector<1x4x4x16xbf16>
    tpu.vector_store %arg8[%c0_114, %c0_115, %c0_116, %c0_117], %171 {strides = array<i32>} : memref<1x4x4x16xbf16, #tpu.memory_space<vmem>>, vector<1x4x4x16xbf16>,
    return
  }
  func.func @transform_0(%arg0: i32) -> (i32, i32, i32, i32, i32) {
    %c0_i32 = arith.constant 0 : i32
    %c0_i32_0 = arith.constant 0 : i32
    %c0_i32_1 = arith.constant 0 : i32
    %c0_i32_2 = arith.constant 0 : i32
    %c0_i32_3 = arith.constant 0 : i32
    return %arg0, %c0_i32, %c0_i32_0, %c0_i32_1, %c0_i32_2 : i32, i32, i32, i32, i32
  }
  func.func @transform_1(%arg0: i32) -> (i32, i32) {
    %c0_i32 = arith.constant 0 : i32
    %c0_i32_0 = arith.constant 0 : i32
    %c0_i32_1 = arith.constant 0 : i32
    return %c0_i32, %c0_i32_0 : i32, i32
  }
  func.func @transform_2(%arg0: i32) -> (i32, i32) {
    %c0_i32 = arith.constant 0 : i32
    %c0_i32_0 = arith.constant 0 : i32
    %c0_i32_1 = arith.constant 0 : i32
    return %c0_i32, %c0_i32_0 : i32, i32
  }
  func.func @transform_3(%arg0: i32) -> (i32, i32) {
    %c0_i32 = arith.constant 0 : i32
    %c0_i32_0 = arith.constant 0 : i32
    %c0_i32_1 = arith.constant 0 : i32
    return %c0_i32, %c0_i32_0 : i32, i32
  }
  func.func @transform_4(%arg0: i32) -> (i32, i32) {
    %c0_i32 = arith.constant 0 : i32
    %c0_i32_0 = arith.constant 0 : i32
    %c0_i32_1 = arith.constant 0 : i32
    return %c0_i32, %c0_i32_0 : i32, i32
  }
  func.func @transform_5(%arg0: i32) -> (i32, i32) {
    %c0_i32 = arith.constant 0 : i32
    %c0_i32_0 = arith.constant 0 : i32
    %c0_i32_1 = arith.constant 0 : i32
    return %c0_i32, %c0_i32_0 : i32, i32
  }
  func.func @transform_6(%arg0: i32) -> (i32, i32) {
    %c0_i32 = arith.constant 0 : i32
    %c0_i32_0 = arith.constant 0 : i32
    %c0_i32_1 = arith.constant 0 : i32
    return %c0_i32, %c0_i32_0 : i32, i32
  }
  func.func @transform_7(%arg0: i32) -> (i32, i32, i32, i32) {
    %c0_i32 = arith.constant 0 : i32
    %c0_i32_0 = arith.constant 0 : i32
    %c0_i32_1 = arith.constant 0 : i32
    %c0_i32_2 = arith.constant 0 : i32
    return %arg0, %c0_i32, %c0_i32_0, %c0_i32_1 : i32, i32, i32, i32
  }
}

</mosaic_0001>

<bundles_post_ra>
// kernel: encoder_forward.4
= control target key start
LH: loop header
LB: loop body
LE: loop exit
PB: predicated region body
PF: predicated region fallthrough
CT: control target
= control target key end

     0   :  { %12 = vsyncpa [#allocation4], 0  ;;  %s2947_s0 = inlined_call_operand.hbm [shape: bf16[2,8,2,8,8], index: 0, kind: input, shape index: {}]   ;;  %s2948_s1 = inlined_call_operand.hbm [shape: bf16[4,8], index: 1, kind: input, shape index: {}]   ;;  %s2949_s2 = inlined_call_operand.hbm [shape: f32[1,8], index: 2, kind: input, shape index: {}]   ;;  %s2950_s3 = inlined_call_operand.hbm [shape: f32[9,8], index: 3, kind: input, shape index: {}]   ;;  %s2951_s4 = inlined_call_operand.hbm [shape: f32[1,8], index: 4, kind: input, shape index: {}]   ;;  %s2952_s5 = inlined_call_operand.hbm [shape: bf16[8,8], index: 5, kind: input, shape index: {}]   ;;  %s2953_s6 = inlined_call_operand.hbm [shape: f32[1,8], index: 6, kind: input, shape index: {}]   ;;  %s2954_s7 = inlined_call_operand.hbm [shape: bf16[2,8,8,8], index: 7, kind: output, shape index: {}]  }
   0x1   :  { %14 = vsyncpa [#allocation4 + $0x1], 0 }
   0x2   :  { %15 = vsyncpa [#allocation7], 0 }
   0x3   :  { %16 = vsyncpa [#allocation10], 0 }
   0x4   :  { %17 = vsyncpa [#allocation13], 0 }
   0x5   :  { %18 = vsyncpa [#allocation5], 0 }
   0x6   :  { %20 = vsyncpa [#allocation5 + $0x1], 0  ;;  %s2264_s24 = smov 0   ;;  %s2266_s25 = smov 0  }
   0x7   :  { %s2268_s26 = smov 0   ;;  %s2270_s27 = smov 0  }
   0x8 LB: > { %s2208_s28 = smov [#allocation6]   ;;  %s2285_s30 = sadd.s32 4294967295, %s2206_s27   ;;  %s2206_s27 = sphi %s2270_s27, %s2980_s27   ;;  %s2202_s26 = sphi %s2268_s26, %s2979_s26   ;;  %s2198_s25 = sphi %s2266_s25, %s2978_s25   ;;  %s2194_s24 = sphi %s2264_s24, %s2977_s24  }
   0x9   : > { %s222_s29 = sshll.u32 %s2208_s28, 4  ;;  %p1633_p0 = scmp.ge.s32.totalorder %s2206_s27, 1  ;;  %s223_s29 = int_to_ptr.vmem [resolvable:$true] %s222_s29 }
   0xa   : > { %p2955_p1 = scmp.eq.s32.totalorder %s2285_s30, 0  ;;  %p209_p2 = scmp.lt.s32.totalorder %s2206_s27, 3 }
   0xb   : > { %s2209_s9 = smov [#allocation9]   ;;  %s2210_s12 = smov [#allocation12]  }
   0xc   : > { %p2290_p3 = pnand %p1633_p0, %p209_p2  ;;  %s243_s10 = sshll.u32 %s2209_s9, 4  ;;  %s2297_s10 = int_to_ptr.vmem [resolvable:$true] %s243_s10 }
   0xd   : > { %s268_s13 = sshll.u32 %s2210_s12, 4  ;;  %s1930_s16 = scalar_lea.hbm %s2948_s1, 32  ;;  %s2305_s13 = int_to_ptr.vmem [resolvable:$true] %s268_s13 }
   0xe   : > { %s2958_s8 = scalar_select %p2290_p3, 1, 0 }
   0xf   : > { %p1827_p5 = pneg %p2290_p3  ;;  %p1931_p7 = scmp.ne.s32.totalorder %s2948_s1, %s1930_s16 }
  0x10   : > { %p1937_p11 = scmp.lt.u32.totalorder %s1930_s16, %s2948_s1 }
  0x11   : > { %p2301_p6 = pnand %p1827_p5, %p2955_p1 }
  0x13   : > { %p2315_p8 = pneg %p2301_p6 }
  0x15   : > { %p1933_p9 = pnand %p2315_p8, %p1931_p7 }
  0x17   : > { %p1934_p10 = pneg %p1933_p9 }
  0x19   : > { %p1939_p12 = pnand %p1937_p11, %p1934_p10 }
  0x1b   : > { %1942 = shalt.err (!%p1939_p12)
}
  0x1c   : > { %s1943_s22 = scalar_lea.vmem %s223_s29, 32  ;;  %p1951_p5 = scmp.lt.s32.totalorder %s223_s29, %s223_s29 }
  0x1d   : > { %p1944_p13 = scmp.ne.s32.totalorder %s223_s29, %s1943_s22  ;;  %p1952_p4 = scmp.lt.s32.totalorder %s1943_s22, %s1943_s22 }
  0x1f   : > { %p1946_p0 = pnand %p1944_p13, %p2315_p8  ;;  %p1953_p1 = por %p1952_p4, %p1951_p5 }
  0x21   : > { %p1947_p2 = pneg %p1946_p0 }
  0x23   : > { %p1954_p3 = pnand %p1953_p1, %p1947_p2 }
  0x25   : > { %1957 = shalt.err (!%p1954_p3)
}
  0x26   : > { %1830 = dma.hbm_to_vmem [thread:$0]  (!%p2301_p6), %s2948_s1, 32, %s223_s29, [#allocation7]  }
  0x27   : > { %s1958_s14 = scalar_lea.hbm %s2950_s3, 256 }
  0x28   : > { %p1959_p7 = scmp.ne.s32.totalorder %s2950_s3, %s1958_s14  ;;  %p1965_p1 = scmp.lt.u32.totalorder %s1958_s14, %s2950_s3 }
  0x2a   : > { %p1961_p9 = pnand %p1959_p7, %p2315_p8 }
  0x2c   : > { %p1962_p4 = pneg %p1961_p9 }
  0x2e   : > { %p1967_p3 = pnand %p1965_p1, %p1962_p4 }
  0x30   : > { %1970 = shalt.err (!%p1967_p3)
}
  0x31   : > { %s1971_s29 = scalar_lea.vmem %s2297_s10, 256  ;;  %p1979_p13 = scmp.lt.s32.totalorder %s2297_s10, %s2297_s10 }
  0x32   : > { %p1972_p10 = scmp.ne.s32.totalorder %s2297_s10, %s1971_s29  ;;  %p1980_p0 = scmp.lt.s32.totalorder %s1971_s29, %s1971_s29 }
  0x34   : > { %p1974_p11 = pnand %p1972_p10, %p2315_p8  ;;  %p1981_p2 = por %p1980_p0, %p1979_p13 }
  0x36   : > { %p1975_p12 = pneg %p1974_p11 }
  0x38   : > { %p1982_p5 = pnand %p1981_p2, %p1975_p12 }
  0x3a   : > { %1985 = shalt.err (!%p1982_p5)
}
  0x3b   : > { %s2211_s20 = smov 128   ;;  %s2212_s21 = smov 8  }
  0x3c   : > { %1836 = dma.hbm_to_vmem [thread:$0]  (!%p2301_p6), %s2950_s3, 256, %s2297_s10, [#allocation10], %s2211_s20, %s2211_s20, %s2212_s21  }
  0x3d   : > { %s1986_s12 = scalar_lea.hbm %s2952_s5, 64 }
  0x3e   : > { %p1987_p7 = scmp.ne.s32.totalorder %s2952_s5, %s1986_s12  ;;  %p1993_p1 = scmp.lt.u32.totalorder %s1986_s12, %s2952_s5 }
  0x40   : > { %p1989_p9 = pnand %p1987_p7, %p2315_p8 }
  0x42   : > { %p1990_p4 = pneg %p1989_p9 }
  0x44   : > { %p1995_p3 = pnand %p1993_p1, %p1990_p4 }
  0x46   : > { %1998 = shalt.err (!%p1995_p3)
}
  0x47   : > { %s1999_s10 = scalar_lea.vmem %s2305_s13, 64  ;;  %p2007_p13 = scmp.lt.s32.totalorder %s2305_s13, %s2305_s13 }
  0x48   : > { %p2000_p10 = scmp.ne.s32.totalorder %s2305_s13, %s1999_s10  ;;  %p2008_p0 = scmp.lt.s32.totalorder %s1999_s10, %s1999_s10 }
  0x4a   : > { %p2002_p11 = pnand %p2000_p10, %p2315_p8  ;;  %p2009_p2 = por %p2008_p0, %p2007_p13 }
  0x4c   : > { %p2003_p12 = pneg %p2002_p11 }
  0x4e   : > { %p2010_p5 = pnand %p2009_p2, %p2003_p12 }
  0x50   : > { %2013 = shalt.err (!%p2010_p5)
}
  0x51   : > { %1842 = dma.hbm_to_vmem [thread:$0]  (!%p2301_p6), %s2952_s5, 64, %s2305_s13, [#allocation13]  }
  0x52   : > { %s2213_s20 = smov [#allocation8]   ;;  %s2214_s22 = smov [#allocation11]  }
  0x53   : > { %s233_s21 = sshll.u32 %s2213_s20, 4  ;;  %s257_s23 = sshll.u32 %s2214_s22, 4  ;;  %s234_s21 = int_to_ptr.vmem [resolvable:$true] %s233_s21  ;;  %s258_s23 = int_to_ptr.vmem [resolvable:$true] %s257_s23 }
  0x54   : > { %s2014_s12 = scalar_lea.hbm %s2949_s2, 16 }
  0x55   : > { %p2015_p7 = scmp.ne.s32.totalorder %s2949_s2, %s2014_s12  ;;  %p2021_p1 = scmp.lt.u32.totalorder %s2014_s12, %s2949_s2 }
  0x57   : > { %p2017_p9 = pnand %p2015_p7, %p2315_p8 }
  0x59   : > { %p2018_p4 = pneg %p2017_p9 }
  0x5b   : > { %p2023_p3 = pnand %p2021_p1, %p2018_p4 }
  0x5d   : > { %2026 = shalt.err (!%p2023_p3)
}
  0x5e   : > { %s2027_s13 = scalar_lea.vmem %s234_s21, 16  ;;  %s2034_s10 = scalar_lea.vmem %s234_s21, 32 }
  0x5f   : > { %p2028_p10 = scmp.ne.s32.totalorder %s234_s21, %s2027_s13  ;;  %p2035_p13 = scmp.lt.s32.totalorder %s234_s21, %s234_s21 }
  0x60   : > { %p2036_p0 = scmp.lt.s32.totalorder %s2034_s10, %s2027_s13 }
  0x61   : > { %p2030_p11 = pnand %p2028_p10, %p2315_p8 }
  0x62   : > { %p2037_p2 = por %p2036_p0, %p2035_p13 }
  0x63   : > { %p2031_p12 = pneg %p2030_p11 }
  0x65   : > { %p2038_p5 = pnand %p2037_p2, %p2031_p12 }
  0x67   : > { %2041 = shalt.err (!%p2038_p5)
}
  0x68   : > { %1833 = dma.hbm_to_vmem [thread:$0]  (!%p2301_p6), %s2949_s2, 16, %s234_s21, [#allocation7]  }
  0x69   : > { %s2042_s28 = scalar_lea.hbm %s2951_s4, 16 }
  0x6a   : > { %p2043_p7 = scmp.ne.s32.totalorder %s2951_s4, %s2042_s28  ;;  %p2049_p1 = scmp.lt.u32.totalorder %s2042_s28, %s2951_s4 }
  0x6c   : > { %p2045_p9 = pnand %p2043_p7, %p2315_p8 }
  0x6e   : > { %p2046_p4 = pneg %p2045_p9 }
  0x70   : > { %p2051_p3 = pnand %p2049_p1, %p2046_p4 }
  0x72   : > { %2054 = shalt.err (!%p2051_p3)
}
  0x73   : > { %s2055_s16 = scalar_lea.vmem %s258_s23, 16  ;;  %s2062_s21 = scalar_lea.vmem %s258_s23, 32 }
  0x74   : > { %p2056_p10 = scmp.ne.s32.totalorder %s258_s23, %s2055_s16  ;;  %p2063_p13 = scmp.lt.s32.totalorder %s258_s23, %s258_s23 }
  0x75   : > { %p2064_p0 = scmp.lt.s32.totalorder %s2062_s21, %s2055_s16 }
  0x76   : > { %p2058_p11 = pnand %p2056_p10, %p2315_p8 }
  0x77   : > { %p2065_p2 = por %p2064_p0, %p2063_p13 }
  0x78   : > { %p2059_p12 = pneg %p2058_p11 }
  0x7a   : > { %p2066_p5 = pnand %p2065_p2, %p2059_p12 }
  0x7c   : > { %2069 = shalt.err (!%p2066_p5)
}
  0x7d   : > { %1839 = dma.hbm_to_vmem [thread:$0]  (!%p2301_p6), %s2951_s4, 16, %s258_s23, [#allocation10]  }
  0x7e   : > { %s2215_s10 = smov [#allocation14]   ;;  %s2070_s22 = scalar_lea.hbm %s2953_s6, 16 }
  0x7f   : > { %s279_s18 = sshll.u32 %s2215_s10, 4  ;;  %p2071_p7 = scmp.ne.s32.totalorder %s2953_s6, %s2070_s22  ;;  %s280_s18 = int_to_ptr.vmem [resolvable:$true] %s279_s18 }
  0x80   : > { %p2077_p1 = scmp.lt.u32.totalorder %s2070_s22, %s2953_s6 }
  0x81   : > { %p2073_p9 = pnand %p2071_p7, %p2315_p8 }
  0x83   : > { %p2074_p4 = pneg %p2073_p9 }
  0x85   : > { %p2079_p3 = pnand %p2077_p1, %p2074_p4 }
  0x87   : > { %2082 = shalt.err (!%p2079_p3)
}
  0x88   : > { %s2083_s23 = scalar_lea.vmem %s280_s18, 16  ;;  %s2090_s15 = scalar_lea.vmem %s280_s18, 32 }
  0x89   : > { %p2084_p10 = scmp.ne.s32.totalorder %s280_s18, %s2083_s23  ;;  %p2091_p13 = scmp.lt.s32.totalorder %s280_s18, %s280_s18 }
  0x8a   : > { %p2092_p0 = scmp.lt.s32.totalorder %s2090_s15, %s2083_s23 }
  0x8b   : > { %p2086_p11 = pnand %p2084_p10, %p2315_p8 }
  0x8c   : > { %p2093_p2 = por %p2092_p0, %p2091_p13 }
  0x8d   : > { %p2087_p12 = pneg %p2086_p11 }
  0x8f   : > { %p2094_p5 = pnand %p2093_p2, %p2087_p12 }
  0x91   : > { %2097 = shalt.err (!%p2094_p5)
}
  0x92   : > { %1845 = dma.hbm_to_vmem [thread:$0]  (!%p2301_p6), %s2953_s6, 16, %s280_s18, [#allocation13]  }
  0x93   : > { %s1632_s19 = sadd.s32 4294967294, %s2206_s27   ;;  %s2433_s11 = sadd.s32 1, %s2206_s27  }
  0x94   : > { %s30_s17 = ssub.s32 %s2206_s27, %s2433_s11  ;;  %s33_s13 = sadd.s32 1, %s2202_s26 }
  0x95   : > { %p31_p8 = scmp.eq.s32.totalorder %s30_s17, 0  ;;  %p40_p7 = scmp.ne.s32.totalorder %s2202_s26, %s2198_s25 }
  0x96   : > { %p41_p9 = scmp.eq.s32.totalorder %s2206_s27, 0  ;;  %p46_p4 = scmp.ne.s32.totalorder %s2198_s25, %s2194_s24 }
  0x97   : > { %s2444_s10 = scalar_select %p31_p8, %s2202_s26, %s33_s13  }
  0x98   : > { %p2446_p1 = por %p41_p9, %p40_p7  ;;  %p2962_p3 = scmp.eq.s32.totalorder %s2285_s30, 0 }
  0x99   : > { %p196_p10 = scmp.eq.s32.totalorder %s2285_s30, 1  ;;  %p202_p11 = scmp.eq.s32.totalorder %s1632_s19, 1 }
  0x9a   : > { %p2452_p6 = por %p2962_p3, %p46_p4  ;;  %p1860_p12 = scmp.lt.s32.totalorder %s2206_s27, 2 }
  0x9b   : > { %s290_s20 = sand.u32 1, %s2202_s26   ;;  %p2459_p13 = por %p196_p10, %p40_p7 }
  0x9c   : > { %p2463_p0 = por %p202_p11, %p46_p4  ;;  %s1641_s9 = sshll.u32 %s290_s20, 6 }
  0x9d   : > { %s2964_s22 = scalar_select %p2459_p13, 1, 0 }
  0x9e   : > { %s2965_s28 = scalar_select %p2463_p0, 1, 0 }
  0x9f   : > { %s1714_s12 = sshll.u32 %s2206_s27, 10  ;;  %s294_s16 = scalar_lea.vmem [#allocation3], %s1641_s9 }
  0xa0   : > { %s2471_s15 = scalar_lea.hbm %s2947_s0, %s1714_s12  ;;  %s301_s21 = sshll.u32 %s294_s16, 4  ;;  %s2473_s21 = int_to_ptr.vmem [resolvable:$true] %s301_s21 }
  0xa1   : > { %p2477_p2 = pnand %p1860_p12, %p2446_p1  ;;  %s2481_s17 = scalar_lea.sflag [#allocation4], %s290_s20 }
  0xa2   : > { %s2098_s13 = scalar_lea.hbm %s2471_s15, 1024  ;;  %s2103_s29 = scalar_lea.hbm %s2947_s0, 2048 }
  0xa3   : > { %p2099_p5 = scmp.ne.s32.totalorder %s2471_s15, %s2098_s13  ;;  %p2100_p8 = pneg %p2477_p2 }
  0xa4   : > { %p2104_p4 = scmp.lt.u32.totalorder %s2471_s15, %s2947_s0  ;;  %p2105_p1 = scmp.lt.u32.totalorder %s2103_s29, %s2098_s13 }
  0xa5   : > { %p2101_p7 = pnand %p2100_p8, %p2099_p5  ;;  %p2107_p10 = scmp.lt.u32.totalorder %s2098_s13, %s2471_s15 }
  0xa6   : > { %p2106_p3 = por %p2105_p1, %p2104_p4 }
  0xa7   : > { %p2102_p9 = pneg %p2101_p7 }
  0xa8   : > { %p2108_p11 = por %p2107_p10, %p2106_p3 }
  0xaa   : > { %p2109_p12 = pnand %p2108_p11, %p2102_p9 }
  0xac   : > { %2112 = shalt.err (!%p2109_p12)
}
  0xad   : > { %s2113_s20 = scalar_lea.vmem %s2473_s21, 1024  ;;  %s2216_s16 = smov [#allocation3]  }
  0xae   : > { %p2114_p5 = scmp.ne.s32.totalorder %s2473_s21, %s2113_s20  ;;  %s2118_s9 = sshll.u32 %s2216_s16, 4  ;;  %s2119_s9 = int_to_ptr.vmem [resolvable:$false] %s2118_s9 }
  0xaf   : > { %s2120_s12 = scalar_lea.vmem %s2119_s9, 2048  ;;  %p2121_p13 = scmp.lt.s32.totalorder %s2473_s21, %s2119_s9 }
  0xb0   : > { %p2116_p7 = pnand %p2114_p5, %p2100_p8  ;;  %p2122_p4 = scmp.lt.s32.totalorder %s2120_s12, %s2113_s20 }
  0xb2   : > { %p2117_p0 = pneg %p2116_p7  ;;  %p2123_p1 = por %p2122_p4, %p2121_p13 }
  0xb4   : > { %p2124_p3 = pnand %p2123_p1, %p2117_p0 }
  0xb6   : > { %2127 = shalt.err (!%p2124_p3)
}
  0xb7   : > { %s2217_s13 = smov 64   ;;  %s2218_s29 = smov 4  }
  0xb8   : > { %1849 = dma.hbm_to_vmem [thread:$0]  (!%p2477_p2), %s2471_s15, 1024, %s2473_s21, %s2481_s17, %s2217_s13, %s2217_s13, %s2218_s29  }
  0xb9   : > { %p2967_p8 = scmp.ne.s32.totalorder %s2958_s8, 0 }
  0xba   : > { %s2512_s14 = sand.u32 (!%p2967_p8), 1, %s2198_s25  }
  0xbb   : > { %313 = sbr.rel (%p2967_p8) target bundleno = 855 (0x357), region = 48  ;;  %s1645_s23 = sshll.u32 (!%p2967_p8), %s2512_s14, 6 }
  0xbc   : > { %s316_s20 = scalar_lea.sflag (!%p2967_p8), [#allocation4], %s2512_s14  ;;  %s2516_s16 = scalar_lea.vmem (!%p2967_p8), [#allocation3], %s1645_s23 }
  0xc2   : > { %2173 = dma.done.wait (%p2452_p6), %s316_s20, 1024  }
  0xc3   : > { %2175 = vsyncadd (%p2452_p6), %s316_s20, 4294966272  ;;  %p2968_p13 = scmp.eq.s32.totalorder %s2285_s30, 0 }
  0xc5   : > { %2177 = dma.done.wait (%p2968_p13), [#allocation7], 48   ;;  %p2969_p0 = pmov %p2968_p13 }
  0xc7   : > { %2179 = vsyncadd (%p2969_p0), [#allocation7], 4294967248  ;;  %p2970_p2 = pmov %p2969_p0 }
  0xc8   : > { %p2971_p9 = pmov %p2969_p0 }
  0xc9   : > { %2181 = dma.done.wait (%p2970_p2), [#allocation10], 272  }
  0xca   : > { %2183 = vsyncadd (%p2971_p9), [#allocation10], 4294967024  ;;  %p2972_p10 = pmov %p2969_p0 }
  0xcb   : > { %p2973_p11 = pmov %p2969_p0 }
  0xcc   : > { %2185 = dma.done.wait (%p2972_p10), [#allocation13], 80  }
  0xcd   : > { %2187 = vsyncadd (%p2973_p11), [#allocation13], 4294967216  ;;  %v1914_v0 = vld [vmem:[%s2516_s16] ss:$8 sps:$4 sm:$0xff]   ;;  %v1915_v1 = vld [vmem:[%s2516_s16 + $0x10] ss:$8 sps:$4 sm:$0xff]  }
  0xce   : > { %s2219_s8 = smov 124   ;;  %v1916_v2 = vld [vmem:[%s2516_s16 + $0x20] ss:$8 sps:$4 sm:$0xff]   ;;  %v1917_v3 = vld [vmem:[%s2516_s16 + $0x30] ss:$8 sps:$4 sm:$0xff]   ;;  %vm470_vm0 = vcmask 1041408  }
  0xcf   : > { %616 = vrot.lane.b32.xlu0 %v1914_v0, %s2219_s8  ;;  %620 = vrot.lane.b32.xlu1 %v1916_v2, %s2219_s8  ;;  %vm457_vm1 = vcmask 31744   ;;  %v1918_v4 = vld [vmem:[%s2516_s16 + $0x4] ss:$8 sps:$4 sm:$0xff]   ;;  %v1919_v5 = vld [vmem:[%s2516_s16 + $0x14] ss:$8 sps:$4 sm:$0xff]   ;;  %vm375_vm2 = vcmask 64512  }
  0xd0   : > { %v1920_v6 = vld [vmem:[%s2516_s16 + $0x24] ss:$8 sps:$4 sm:$0xff]   ;;  %v421_v7 = vld [vmem:[#allocation6] sm:$0x3]  ;;  %v1921_v10 = vld [vmem:[%s2516_s16 + $0x34] ss:$8 sps:$4 sm:$0xff]  }
  0xd1   : > { %1794 = vmatprep.subr.msk.bf16.mxu1 %vm470_vm0, %v421_v7  ;;  %v472_v8 = vsel %vm470_vm0, %v421_v7, 0  ;;  %v1922_v9 = vld [vmem:[%s2516_s16 + $0x20] ss:$8 sps:$4 sm:$0xff]   ;;  %1793 = vmatprep.subr.msk.bf16.mxu0 %vm470_vm0, %v421_v7  ;;  %v1923_v11 = vld [vmem:[%s2516_s16 + $0x30] ss:$8 sps:$4 sm:$0xff]   ;;  %vm377_vm3 = vcmask 57344  }
  0xd2   : > { %1792 = vmatpush3.bf16.msra.mxu1 %v472_v8  ;;  %1747 = vmatprep.mubr.msk.bf16.mxu1 %vm457_vm1, %v1922_v9  ;;  %v1924_v12 = vld [vmem:[%s2516_s16] ss:$8 sps:$4 sm:$0xff]   ;;  %v1925_v13 = vld [vmem:[%s2516_s16 + $0x10] ss:$8 sps:$4 sm:$0xff]   ;;  %v1926_v14 = vld [vmem:[%s2516_s16 + $0x4] ss:$8 sps:$4 sm:$0xff]  }
  0xd3   : > { %618 = vrot.lane.b32.xlu0 %v1915_v1, %s2219_s8  ;;  %622 = vrot.lane.b32.xlu1 %v1917_v3, %s2219_s8  ;;  %v1927_v15 = vld [vmem:[%s2516_s16 + $0x14] ss:$8 sps:$4 sm:$0xff]   ;;  %v1928_v16 = vld [vmem:[%s2516_s16 + $0x24] ss:$8 sps:$4 sm:$0xff]   ;;  %v2220_v26 = vmov 0.0   ;;  %vm1402_vm4 = vcmask 1043456  }
  0xd4   : > { %1795 = vmatprep.subr.msk.bf16.mxu1 %vm470_vm0, %v421_v7  ;;  %1742 = vmatpush3.bf16.msra.mxu0 %v472_v8  ;;  %v1929_v17 = vld [vmem:[%s2516_s16 + $0x34] ss:$8 sps:$4 sm:$0xff]   ;;  %381 = vst.msk [vmem:[#allocation2 + $0x120] sm:$0xff] %vm375_vm2, %v2220_v26  ;;  %383 = vst.msk [vmem:[#allocation2 + $0x1b0] sm:$0xff] %vm375_vm2, %v2220_v26  ;;  %v2601_v27 = vld [vmem:[#allocation8] ss:$0 sm:$0xff] }
  0xd5   : > { %1748 = vmatmul.mubr.msk.bf16.vlgmr.msra.gmra.mrb[0].mxu1 %vm457_vm1, %v1923_v11  ;;  %1743 = vmatprep.mubr.msk.bf16.mxu0 %vm457_vm1, %v1924_v12  ;;  %415 = vst.msk [vmem:[#allocation2 + $0x1e0] sm:$0x1] %vm377_vm3, %v2220_v26  ;;  %382 = vst.msk [vmem:[#allocation2 + $0x128] sm:$0x1] %vm377_vm3, %v2220_v26  ;;  %s1652_s18 = sshll.u32 %s2512_s14, 5  ;;  %vm1479_vm5 = vcmask 60416  }
  0xd6   : > { %1752 = vmatpush3.bf16.msra.mxu1 %v472_v8  ;;  %1796 = vmatprep.subr.msk.bf16.mxu0 %vm470_vm0, %v421_v7  ;;  %384 = vst.msk [vmem:[#allocation2 + $0x1b8] sm:$0x1] %vm377_vm3, %v2220_v26  ;;  %395 = vst.msk [vmem:[#allocation2 + $0xa0] sm:$0x1] %vm377_vm3, %v2220_v26  ;;  %s373_s15 = scalar_lea.vmem [#allocation15], %s1652_s18  ;;  %s1715_s21 = sshll.u32 %s2285_s30, 9 }
  0xd7   : > { %933 = vrot.lane.b32.xlu0 %v1918_v4, %s2219_s8  ;;  %935 = vrot.lane.b32.xlu1 %v1919_v5, %s2219_s8  ;;  %396 = vst.msk [vmem:[#allocation2 + $0xb0] sm:$0x1] %vm377_vm3, %v2220_v26  ;;  %397 = vst.msk [vmem:[#allocation2 + $0xc0] sm:$0x1] %vm377_vm3, %v2220_v26  ;;  %s1502_s19 = sshll.u32 %s373_s15, 4  ;;  %s2898_s12 = scalar_lea.hbm %s2954_s7, %s1715_s21  ;;  %s2900_s19 = int_to_ptr.vmem [resolvable:$true] %s1502_s19 }
  0xd8   : > { %1744 = vmatmul.mubr.msk.bf16.vlgmr.msra.gmra.mrb[0].mxu0 %vm457_vm1, %v1925_v13  ;;  %1797 = vmatprep.subr.msk.bf16.mxu1 %vm470_vm0, %v421_v7  ;;  %398 = vst.msk [vmem:[#allocation2 + $0xd0] sm:$0x1] %vm377_vm3, %v2220_v26  ;;  %399 = vst.msk [vmem:[#allocation2 + $0xe0] sm:$0x1] %vm377_vm3, %v2220_v26  ;;  %s1489_s30 = scalar_lea.sflag [#allocation5], %s2512_s14  ;;  %s2128_s13 = scalar_lea.vmem %s2900_s19, 512 }
  0xd9   : > { %1762 = vmatpush3.bf16.msra.mxu0 %v472_v8  ;;  %1763 = vmatprep.mubr.msk.bf16.mxu0 %vm457_vm1, %v1926_v14  ;;  %400 = vst.msk [vmem:[#allocation2 + $0xf0] sm:$0x1] %vm377_vm3, %v2220_v26  ;;  %401 = vst.msk [vmem:[#allocation2 + $0x100] sm:$0x1] %vm377_vm3, %v2220_v26  ;;  %p2129_p6 = scmp.ne.s32.totalorder %s2900_s19, %s2128_s13  ;;  %p2974_p12 = scmp.ne.s32.totalorder %s2964_s22, 0 }
  0xda   : > { %402 = vst.msk [vmem:[#allocation2 + $0x110] sm:$0x1] %vm377_vm3, %v2220_v26  ;;  %413 = vst.msk [vmem:[#allocation2 + $0x1c0] sm:$0x1] %vm377_vm3, %v2220_v26  ;;  %s2221_s29 = smov [#allocation15]  }
  0xdb   : > { %937 = vrot.lane.b32.xlu0 %v1920_v6, %s2219_s8  ;;  %939 = vrot.lane.b32.xlu1 %v1921_v10, %s2219_s8  ;;  %414 = vst.msk [vmem:[#allocation2 + $0x1d0] sm:$0x1] %vm377_vm3, %v2220_v26  ;;  %416 = vst.msk [vmem:[#allocation2 + $0x1f0] sm:$0x1] %vm377_vm3, %v2220_v26  ;;  %p2130_p5 = pnand %p2129_p6, %p2974_p12  ;;  %s2132_s23 = sshll.u32 %s2221_s29, 4  ;;  %s2133_s23 = int_to_ptr.vmem [resolvable:$false] %s2132_s23 }
  0xdc   : > { %417 = vst.msk [vmem:[#allocation2 + $0x200] sm:$0x1] %vm377_vm3, %v2220_v26  ;;  %418 = vst.msk [vmem:[#allocation2 + $0x210] sm:$0x1] %vm377_vm3, %v2220_v26  ;;  %s2134_s20 = scalar_lea.vmem %s2133_s23, 1024  ;;  %p2135_p4 = scmp.lt.s32.totalorder %s2900_s19, %s2133_s23 }
  0xdd   : > { %419 = vst.msk [vmem:[#allocation2 + $0x220] sm:$0x1] %vm377_vm3, %v2220_v26  ;;  %420 = vst.msk [vmem:[#allocation2 + $0x230] sm:$0x1] %vm377_vm3, %v2220_v26  ;;  %p2131_p7 = pneg %p2130_p5  ;;  %p2136_p1 = scmp.lt.s32.totalorder %s2134_s20, %s2128_s13 }
  0xde   : > { %412 = vst.msk [vmem:[#allocation2 + $0x1b0] sm:$0x1] %vm377_vm3, %v2220_v26 }
  0xdf   : > { %p2137_p3 = por %p2136_p1, %p2135_p4 }
  0xe0   : > { %1764 = vmatmul.mubr.msk.bf16.vlgmr.msra.gmra.mrb[4].mxu0 %vm457_vm1, %v1927_v15 }
  0xe1   : > { %1767 = vmatprep.mubr.msk.bf16.mxu0 %vm457_vm1, %v1928_v16  ;;  %p2138_p8 = pnand %p2137_p3, %p2131_p7 }
  0xe8   : > { %1768 = vmatmul.mubr.msk.bf16.gmra.mrb[8].mxu0 %vm457_vm1, %v1929_v17 }
 0x141   : > { %v617_v18 = vpop.permute.xlu0 %616  ;;  %v621_v19 = vpop.permute.xlu1 %620 }
 0x142   : > { %1753 = vmatprep.mubr.msk.bf16.mxu1 %vm457_vm1, %v617_v18 }
 0x145   : > { %v619_v20 = vpop.permute.xlu0 %618  ;;  %v623_v21 = vpop.permute.xlu1 %622 }
 0x146   : > { %1754 = vmatmul.mubr.msk.bf16.vlgmr.msra.gmra.mrb[4].mxu1 %vm457_vm1, %v619_v20 }
 0x147   : > { %1772 = vmatpush3.bf16.msra.mxu1 %v472_v8  ;;  %1757 = vmatprep.mubr.msk.bf16.mxu1 %vm457_vm1, %v621_v19 }
 0x149   : > { %v934_v22 = vpop.permute.xlu0 %933  ;;  %v936_v23 = vpop.permute.xlu1 %935 }
 0x14d   : > { %v938_v24 = vpop.permute.xlu0 %937  ;;  %v940_v25 = vpop.permute.xlu1 %939 }
 0x14e   : > { %1758 = vmatmul.mubr.msk.bf16.gmra.mrb[8].mxu1 %vm457_vm1, %v623_v21 }
 0x14f   : > { %1773 = vmatprep.mubr.msk.bf16.mxu1 %vm457_vm1, %v934_v22 }
 0x156   : > { %1774 = vmatmul.mubr.msk.bf16.vlgmr.msra.gmra.mrb[12].mxu1 %vm457_vm1, %v936_v23 }
 0x157   : > { %1777 = vmatprep.mubr.msk.bf16.mxu1 %vm457_vm1, %v938_v24 }
 0x15e   : > { %1778 = vmatmul.mubr.msk.bf16.gmra.mrb[16].mxu1 %vm457_vm1, %v940_v25 }
 0x1a8   : > { %v1749_v28 = vpop.f32.mrb[0].mxu1 }
 0x1a9   : > { %v533_v29 = vadd.f32 %v1749_v28, %v2601_v27  ;;  %v524_v30 = vpop.f32.mrb[1].mxu1 }
 0x1aa   : > { %v525_v31 = vadd.f32 %v2601_v27, %v524_v30  ;;  %v1750_v32 = vpop.f32.mrb[2].mxu1 }
 0x1ab   : > { %v1745_v33 = vpop.f32.mrb[0].mxu0  ;;  %v545_v34 = vadd.f32 3.0, %v533_v29  ;;  %v536_v35 = vadd.f32 %v1750_v32, %v2601_v27  ;;  %v527_v36 = vpop.f32.mrb[3].mxu1 }
 0x1ac   : > { %v517_v37 = vadd.f32 %v1745_v33, %v2601_v27  ;;  %v508_v38 = vpop.f32.mrb[1].mxu0  ;;  %v543_v39 = vadd.f32 3.0, %v525_v31  ;;  %v528_v40 = vadd.f32 %v2601_v27, %v527_v36 }
 0x1ad   : > { %v509_v41 = vadd.f32 %v2601_v27, %v508_v38  ;;  %v1746_v42 = vpop.f32.mrb[2].mxu0  ;;  %v553_v43 = vmax.f32 %v545_v34, 0.0  ;;  %v546_v44 = vadd.f32 3.0, %v536_v35 }
 0x1ae   : > { %v541_v45 = vadd.f32 3.0, %v517_v37  ;;  %v520_v46 = vadd.f32 %v1746_v42, %v2601_v27  ;;  %v511_v47 = vpop.f32.mrb[3].mxu0  ;;  %v551_v48 = vmax.f32 %v543_v39, 0.0  ;;  %v544_v49 = vadd.f32 3.0, %v528_v40 }
 0x1af   : > { %v539_v50 = vadd.f32 3.0, %v509_v41  ;;  %v512_v51 = vadd.f32 %v2601_v27, %v511_v47  ;;  %v561_v52 = vmin.f32 %v553_v43, 6.0  ;;  %v554_v53 = vmax.f32 %v546_v44, 0.0  ;;  %v1382_v44 = vld [vmem:[#allocation12] sm:$0xf] }
 0x1b0   : > { %v549_v54 = vmax.f32 %v541_v45, 0.0  ;;  %v542_v55 = vadd.f32 3.0, %v520_v46  ;;  %v559_v56 = vmin.f32 %v551_v48, 6.0  ;;  %v552_v57 = vmax.f32 %v544_v49, 0.0  ;;  %1798 = vmatprep.subr.msk.bf16.mxu0 %vm1402_vm4, %v1382_v44 }
 0x1b1   : > { %v547_v58 = vmax.f32 %v539_v50, 0.0  ;;  %v540_v59 = vadd.f32 3.0, %v512_v51  ;;  %v569_v60 = vmul.f32 %v561_v52, %v533_v29  ;;  %v562_v61 = vmin.f32 %v554_v53, 6.0 }
 0x1b2   : > { %v557_v62 = vmin.f32 %v549_v54, 6.0  ;;  %v550_v63 = vmax.f32 %v542_v55, 0.0  ;;  %v567_v0 = vmul.f32 %v559_v56, %v525_v31  ;;  %v560_v1 = vmin.f32 %v552_v57, 6.0 }
 0x1b3   : > { %v555_v2 = vmin.f32 %v547_v58, 6.0  ;;  %v548_v3 = vmax.f32 %v540_v59, 0.0  ;;  %v1765_v4 = vpop.f32.mrb[4].mxu0  ;;  %v577_v5 = vmul.f32 0.16666667, %v569_v60  ;;  %v570_v6 = vmul.f32 %v562_v61, %v536_v35 }
 0x1b4   : > { %v565_v7 = vmul.f32 %v557_v62, %v517_v37  ;;  %v558_v8 = vmin.f32 %v550_v63, 6.0  ;;  %v825_v9 = vpop.f32.mrb[5].mxu0  ;;  %v575_v10 = vmul.f32 0.16666667, %v567_v0  ;;  %v568_v11 = vmul.f32 %v560_v1, %v528_v40 }
 0x1b5   : > { %v563_v12 = vmul.f32 %v555_v2, %v509_v41  ;;  %v556_v13 = vmin.f32 %v548_v3, 6.0  ;;  %v1766_v14 = vpop.f32.mrb[6].mxu0  ;;  %586 = vst.msk [vmem:[#allocation2 + $0x71] sm:$0xff] %vm375_vm2, %v577_v5  ;;  %v578_v15 = vmul.f32 0.16666667, %v570_v6  ;;  %v834_v18 = vadd.f32 %v1765_v4, %v2601_v27 }
 0x1b6   : > { %v573_v16 = vmul.f32 0.16666667, %v565_v7  ;;  %v566_v17 = vmul.f32 %v558_v8, %v520_v46  ;;  %v828_v19 = vpop.f32.mrb[7].mxu0  ;;  %584 = vst.msk [vmem:[#allocation2 + $0x51] sm:$0xff] %vm375_vm2, %v575_v10  ;;  %v576_v20 = vmul.f32 0.16666667, %v568_v11  ;;  %v826_v23 = vadd.f32 %v2601_v27, %v825_v9 }
 0x1b7   : > { %v571_v21 = vmul.f32 0.16666667, %v563_v12  ;;  %v564_v22 = vmul.f32 %v556_v13, %v512_v51  ;;  %587 = vst.msk [vmem:[#allocation2 + $0x81] sm:$0xff] %vm375_vm2, %v578_v15  ;;  %v858_v25 = vadd.f32 3.0, %v834_v18  ;;  %v837_v26 = vadd.f32 %v1766_v14, %v2601_v27 }
 0x1b8   : > { %582 = vst.msk [vmem:[#allocation2 + $0x31] sm:$0xff] %vm375_vm2, %v573_v16  ;;  %v574_v24 = vmul.f32 0.16666667, %v566_v17  ;;  %v829_v28 = vadd.f32 %v2601_v27, %v828_v19  ;;  %585 = vst.msk [vmem:[#allocation2 + $0x61] sm:$0xff] %vm375_vm2, %v576_v20  ;;  %v856_v30 = vadd.f32 3.0, %v826_v23  ;;  %v1404_v1 = vsel %vm1402_vm4, %v1382_v44, 0 }
 0x1b9   : > { %580 = vst.msk [vmem:[#allocation2 + $0x11] sm:$0xff] %vm375_vm2, %v571_v21  ;;  %v572_v29 = vmul.f32 0.16666667, %v564_v22  ;;  %v866_v31 = vmax.f32 %v858_v25, 0.0  ;;  %v859_v32 = vadd.f32 3.0, %v837_v26  ;;  %1782 = vmatpush3.bf16.msra.mxu0 %v1404_v1  ;;  %v1078_v15 = vlaneseq  ;;  %v1067_v19 = vld [vmem:[#allocation9] sm:$0xff] }
 0x1ba   : > { %583 = vst.msk [vmem:[#allocation2 + $0x41] sm:$0xff] %vm375_vm2, %v574_v24  ;;  %v857_v33 = vadd.f32 3.0, %v829_v28  ;;  %v864_v34 = vmax.f32 %v856_v30, 0.0  ;;  %v1099_v24 = vld [vmem:[#allocation2 + $0x121] sm:$0xff] }
 0x1bb   : > { %581 = vst.msk [vmem:[#allocation2 + $0x21] sm:$0xff] %vm375_vm2, %v572_v29  ;;  %v1769_v35 = vpop.f32.mrb[8].mxu0  ;;  %v874_v36 = vmin.f32 %v866_v31, 6.0  ;;  %v867_v37 = vmax.f32 %v859_v32, 0.0  ;;  %v1079_v16 = vshrl.u32 %v1078_v15, 7  ;;  %v1127_v29 = vld [vmem:[#allocation2 + $0x1b1] sm:$0xff] }
 0x1bc   : > { %v865_v38 = vmax.f32 %v857_v33, 0.0  ;;  %v850_v39 = vadd.f32 %v1769_v35, %v2601_v27  ;;  %v841_v40 = vpop.f32.mrb[9].mxu0  ;;  %v872_v41 = vmin.f32 %v864_v34, 6.0 }
 0x1bd   : > { %v842_v42 = vadd.f32 %v2601_v27, %v841_v40  ;;  %v1770_v43 = vpop.f32.mrb[10].mxu0  ;;  %v882_v45 = vmul.f32 %v874_v36, %v834_v18  ;;  %v875_v46 = vmin.f32 %v867_v37, 6.0  ;;  %v1080_v17 = vsub.s32 0, %v1079_v16 }
 0x1be   : > { %v873_v47 = vmin.f32 %v865_v38, 6.0  ;;  %v862_v48 = vadd.f32 3.0, %v850_v39  ;;  %v844_v49 = vpop.f32.mrb[11].mxu0  ;;  %v880_v50 = vmul.f32 %v872_v41, %v826_v23  ;;  %v853_v52 = vadd.f32 %v1770_v43, %v2601_v27  ;;  %v1070_v23 = vld [vmem:[#allocation2 + $0x1b0] sm:$0xff] }
 0x1bf   : > { %v860_v51 = vadd.f32 3.0, %v842_v42  ;;  %v845_v53 = vadd.f32 %v2601_v27, %v844_v49  ;;  %v890_v54 = vmul.f32 0.16666667, %v882_v45  ;;  %v883_v55 = vmul.f32 %v875_v46, %v837_v26 }
 0x1c0   : > { %v881_v56 = vmul.f32 %v873_v47, %v829_v28  ;;  %v870_v57 = vmax.f32 %v862_v48, 0.0  ;;  %v888_v58 = vmul.f32 0.16666667, %v880_v50  ;;  %v863_v60 = vadd.f32 3.0, %v853_v52  ;;  %v1183_v45 = vld [vmem:[#allocation2 + $0x11] sm:$0xff] }
 0x1c1   : > { %v868_v59 = vmax.f32 %v860_v51, 0.0  ;;  %v861_v61 = vadd.f32 3.0, %v845_v53  ;;  %899 = vst.msk [vmem:[#allocation2 + $0x151] sm:$0xff] %vm375_vm2, %v890_v54  ;;  %v891_v62 = vmul.f32 0.16666667, %v883_v55  ;;  %v1109_v18 = vsub.s32 1, %v1079_v16 }
 0x1c2   : > { %v889_v63 = vmul.f32 0.16666667, %v881_v56  ;;  %v878_v0 = vmin.f32 %v870_v57, 6.0  ;;  %897 = vst.msk [vmem:[#allocation2 + $0x131] sm:$0xff] %vm375_vm2, %v888_v58  ;;  %v871_v3 = vmax.f32 %v863_v60, 0.0  ;;  %v2637_v20 = vrot.slane %v1067_v19, %v1080_v17  ;;  %v1184_v50 = vld [vmem:[#allocation2 + $0x21] sm:$0xff] }
 0x1c3   : > { %v876_v2 = vmin.f32 %v868_v59, 6.0  ;;  %v869_v4 = vmax.f32 %v861_v61, 0.0  ;;  %900 = vst.msk [vmem:[#allocation2 + $0x161] sm:$0xff] %vm375_vm2, %v891_v62  ;;  %v2639_v21 = vrot.slane %v1067_v19, %v1109_v18  ;;  %v1137_v22 = vsub.s32 2, %v1079_v16  ;;  %v1186_v57 = vld [vmem:[#allocation2 + $0x41] sm:$0xff]  ;;  %v1187_v58 = vld [vmem:[#allocation2 + $0x51] sm:$0xff] }
 0x1c4   : > { %898 = vst.msk [vmem:[#allocation2 + $0x141] sm:$0xff] %vm375_vm2, %v889_v63  ;;  %v886_v5 = vmul.f32 %v878_v0, %v850_v39  ;;  %v879_v7 = vmin.f32 %v871_v3, 6.0  ;;  %v1082_v25 = vmul.f32 %v2637_v20, %v1070_v23  ;;  %v1193_v30 = vsub.s32 4, %v1079_v16  ;;  %v1188_v63 = vld [vmem:[#allocation2 + $0x61] sm:$0xff] }
 0x1c5   : > { %v884_v6 = vmul.f32 %v876_v2, %v842_v42  ;;  %v877_v8 = vmin.f32 %v869_v4, 6.0  ;;  %v1111_v26 = vmul.f32 %v2639_v21, %v1099_v24  ;;  %v2643_v28 = vrot.slane %v1067_v19, %v1137_v22  ;;  %v1189_v4 = vld [vmem:[#allocation2 + $0x71] sm:$0xff] }
 0x1c6   : > { %v894_v9 = vmul.f32 0.16666667, %v886_v5  ;;  %v887_v11 = vmul.f32 %v879_v7, %v853_v52  ;;  %v1165_v32 = vsub.s32 3, %v1079_v16  ;;  %v1221_v33 = vsub.s32 5, %v1079_v16  ;;  %v1185_v52 = vld [vmem:[#allocation2 + $0x31] sm:$0xff] }
 0x1c7   : > { %v892_v10 = vmul.f32 0.16666667, %v884_v6  ;;  %v885_v12 = vmul.f32 %v877_v8, %v845_v53  ;;  %v1119_v36 = vadd.f32 %v1111_v26, %v1082_v25  ;;  %v1139_v37 = vmul.f32 %v2643_v28, %v1127_v29 }
 0x1c8   : > { %903 = vst.msk [vmem:[#allocation2 + $0x191] sm:$0xff] %vm375_vm2, %v894_v9  ;;  %v895_v13 = vmul.f32 0.16666667, %v887_v11  ;;  %v1249_v38 = vsub.s32 6, %v1079_v16  ;;  %v1277_v41 = vsub.s32 7, %v1079_v16  ;;  %v1194_v46 = vrot.slane %v1067_v19, %v1193_v30  ;;  %v1102_v25 = vld [vmem:[#allocation2 + $0x151] sm:$0xff] }
 0x1c9   : > { %901 = vst.msk [vmem:[#allocation2 + $0x171] sm:$0xff] %vm375_vm2, %v892_v10  ;;  %v893_v14 = vmul.f32 0.16666667, %v885_v12  ;;  %v2650_v49 = vrot.slane %v1067_v19, %v1165_v32  ;;  %v2652_v51 = vrot.slane %v1067_v19, %v1221_v33  ;;  %v2654_v55 = vadd.f32 %v1139_v37, %v1119_v36 }
 0x1ca   : > { %904 = vst.msk [vmem:[#allocation2 + $0x1a1] sm:$0xff] %vm375_vm2, %v895_v13  ;;  %v2656_v56 = vrot.slane %v1067_v19, %v1249_v38  ;;  %v2658_v61 = vmul.f32 %v1194_v46, %v1183_v45  ;;  %v2660_v62 = vrot.slane %v1067_v19, %v1277_v41  ;;  %v2662_v2 = vmul.f32 %v1194_v46, %v1184_v50  ;;  %v1190_v19 = vld [vmem:[#allocation2 + $0x81] sm:$0xff] }
 0x1cb   : > { %902 = vst.msk [vmem:[#allocation2 + $0x181] sm:$0xff] %vm375_vm2, %v893_v14  ;;  %v2664_v3 = vmul.f32 %v1194_v46, %v1185_v52  ;;  %v2666_v8 = vmul.f32 %v1194_v46, %v1186_v57  ;;  %v2668_v9 = vmul.f32 %v1194_v46, %v1187_v58  ;;  %v2671_v14 = vmul.f32 %v1194_v46, %v1188_v63  ;;  %v1270_v50 = vld [vmem:[#allocation2 + $0x161] sm:$0xff] }
 0x1cc   : > { %v2674_v22 = vmul.f32 %v1194_v46, %v1189_v4  ;;  %v2690_v52 = vmul.f32 %v2660_v62, %v1102_v25 }
 0x219   : > { %v1755_v31 = vpop.f32.mrb[4].mxu1 }
 0x21a   : > { %v679_v34 = vadd.f32 %v1755_v31, %v2601_v27  ;;  %v670_v35 = vpop.f32.mrb[5].mxu1 }
 0x21b   : > { %v671_v39 = vadd.f32 %v2601_v27, %v670_v35  ;;  %v1756_v40 = vpop.f32.mrb[6].mxu1  ;;  %v1100_v35 = vld [vmem:[#allocation2 + $0x131] sm:$0xff] }
 0x21c   : > { %v703_v42 = vadd.f32 3.0, %v679_v34  ;;  %v682_v43 = vadd.f32 %v1756_v40, %v2601_v27  ;;  %v673_v44 = vpop.f32.mrb[7].mxu1  ;;  %v2679_v40 = vmul.f32 %v1194_v46, %v1190_v19  ;;  %v2694_v57 = vmul.f32 %v2660_v62, %v1100_v35 }
 0x21d   : > { %v701_v47 = vadd.f32 3.0, %v671_v39  ;;  %v674_v48 = vadd.f32 %v2601_v27, %v673_v44  ;;  %v2683_v44 = vmul.f32 %v2639_v21, %v1102_v25  ;;  %v1106_v25 = vld [vmem:[#allocation2 + $0x191] sm:$0xff] }
 0x21e   : > { %v711_v53 = vmax.f32 %v703_v42, 0.0  ;;  %v704_v54 = vadd.f32 3.0, %v682_v43 }
 0x21f   : > { %v709_v59 = vmax.f32 %v701_v47, 0.0  ;;  %v702_v60 = vadd.f32 3.0, %v674_v48 }
 0x220   : > { %v719_v0 = vmin.f32 %v711_v53, 6.0  ;;  %v712_v1 = vmax.f32 %v704_v54, 0.0 }
 0x221   : > { %v717_v5 = vmin.f32 %v709_v59, 6.0  ;;  %v710_v6 = vmax.f32 %v702_v60, 0.0  ;;  %v1759_v7 = vpop.f32.mrb[8].mxu1 }
 0x222   : > { %v727_v10 = vmul.f32 %v719_v0, %v679_v34  ;;  %v720_v11 = vmin.f32 %v712_v1, 6.0  ;;  %v695_v12 = vadd.f32 %v1759_v7, %v2601_v27  ;;  %v686_v13 = vpop.f32.mrb[9].mxu1 }
 0x223   : > { %v725_v15 = vmul.f32 %v717_v5, %v671_v39  ;;  %v718_v16 = vmin.f32 %v710_v6, 6.0  ;;  %v687_v17 = vadd.f32 %v2601_v27, %v686_v13  ;;  %v1760_v18 = vpop.f32.mrb[10].mxu1  ;;  %v1101_v39 = vld [vmem:[#allocation2 + $0x141] sm:$0xff] }
 0x224   : > { %v735_v23 = vmul.f32 0.16666667, %v727_v10  ;;  %v728_v24 = vmul.f32 %v720_v11, %v682_v43  ;;  %v707_v26 = vadd.f32 3.0, %v695_v12  ;;  %v698_v29 = vadd.f32 %v1760_v18, %v2601_v27  ;;  %v689_v30 = vpop.f32.mrb[11].mxu1 }
 0x225   : > { %v733_v31 = vmul.f32 0.16666667, %v725_v15  ;;  %v726_v32 = vmul.f32 %v718_v16, %v674_v48  ;;  %v705_v33 = vadd.f32 3.0, %v687_v17  ;;  %v690_v34 = vadd.f32 %v2601_v27, %v689_v30 }
 0x226   : > { %744 = vst.msk [vmem:[#allocation2 + $0xc1] sm:$0xff] %vm375_vm2, %v735_v23  ;;  %v736_v36 = vmul.f32 0.16666667, %v728_v24  ;;  %v715_v37 = vmax.f32 %v707_v26, 0.0  ;;  %v708_v38 = vadd.f32 3.0, %v698_v29  ;;  %v2687_v48 = vmul.f32 %v2639_v21, %v1100_v35 }
 0x227   : > { %742 = vst.msk [vmem:[#allocation2 + $0xa1] sm:$0xff] %vm375_vm2, %v733_v31  ;;  %v734_v41 = vmul.f32 0.16666667, %v726_v32  ;;  %v713_v42 = vmax.f32 %v705_v33, 0.0  ;;  %v706_v43 = vadd.f32 3.0, %v690_v34  ;;  %v2697_v58 = vmul.f32 %v2660_v62, %v1101_v39  ;;  %v1104_v32 = vld [vmem:[#allocation2 + $0x171] sm:$0xff] }
 0x228   : > { %745 = vst.msk [vmem:[#allocation2 + $0xd1] sm:$0xff] %vm375_vm2, %v736_v36  ;;  %v723_v45 = vmin.f32 %v715_v37, 6.0  ;;  %v716_v47 = vmax.f32 %v708_v38, 0.0  ;;  %v2701_v1 = vmul.f32 %v2639_v21, %v1101_v39  ;;  %v2705_v10 = vmul.f32 %v2660_v62, %v1270_v50  ;;  %v1272_v37 = vld [vmem:[#allocation2 + $0x181] sm:$0xff] }
 0x229   : > { %743 = vst.msk [vmem:[#allocation2 + $0xb1] sm:$0xff] %vm375_vm2, %v734_v41  ;;  %v721_v46 = vmin.f32 %v713_v42, 6.0  ;;  %v714_v53 = vmax.f32 %v706_v43, 0.0  ;;  %v1775_v54 = vpop.f32.mrb[12].mxu1  ;;  %v2711_v33 = vmul.f32 %v1270_v50, %v2639_v21  ;;  %v2717_v41 = vmul.f32 %v2639_v21, %v1106_v25 }
 0x22a   : > { %v731_v59 = vmul.f32 %v723_v45, %v695_v12  ;;  %v724_v60 = vmin.f32 %v716_v47, 6.0  ;;  %v996_v63 = vadd.f32 %v1775_v54, %v2601_v27  ;;  %v987_v0 = vpop.f32.mrb[13].mxu1  ;;  %v2720_v42 = vmul.f32 %v2660_v62, %v1106_v25 }
 0x22b   : > { %v729_v4 = vmul.f32 %v721_v46, %v687_v17  ;;  %v722_v5 = vmin.f32 %v714_v53, 6.0  ;;  %v988_v6 = vadd.f32 %v2601_v27, %v987_v0  ;;  %v1776_v7 = vpop.f32.mrb[14].mxu1  ;;  %v2724_v50 = vmul.f32 %v2639_v21, %v1104_v32 }
 0x22c   : > { %v739_v11 = vmul.f32 0.16666667, %v731_v59  ;;  %v732_v13 = vmul.f32 %v724_v60, %v698_v29  ;;  %v1020_v15 = vadd.f32 3.0, %v996_v63  ;;  %v999_v12 = vadd.f32 %v1776_v7, %v2601_v27  ;;  %v990_v16 = vpop.f32.mrb[15].mxu1 }
 0x22d   : > { %v737_v18 = vmul.f32 0.16666667, %v729_v4  ;;  %v730_v19 = vmul.f32 %v722_v5, %v690_v34  ;;  %v1018_v23 = vadd.f32 3.0, %v988_v6  ;;  %v991_v24 = vadd.f32 %v2601_v27, %v990_v16 }
 0x22e   : > { %748 = vst.msk [vmem:[#allocation2 + $0x101] sm:$0xff] %vm375_vm2, %v739_v11  ;;  %v740_v17 = vmul.f32 0.16666667, %v732_v13  ;;  %v1028_v26 = vmax.f32 %v1020_v15, 0.0  ;;  %v1021_v30 = vadd.f32 3.0, %v999_v12  ;;  %v1155_v31 = vld [vmem:[#allocation2 + $0xa0] sm:$0xff]  ;;  %v2727_v46 = vmul.f32 %v2660_v62, %v1104_v32 }
 0x22f   : > { %746 = vst.msk [vmem:[#allocation2 + $0xe1] sm:$0xff] %vm375_vm2, %v737_v18  ;;  %v738_v29 = vmul.f32 0.16666667, %v730_v19  ;;  %v1026_v35 = vmax.f32 %v1018_v23, 0.0  ;;  %v1019_v36 = vadd.f32 3.0, %v991_v24  ;;  %v1167_v34 = vmul.f32 %v2650_v49, %v1155_v31  ;;  %v1274_v31 = vld [vmem:[#allocation2 + $0x1a1] sm:$0xff] }
 0x230   : > { %749 = vst.msk [vmem:[#allocation2 + $0x111] sm:$0xff] %vm375_vm2, %v740_v17  ;;  %v1036_v38 = vmin.f32 %v1028_v26, 6.0  ;;  %v1029_v39 = vmax.f32 %v1021_v30, 0.0  ;;  %v2731_v0 = vmul.f32 %v2660_v62, %v1272_v37  ;;  %v1157_v30 = vld [vmem:[#allocation2 + $0xc0] sm:$0xff] }
 0x231   : > { %747 = vst.msk [vmem:[#allocation2 + $0xf1] sm:$0xff] %vm375_vm2, %v738_v29  ;;  %v1034_v43 = vmin.f32 %v1026_v35, 6.0  ;;  %v1027_v45 = vmax.f32 %v1019_v36, 0.0  ;;  %v1779_v47 = vpop.f32.mrb[16].mxu1  ;;  %v1175_v13 = vadd.f32 %v1167_v34, %v2654_v55  ;;  %v1211_v35 = vld [vmem:[#allocation2 + $0xa1] sm:$0xff]  ;;  %v1158_v55 = vld [vmem:[#allocation2 + $0xd0] sm:$0xff] }
 0x232   : > { %v1044_v53 = vmul.f32 %v1036_v38, %v996_v63  ;;  %v1037_v54 = vmin.f32 %v1029_v39, 6.0  ;;  %v1012_v59 = vadd.f32 %v1779_v47, %v2601_v27  ;;  %v1003_v60 = vpop.f32.mrb[17].mxu1  ;;  %v1156_v38 = vld [vmem:[#allocation2 + $0xb0] sm:$0xff]  ;;  %v2745_v47 = vmul.f32 %v2650_v49, %v1157_v30 }
 0x233   : > { %v1042_v4 = vmul.f32 %v1034_v43, %v988_v6  ;;  %v1035_v5 = vmin.f32 %v1027_v45, 6.0  ;;  %v1004_v7 = vadd.f32 %v2601_v27, %v1003_v60  ;;  %v1780_v11 = vpop.f32.mrb[18].mxu1  ;;  %v1212_v39 = vld [vmem:[#allocation2 + $0xb1] sm:$0xff]  ;;  %v1223_v60 = vmul.f32 %v2652_v51, %v1211_v35 }
 0x234   : > { %v1052_v15 = vmul.f32 0.16666667, %v1044_v53  ;;  %v1045_v16 = vmul.f32 %v1037_v54, %v999_v12  ;;  %v1024_v18 = vadd.f32 3.0, %v1012_v59  ;;  %v1015_v19 = vadd.f32 %v1780_v11, %v2601_v27  ;;  %v1006_v63 = vpop.f32.mrb[19].mxu1  ;;  %v1213_v53 = vld [vmem:[#allocation2 + $0xc1] sm:$0xff] }
 0x235   : > { %v1050_v23 = vmul.f32 0.16666667, %v1042_v4  ;;  %v1043_v25 = vmul.f32 %v1035_v5, %v991_v24  ;;  %v1022_v17 = vadd.f32 3.0, %v1004_v7  ;;  %v1007_v26 = vadd.f32 %v2601_v27, %v1006_v63  ;;  %v1214_v4 = vld [vmem:[#allocation2 + $0xd1] sm:$0xff] }
 0x236   : > { %1061 = vst.msk [vmem:[#allocation2 + $0x1e1] sm:$0xff] %vm375_vm2, %v1052_v15  ;;  %v1053_v6 = vmul.f32 0.16666667, %v1045_v16  ;;  %v1032_v32 = vmax.f32 %v1024_v18, 0.0  ;;  %v1025_v29 = vadd.f32 3.0, %v1015_v19  ;;  %v2739_v12 = vmul.f32 %v1272_v37, %v2639_v21  ;;  %v1159_v5 = vld [vmem:[#allocation2 + $0xe0] sm:$0xff] }
 0x237   : > { %1059 = vst.msk [vmem:[#allocation2 + $0x1c1] sm:$0xff] %vm375_vm2, %v1050_v23  ;;  %v1051_v36 = vmul.f32 0.16666667, %v1043_v25  ;;  %v1030_v34 = vmax.f32 %v1022_v17, 0.0  ;;  %v1023_v24 = vadd.f32 3.0, %v1007_v26  ;;  %v1203_v27 = vadd.f32 %v2658_v61, %v1175_v13  ;;  %v1215_v18 = vld [vmem:[#allocation2 + $0xe1] sm:$0xff] }
 0x238   : > { %1062 = vst.msk [vmem:[#allocation2 + $0x1f1] sm:$0xff] %vm375_vm2, %v1053_v6  ;;  %v1040_v43 = vmin.f32 %v1032_v32, 6.0  ;;  %v1033_v45 = vmax.f32 %v1025_v29, 0.0  ;;  %v2748_v21 = vmul.f32 %v2660_v62, %v1274_v31  ;;  %v2753_v61 = vmul.f32 %v2650_v49, %v1158_v55  ;;  %v1160_v62 = vld [vmem:[#allocation2 + $0xf0] sm:$0xff]  ;;  %v1161_v31 = vld [vmem:[#allocation2 + $0x100] sm:$0xff] }
 0x239   : > { %1060 = vst.msk [vmem:[#allocation2 + $0x1d1] sm:$0xff] %vm375_vm2, %v1051_v36  ;;  %v1038_v37 = vmin.f32 %v1030_v34, 6.0  ;;  %v1031_v54 = vmax.f32 %v1023_v24, 0.0  ;;  %v2756_v15 = vmul.f32 %v2650_v49, %v1156_v38  ;;  %v2759_v16 = vmul.f32 %v2652_v51, %v1212_v39  ;;  %v1216_v30 = vld [vmem:[#allocation2 + $0xf1] sm:$0xff]  ;;  %v1217_v55 = vld [vmem:[#allocation2 + $0x101] sm:$0xff] }
 0x23a   : > { %v1048_v11 = vmul.f32 %v1040_v43, %v1012_v59  ;;  %v1041_v13 = vmin.f32 %v1033_v45, 6.0  ;;  %v1231_v25 = vadd.f32 %v1223_v60, %v1203_v27  ;;  %v2762_v17 = vmul.f32 %v2652_v51, %v1213_v53  ;;  %v1162_v35 = vld [vmem:[#allocation2 + $0x110] sm:$0xff]  ;;  %v2785_v60 = vld [vmem:[#allocation9 + $0x8] ss:$0 sm:$0xff] }
 0x23b   : > { %v1046_v63 = vmul.f32 %v1038_v37, %v1004_v7  ;;  %v1039_v23 = vmin.f32 %v1031_v54, 6.0  ;;  %v2765_v59 = vmul.f32 %v2652_v51, %v1214_v4  ;;  %v2768_v29 = vmul.f32 %v2650_v49, %v1159_v5  ;;  %v1218_v39 = vld [vmem:[#allocation2 + $0x111] sm:$0xff] }
 0x23c   : > { %v1056_v6 = vmul.f32 0.16666667, %v1048_v11  ;;  %v1049_v32 = vmul.f32 %v1041_v13, %v1015_v19  ;;  %v2771_v38 = vmul.f32 %v2650_v49, %v1160_v62  ;;  %v2774_v27 = vmul.f32 %v2652_v51, %v1215_v18 }
 0x23d   : > { %v1073_v36 = vld [vmem:[#allocation2 + $0x1e0] sm:$0xff]  ;;  %v1054_v34 = vmul.f32 0.16666667, %v1046_v63  ;;  %v1047_v7 = vmul.f32 %v1039_v23, %v1007_v26  ;;  %v2779_v37 = vmul.f32 %v2652_v51, %v1216_v30  ;;  %v2782_v26 = vmul.f32 %v2650_v49, %v1161_v31 }
 0x23e   : > { %v1130_v24 = vld [vmem:[#allocation2 + $0x1e1] sm:$0xff]  ;;  %1065 = vst.msk [vmem:[#allocation2 + $0x221] sm:$0xff] %vm375_vm2, %v1056_v6  ;;  %v1057_v19 = vmul.f32 0.16666667, %v1049_v32  ;;  %v1085_v53 = vmul.f32 %v2637_v20, %v1073_v36  ;;  %v2790_v13 = vmul.f32 %v2650_v49, %v1162_v35  ;;  %v2796_v23 = vmul.f32 %v2652_v51, %v1217_v55 }
 0x23f   : > { %v1071_v43 = vld [vmem:[#allocation2 + $0x1c0] sm:$0xff]  ;;  %1063 = vst.msk [vmem:[#allocation2 + $0x201] sm:$0xff] %vm375_vm2, %v1054_v34  ;;  %v1055_v54 = vmul.f32 0.16666667, %v1047_v7  ;;  %v1242_v11 = vld [vmem:[#allocation2 + $0x1f0] sm:$0xff]  ;;  %v1142_v63 = vmul.f32 %v2643_v28, %v1130_v24  ;;  %v2799_v30 = vmul.f32 %v2652_v51, %v1218_v39  ;;  %v1253_v35 = vmul.f32 %v2656_v56, %v1073_v36 }
 0x240   : > { %v1128_v45 = vld [vmem:[#allocation2 + $0x1c1] sm:$0xff]  ;;  %v1083_v4 = vmul.f32 %v2637_v20, %v1071_v43  ;;  %v1251_v5 = vmul.f32 %v2656_v56, %v1071_v43  ;;  %v1072_v62 = vld [vmem:[#allocation2 + $0x1d0] sm:$0xff]  ;;  %1066 = vst.msk [vmem:[#allocation2 + $0x231] sm:$0xff] %vm375_vm2, %v1057_v19  ;;  %v1122_v18 = vadd.f32 %v2683_v44, %v1085_v53  ;;  %v1254_v55 = vmul.f32 %v2656_v56, %v1242_v11 }
 0x241   : > { %1064 = vst.msk [vmem:[#allocation2 + $0x211] sm:$0xff] %vm375_vm2, %v1055_v54  ;;  %v1140_v49 = vmul.f32 %v2643_v28, %v1128_v45  ;;  %v1296_v32 = vld [vmem:[#allocation2 + $0x1d1] sm:$0xff]  ;;  %v1307_v44 = vmul.f32 %v2785_v60, %v1128_v45  ;;  %v1084_v34 = vmul.f32 %v2637_v20, %v1072_v62  ;;  %v2810_v43 = vmul.f32 %v2785_v60, %v1130_v24 }
 0x242   : > { %v1120_v31 = vadd.f32 %v2687_v48, %v1083_v4  ;;  %v1259_v6 = vadd.f32 %v1251_v5, %v1231_v25  ;;  %v1150_v7 = vadd.f32 %v1142_v63, %v1122_v18  ;;  %v1298_v39 = vld [vmem:[#allocation2 + $0x1f1] sm:$0xff]  ;;  %v1086_v48 = vmul.f32 %v1242_v11, %v2637_v20 }
 0x243   : > { %v1252_v25 = vmul.f32 %v2656_v56, %v1072_v62  ;;  %v2814_v53 = vld [vmem:[#allocation11] ss:$0 sm:$0xff]  ;;  %v1121_v36 = vadd.f32 %v2701_v1, %v1084_v34  ;;  %v1141_v45 = vmul.f32 %v1296_v32, %v2643_v28  ;;  %v1310_v1 = vmul.f32 %v2785_v60, %v1298_v39 }
 0x244   : > { %v1148_v19 = vadd.f32 %v1140_v49, %v1120_v31  ;;  %v1287_v51 = vadd.f32 %v2694_v57, %v1259_v6  ;;  %v1178_v54 = vadd.f32 %v2753_v61, %v1150_v7  ;;  %v1308_v57 = vmul.f32 %v2785_v60, %v1296_v32 }
 0x245   : > { %v1123_v24 = vadd.f32 %v2711_v33, %v1086_v48  ;;  %v2822_v18 = vld [vmem:[#allocation2 + $0x220] sm:$0xff]  ;;  %v1149_v62 = vadd.f32 %v1141_v45, %v1121_v36  ;;  %v1143_v61 = vmul.f32 %v1298_v39, %v2643_v28 }
 0x246   : > { %v1176_v4 = vadd.f32 %v2756_v15, %v1148_v19  ;;  %v1315_v5 = vadd.f32 %v1307_v44, %v1287_v51  ;;  %v2824_v11 = vld [vmem:[#allocation2 + $0x221] sm:$0xff]  ;;  %v1206_v63 = vadd.f32 %v2666_v8, %v1178_v54  ;;  %v1089_v33 = vmul.f32 %v2637_v20, %v2822_v18 }
 0x247   : > { %v1075_v31 = vld [vmem:[#allocation2 + $0x200] sm:$0xff]  ;;  %v1177_v44 = vadd.f32 %v2745_v47, %v1149_v62  ;;  %v1151_v8 = vadd.f32 %v1143_v61, %v1123_v24  ;;  %v1146_v19 = vmul.f32 %v2643_v28, %v2824_v11 }
 0x248   : > { %v1132_v49 = vld [vmem:[#allocation2 + $0x201] sm:$0xff]  ;;  %v1204_v15 = vadd.f32 %v2662_v2, %v1176_v4  ;;  %v1330_v6 = vadd.f32 %v2814_v53, %v1315_v5  ;;  %v1087_v32 = vmul.f32 %v2637_v20, %v1075_v31  ;;  %v1234_v34 = vadd.f32 %v2765_v59, %v1206_v63  ;;  %v1244_v7 = vld [vmem:[#allocation2 + $0x210] sm:$0xff] }
 0x249   : > { %v1144_v48 = vmul.f32 %v2643_v28, %v1132_v49  ;;  %v1205_v36 = vadd.f32 %v2664_v3, %v1177_v44  ;;  %v1179_v54 = vadd.f32 %v2768_v29, %v1151_v8  ;;  %v1255_v47 = vmul.f32 %v2656_v56, %v1075_v31  ;;  %v1300_v63 = vld [vmem:[#allocation2 + $0x211] sm:$0xff] }
 0x24a   : > { %v1232_v51 = vadd.f32 %v2759_v16, %v1204_v15  ;;  %v1338_v39 = vadd.f32 3.0, %v1330_v6  ;;  %v1124_v2 = vadd.f32 %v2724_v50, %v1087_v32  ;;  %v1262_v45 = vadd.f32 %v1254_v55, %v1234_v34 }
 0x24b   : > { %v1256_v24 = vmul.f32 %v2656_v56, %v1244_v7  ;;  %v1233_v62 = vadd.f32 %v2762_v17, %v1205_v36  ;;  %v1207_v50 = vadd.f32 %v2668_v9, %v1179_v54  ;;  %v1088_v61 = vmul.f32 %v1244_v7, %v2637_v20 }
 0x24c   : > { %v1260_v59 = vadd.f32 %v1252_v25, %v1232_v51  ;;  %v1346_v4 = vmax.f32 %v1338_v39, 0.0  ;;  %v1152_v5 = vadd.f32 %v1144_v48, %v1124_v2  ;;  %v1290_v16 = vadd.f32 %v2705_v10, %v1262_v45 }
 0x24d   : > { %v1311_v55 = vmul.f32 %v2785_v60, %v1132_v49  ;;  %v1126_v25 = vadd.f32 %v2717_v41, %v1089_v33  ;;  %v1261_v31 = vadd.f32 %v1253_v35, %v1233_v62  ;;  %v1235_v32 = vadd.f32 %v2774_v27, %v1207_v50  ;;  %v1246_v33 = vld [vmem:[#allocation2 + $0x230] sm:$0xff] }
 0x24e   : > { %v1288_v3 = vadd.f32 %v2697_v58, %v1260_v59  ;;  %v1180_v29 = vadd.f32 %v2771_v38, %v1152_v5  ;;  %v1318_v15 = vadd.f32 %v1310_v1, %v1290_v16  ;;  %v1125_v17 = vadd.f32 %v2739_v12, %v1088_v61 }
 0x24f   : > { %v1354_v44 = vmin.f32 %v1346_v4, 6.0  ;;  %v1145_v20 = vmul.f32 %v1300_v63, %v2643_v28  ;;  %v1289_v58 = vadd.f32 %v2690_v52, %v1261_v31  ;;  %v1263_v34 = vadd.f32 %v1255_v47, %v1235_v32  ;;  %v1302_v4 = vld [vmem:[#allocation2 + $0x231] sm:$0xff] }
 0x250   : > { %v1316_v10 = vadd.f32 %v1308_v57, %v1288_v3  ;;  %v1208_v9 = vadd.f32 %v2671_v14, %v1180_v29  ;;  %v1333_v38 = vadd.f32 %v2814_v53, %v1318_v15  ;;  %v1154_v49 = vadd.f32 %v1146_v19, %v1126_v25 }
 0x251   : > { %v1312_v27 = vmul.f32 %v2785_v60, %v1300_v63  ;;  %v1153_v1 = vadd.f32 %v1145_v20, %v1125_v17  ;;  %v1317_v12 = vadd.f32 %v2810_v43, %v1289_v58  ;;  %v1291_v14 = vadd.f32 %v2727_v46, %v1263_v34 }
 0x252   : > { %v1331_v41 = vadd.f32 %v2814_v53, %v1316_v10  ;;  %v1236_v35 = vadd.f32 %v2779_v37, %v1208_v9  ;;  %v1341_v57 = vadd.f32 3.0, %v1333_v38  ;;  %v1182_v28 = vadd.f32 %v2790_v13, %v1154_v49 }
 0x253   : > { %v1362_v8 = vmul.f32 %v1354_v44, %v1330_v6  ;;  %v1181_v19 = vadd.f32 %v2782_v26, %v1153_v1  ;;  %v1332_v51 = vadd.f32 %v2814_v53, %v1317_v12  ;;  %v1319_v37 = vadd.f32 %v1311_v55, %v1291_v14 }
 0x254   : > { %v1339_v52 = vadd.f32 3.0, %v1331_v41  ;;  %v1264_v7 = vadd.f32 %v1256_v24, %v1236_v35  ;;  %v1349_v39 = vmax.f32 %v1341_v57, 0.0  ;;  %v1210_v2 = vadd.f32 %v2679_v40, %v1182_v28 }
 0x255   : > { %v1209_v36 = vadd.f32 %v2674_v22, %v1181_v19  ;;  %v1258_v46 = vmul.f32 %v2656_v56, %v1246_v33  ;;  %v1340_v13 = vadd.f32 3.0, %v1332_v51  ;;  %v1334_v6 = vadd.f32 %v2814_v53, %v1319_v37 }
 0x256   : > { %v1347_v48 = vmax.f32 %v1339_v52, 0.0  ;;  %v1292_v43 = vadd.f32 %v2731_v0, %v1264_v7  ;;  %v1357_v45 = vmin.f32 %v1349_v39, 6.0  ;;  %v1238_v54 = vadd.f32 %v2799_v30, %v1210_v2 }
 0x257   : > { %v1237_v59 = vadd.f32 %v2796_v23, %v1209_v36  ;;  %v1257_v40 = vmul.f32 %v2656_v56, %v2822_v18  ;;  %v1370_v5 = vmul.f32 0.16666667, %v1362_v8  ;;  %v1348_v0 = vmax.f32 %v1340_v13, 0.0  ;;  %v1704_v8 = vld [vmem:[#allocation14] ss:$0 sm:$0xff] }
 0x258   : > { %v1355_v26 = vmin.f32 %v1347_v48, 6.0  ;;  %v1320_v47 = vadd.f32 %v1312_v27, %v1292_v43  ;;  %v1342_v24 = vadd.f32 3.0, %v1334_v6  ;;  %v1266_v22 = vadd.f32 %v1258_v46, %v1238_v54 }
 0x259   : > { %v1365_v16 = vmul.f32 %v1357_v45, %v1333_v38  ;;  %v1265_v63 = vadd.f32 %v1257_v40, %v1237_v59  ;;  %v1356_v61 = vmin.f32 %v1348_v0, 6.0  ;;  %v1314_v29 = vmul.f32 %v2785_v60, %v1302_v4 }
 0x25a   : > { %v1363_v62 = vmul.f32 %v1355_v26, %v1331_v41  ;;  %v1335_v50 = vadd.f32 %v2814_v53, %v1320_v47  ;;  %v1350_v3 = vmax.f32 %v1342_v24, 0.0  ;;  %v1294_v30 = vadd.f32 %v2748_v21, %v1266_v22 }
 0x25b   : > { %v1293_v56 = vadd.f32 %v2720_v42, %v1265_v63  ;;  %v1313_v18 = vmul.f32 %v2785_v60, %v2824_v11  ;;  %v1364_v25 = vmul.f32 %v1356_v61, %v1332_v51  ;;  %v1373_v9 = vmul.f32 0.16666667, %v1365_v16 }
 0x25c   : > { %v1371_v23 = vmul.f32 0.16666667, %v1363_v62  ;;  %v1343_v55 = vadd.f32 3.0, %v1335_v50  ;;  %v1358_v31 = vmin.f32 %v1350_v3, 6.0  ;;  %v1322_v15 = vadd.f32 %v1314_v29, %v1294_v30 }
 0x25d   : > { %v1321_v10 = vadd.f32 %v1313_v18, %v1293_v56  ;;  %v1372_v44 = vmul.f32 0.16666667, %v1364_v25 }
 0x25e   : > { %v1378_v32 = vpack.c.bf16 %v1371_v23, %v1370_v5  ;;  %v1351_v17 = vmax.f32 %v1343_v55, 0.0  ;;  %v1337_v20 = vadd.f32 %v2814_v53, %v1322_v15  ;;  %v1366_v58 = vmul.f32 %v1358_v31, %v1334_v6 }
 0x25f   : > { %v1336_v38 = vadd.f32 %v2814_v53, %v1321_v10  ;;  %v1379_v42 = vpack.c.bf16 %v1373_v9, %v1372_v44 }
 0x260   : > { %1783 = vmatprep.mubr.msk.bf16.mxu0 %vm375_vm2, %v1378_v32  ;;  %v1359_v21 = vmin.f32 %v1351_v17, 6.0  ;;  %v1345_v34 = vadd.f32 3.0, %v1337_v20  ;;  %v1374_v41 = vmul.f32 0.16666667, %v1366_v58 }
 0x261   : > { %v1344_v60 = vadd.f32 3.0, %v1336_v38  ;;  %1784 = vmatmul.mubr.msk.bf16.vlgmr.msra.gmra.mrb[12].mxu0 %vm375_vm2, %v1379_v42 }
 0x262   : > { %v1367_v49 = vmul.f32 %v1359_v21, %v1335_v50  ;;  %v1353_v11 = vmax.f32 %v1345_v34, 0.0 }
 0x263   : > { %v1352_v27 = vmax.f32 %v1344_v60, 0.0 }
 0x264   : > { %v1375_v35 = vmul.f32 0.16666667, %v1367_v49  ;;  %v1361_v1 = vmin.f32 %v1353_v11, 6.0 }
 0x265   : > { %v1360_v57 = vmin.f32 %v1352_v27, 6.0 }
 0x266   : > { %v1380_v12 = vpack.c.bf16 %v1375_v35, %v1374_v41  ;;  %v1369_v14 = vmul.f32 %v1361_v1, %v1337_v20 }
 0x267   : > { %v1368_v28 = vmul.f32 %v1360_v57, %v1336_v38 }
 0x268   : > { %1787 = vmatprep.mubr.msk.bf16.mxu0 %vm375_vm2, %v1380_v12  ;;  %v1377_v53 = vmul.f32 0.16666667, %v1369_v14 }
 0x269   : > { %v1376_v33 = vmul.f32 0.16666667, %v1368_v28 }
 0x26b   : > { %v1381_v52 = vpack.c.bf16 %v1377_v53, %v1376_v33 }
 0x26d   : > { %1788 = vmatmul.mubr.msk.bf16.gmra.mrb[16].mxu0 %vm375_vm2, %v1381_v52 }
 0x334   : > { %v1785_v7 = vpop.f32.mrb[12].mxu0 }
 0x335   : > { %v1449_v19 = vadd.f32 %v1785_v7, %v1704_v8  ;;  %v1440_v51 = vpop.f32.mrb[13].mxu0 }
 0x336   : > { %v1441_v39 = vadd.f32 %v1704_v8, %v1440_v51  ;;  %v1786_v37 = vpop.f32.mrb[14].mxu0 }
 0x337   : > { %v1473_v2 = vpack.c.bf16 %v1449_v19, %v1449_v19  ;;  %v1452_v48 = vadd.f32 %v1786_v37, %v1704_v8  ;;  %v1443_v43 = vpop.f32.mrb[15].mxu0 }
 0x338   : > { %v1471_v36 = vpack.c.bf16 %v1441_v39, %v1441_v39  ;;  %v1444_v46 = vadd.f32 %v1704_v8, %v1443_v43 }
 0x339   : > { %1482 = vst.msk [vmem:[%s373_s15 + $0x8] sm:$0xf] %vm1479_vm5, %v1473_v2  ;;  %v1474_v13 = vpack.c.bf16 %v1452_v48, %v1452_v48 }
 0x33a   : > { %1480 = vst.msk [vmem:[%s373_s15] sm:$0xf] %vm1479_vm5, %v1471_v36  ;;  %v1472_v45 = vpack.c.bf16 %v1444_v46, %v1444_v46 }
 0x33b   : > { %1483 = vst.msk [vmem:[%s373_s15 + $0xc] sm:$0xf] %vm1479_vm5, %v1474_v13 }
 0x33c   : > { %1481 = vst.msk [vmem:[%s373_s15 + $0x4] sm:$0xf] %vm1479_vm5, %v1472_v45 }
 0x340   : > { %v1789_v6 = vpop.f32.mrb[16].mxu0 }
 0x341   : > { %v1465_v54 = vadd.f32 %v1789_v6, %v1704_v8  ;;  %v1456_v26 = vpop.f32.mrb[17].mxu0 }
 0x342   : > { %v1457_v47 = vadd.f32 %v1704_v8, %v1456_v26  ;;  %v1790_v59 = vpop.f32.mrb[18].mxu0 }
 0x343   : > { %v1477_v40 = vpack.c.bf16 %v1465_v54, %v1465_v54  ;;  %v1468_v4 = vadd.f32 %v1790_v59, %v1704_v8  ;;  %v1459_v5 = vpop.f32.mrb[19].mxu0 }
 0x344   : > { %v1475_v0 = vpack.c.bf16 %v1457_v47, %v1457_v47  ;;  %v1460_v24 = vadd.f32 %v1704_v8, %v1459_v5 }
 0x345   : > { %1486 = vst.msk [vmem:[%s373_s15 + $0x18] sm:$0xf] %vm1479_vm5, %v1477_v40  ;;  %v1478_v22 = vpack.c.bf16 %v1468_v4, %v1468_v4 }
 0x346   : > { %1484 = vst.msk [vmem:[%s373_s15 + $0x10] sm:$0xf] %vm1479_vm5, %v1475_v0  ;;  %v1476_v62 = vpack.c.bf16 %v1460_v24, %v1460_v24 }
 0x347   : > { %1487 = vst.msk [vmem:[%s373_s15 + $0x1c] sm:$0xf] %vm1479_vm5, %v1478_v22 }
 0x348   : > { %1485 = vst.msk [vmem:[%s373_s15 + $0x14] sm:$0xf] %vm1479_vm5, %v1476_v62 }
 0x349   : > { %2141 = shalt.err (!%p2138_p8)
}
 0x34a   : > { %s2142_s16 = scalar_lea.hbm %s2898_s12, 512  ;;  %s2146_s15 = scalar_lea.hbm %s2954_s7, 1024 }
 0x34b   : > { %p2143_p13 = scmp.ne.s32.totalorder %s2898_s12, %s2142_s16  ;;  %p2147_p9 = scmp.lt.u32.totalorder %s2898_s12, %s2954_s7 }
 0x34c   : > { %p2148_p10 = scmp.lt.u32.totalorder %s2146_s15, %s2142_s16  ;;  %p2150_p6 = scmp.lt.u32.totalorder %s2142_s16, %s2898_s12 }
 0x34d   : > { %p2144_p0 = pnand %p2143_p13, %p2974_p12 }
 0x34e   : > { %p2149_p11 = por %p2148_p10, %p2147_p9 }
 0x34f   : > { %p2145_p2 = pneg %p2144_p0 }
 0x350   : > { %p2151_p5 = por %p2150_p6, %p2149_p11 }
 0x352   : > { %p2152_p7 = pnand %p2151_p5, %p2145_p2 }
 0x354   : > { %2155 = shalt.err (!%p2152_p7)
}
 0x355   : > { %s2222_s9 = smov 64   ;;  %s2223_s13 = smov 4  }
 0x356   : > { %1825 = dma.vmem_to_hbm [thread:$0]  (%p2974_p12), %s2900_s19, 512, %s2898_s12, %s1489_s30, %s2222_s9, %s2222_s9, %s2223_s13  }
 0x357 PF: > { %s1517_s29 = sand.u32 1, %s2194_s24   ;;  %p2975_p4 = scmp.ne.s32.totalorder %s2965_s28, 0 }
 0x358   : > { %p2976_p1 = scmp.ge.s32.totalorder %s2206_s27, 2  ;;  %s1518_s23 = scalar_lea.sflag [#allocation5], %s1517_s29 }
 0x35a   : > { %p1851_p3 = pnand %p2976_p1, %p2975_p4 }
 0x35c   : > { %2189 = dma.done.wait (!%p1851_p3), %s1518_s23, 512  }
 0x35d   : > { %2191 = vsyncadd (!%p1851_p3), %s1518_s23, 4294966784  ;;  %p23_p8 = scmp.ge.s32.totalorder %s2433_s11, 4   ;;  %s2977_s24 = smov %s2198_s25 }
 0x35e   : > { %s2978_s25 = smov %s2202_s26  ;;  %s2979_s26 = smov %s2444_s10 }
 0x35f   : > { %s2980_s27 = smov %s2433_s11  ;;  %25 = sbr.rel (!%p23_p8) target bundleno = 8 (0x8), region = 124 }
 0x366   :  { %1523 = vsyncpa [#allocation4], 1 }
 0x367   :  { %1525 = vsyncpa [#allocation4 + $0x1], 1 }
 0x368   :  { %1526 = vsyncpa [#allocation7], 1 }
 0x369   :  { %1527 = vsyncpa [#allocation10], 1 }
 0x36a   :  { %1528 = vsyncpa [#allocation13], 1 }
 0x36b   :  { %1529 = vsyncpa [#allocation5], 1 }
 0x36c   :  { %1531 = vsyncpa [#allocation5 + $0x1], 1 }

// kernel: encoder_forward.5
= control target key start
LH: loop header
LB: loop body
LE: loop exit
PB: predicated region body
PF: predicated region fallthrough
CT: control target
= control target key end

     0   :  { %s2186_s0 = inlined_call_operand.hbm [shape: bf16[2,4,2,4,16], index: 0, kind: input, shape index: {}]   ;;  %s2187_s1 = inlined_call_operand.hbm [shape: bf16[8,16], index: 1, kind: input, shape index: {}]   ;;  %s2188_s2 = inlined_call_operand.hbm [shape: f32[1,16], index: 2, kind: input, shape index: {}]   ;;  %s2189_s3 = inlined_call_operand.hbm [shape: f32[9,16], index: 3, kind: input, shape index: {}]   ;;  %s2190_s4 = inlined_call_operand.hbm [shape: f32[1,16], index: 4, kind: input, shape index: {}]   ;;  %s2191_s5 = inlined_call_operand.hbm [shape: bf16[16,16], index: 5, kind: input, shape index: {}]   ;;  %s2192_s6 = inlined_call_operand.hbm [shape: f32[1,16], index: 6, kind: input, shape index: {}]   ;;  %s2193_s7 = inlined_call_operand.hbm [shape: bf16[2,4,4,16], index: 7, kind: output, shape index: {}]  }
   0x1   :  { %2197 = sst [smem:[#allocation21_spill]] %s2187_s1 }
   0x2   :  { %12 = vsyncpa [#allocation4], 0 }
   0x3   :  { %14 = vsyncpa [#allocation4 + $0x1], 0 }
   0x4   :  { %15 = vsyncpa [#allocation7], 0 }
   0x5   :  { %16 = vsyncpa [#allocation10], 0 }
   0x6   :  { %17 = vsyncpa [#allocation13], 0 }
   0x7   :  { %18 = vsyncpa [#allocation5], 0 }
   0x8   :  { %20 = vsyncpa [#allocation5 + $0x1], 0  ;;  %s1748_s24 = smov 0   ;;  %s1750_s25 = smov 0  }
   0x9   :  { %s1752_s26 = smov 0   ;;  %s1754_s27 = smov 0  }
   0xa LB: > { %s1689_s28 = smov [#allocation6]   ;;  %s1769_s30 = sadd.s32 4294967295, %s1687_s27   ;;  %s1687_s27 = sphi %s1754_s27, %s2221_s27   ;;  %s1683_s26 = sphi %s1752_s26, %s2220_s26   ;;  %s1679_s25 = sphi %s1750_s25, %s2219_s25   ;;  %s1675_s24 = sphi %s1748_s24, %s2218_s24  }
   0xb   : > { %s222_s29 = sshll.u32 %s1689_s28, 4  ;;  %p1190_p0 = scmp.ge.s32.totalorder %s1687_s27, 1  ;;  %s223_s29 = int_to_ptr.vmem [resolvable:$true] %s222_s29 }
   0xc   : > { %p2194_p1 = scmp.eq.s32.totalorder %s1769_s30, 0  ;;  %p209_p2 = scmp.lt.s32.totalorder %s1687_s27, 3 }
   0xd   : > { %s1690_s9 = smov [#allocation9]   ;;  %s1691_s12 = smov [#allocation12]  }
   0xe   : > { %p1774_p3 = pnand %p1190_p0, %p209_p2  ;;  %s243_s10 = sshll.u32 %s1690_s9, 4  ;;  %s1781_s10 = int_to_ptr.vmem [resolvable:$true] %s243_s10 }
   0xf   : > { %s267_s13 = sshll.u32 %s1691_s12, 4  ;;  %s2200_s1 = sld [smem:[#allocation21_spill]]  ;;  %s1789_s13 = int_to_ptr.vmem [resolvable:$true] %s267_s13 }
  0x10   : > { %s2198_s8 = scalar_select %p1774_p3, 1, 0 }
  0x11   : > { %p1303_p5 = pneg %p1774_p3 }
  0x13   : > { %p1785_p6 = pnand %p1303_p5, %p2194_p1 }
  0x15   : > { %s1411_s16 = scalar_lea.hbm %s2200_s1, 64  ;;  %p1799_p8 = pneg %p1785_p6 }
  0x16   : > { %p1412_p7 = scmp.ne.s32.totalorder %s2200_s1, %s1411_s16  ;;  %p1418_p11 = scmp.lt.u32.totalorder %s1411_s16, %s2200_s1 }
  0x18   : > { %p1414_p9 = pnand %p1799_p8, %p1412_p7 }
  0x1a   : > { %p1415_p10 = pneg %p1414_p9 }
  0x1c   : > { %p1420_p12 = pnand %p1418_p11, %p1415_p10 }
  0x1e   : > { %1423 = shalt.err (!%p1420_p12)
}
  0x1f   : > { %s1424_s22 = scalar_lea.vmem %s223_s29, 64  ;;  %p1432_p5 = scmp.lt.s32.totalorder %s223_s29, %s223_s29 }
  0x20   : > { %p1425_p13 = scmp.ne.s32.totalorder %s223_s29, %s1424_s22  ;;  %p1433_p4 = scmp.lt.s32.totalorder %s1424_s22, %s1424_s22 }
  0x22   : > { %p1427_p0 = pnand %p1425_p13, %p1799_p8  ;;  %p1434_p1 = por %p1433_p4, %p1432_p5 }
  0x24   : > { %p1428_p2 = pneg %p1427_p0 }
  0x26   : > { %p1435_p3 = pnand %p1434_p1, %p1428_p2 }
  0x28   : > { %1438 = shalt.err (!%p1435_p3)
}
  0x29   : > { %1306 = dma.hbm_to_vmem [thread:$0]  (!%p1785_p6), %s2200_s1, 64, %s223_s29, [#allocation7]  }
  0x2a   : > { %s1439_s14 = scalar_lea.hbm %s2189_s3, 256 }
  0x2b   : > { %p1440_p7 = scmp.ne.s32.totalorder %s2189_s3, %s1439_s14  ;;  %p1446_p1 = scmp.lt.u32.totalorder %s1439_s14, %s2189_s3 }
  0x2d   : > { %p1442_p9 = pnand %p1440_p7, %p1799_p8 }
  0x2f   : > { %p1443_p4 = pneg %p1442_p9 }
  0x31   : > { %p1448_p3 = pnand %p1446_p1, %p1443_p4 }
  0x33   : > { %1451 = shalt.err (!%p1448_p3)
}
  0x34   : > { %s1452_s29 = scalar_lea.vmem %s1781_s10, 256  ;;  %p1460_p13 = scmp.lt.s32.totalorder %s1781_s10, %s1781_s10 }
  0x35   : > { %p1453_p10 = scmp.ne.s32.totalorder %s1781_s10, %s1452_s29  ;;  %p1461_p0 = scmp.lt.s32.totalorder %s1452_s29, %s1452_s29 }
  0x37   : > { %p1455_p11 = pnand %p1453_p10, %p1799_p8  ;;  %p1462_p2 = por %p1461_p0, %p1460_p13 }
  0x39   : > { %p1456_p12 = pneg %p1455_p11 }
  0x3b   : > { %p1463_p5 = pnand %p1462_p2, %p1456_p12 }
  0x3d   : > { %1466 = shalt.err (!%p1463_p5)
}
  0x3e   : > { %s1692_s20 = smov 128   ;;  %s1693_s21 = smov 8  }
  0x3f   : > { %1312 = dma.hbm_to_vmem [thread:$0]  (!%p1785_p6), %s2189_s3, 256, %s1781_s10, [#allocation10], %s1692_s20, %s1692_s20, %s1693_s21  }
  0x40   : > { %s1467_s12 = scalar_lea.hbm %s2191_s5, 128 }
  0x41   : > { %p1468_p7 = scmp.ne.s32.totalorder %s2191_s5, %s1467_s12  ;;  %p1474_p1 = scmp.lt.u32.totalorder %s1467_s12, %s2191_s5 }
  0x43   : > { %p1470_p9 = pnand %p1468_p7, %p1799_p8 }
  0x45   : > { %p1471_p4 = pneg %p1470_p9 }
  0x47   : > { %p1476_p3 = pnand %p1474_p1, %p1471_p4 }
  0x49   : > { %1479 = shalt.err (!%p1476_p3)
}
  0x4a   : > { %s1480_s10 = scalar_lea.vmem %s1789_s13, 128  ;;  %p1488_p13 = scmp.lt.s32.totalorder %s1789_s13, %s1789_s13 }
  0x4b   : > { %p1481_p10 = scmp.ne.s32.totalorder %s1789_s13, %s1480_s10  ;;  %p1489_p0 = scmp.lt.s32.totalorder %s1480_s10, %s1480_s10 }
  0x4d   : > { %p1483_p11 = pnand %p1481_p10, %p1799_p8  ;;  %p1490_p2 = por %p1489_p0, %p1488_p13 }
  0x4f   : > { %p1484_p12 = pneg %p1483_p11 }
  0x51   : > { %p1491_p5 = pnand %p1490_p2, %p1484_p12 }
  0x53   : > { %1494 = shalt.err (!%p1491_p5)
}
  0x54   : > { %s1694_s18 = smov 64   ;;  %s1695_s29 = smov 4  }
  0x55   : > { %1318 = dma.hbm_to_vmem [thread:$0]  (!%p1785_p6), %s2191_s5, 128, %s1789_s13, [#allocation13], %s1694_s18, %s1694_s18, %s1695_s29  }
  0x56   : > { %s1696_s22 = smov [#allocation8]   ;;  %s1697_s28 = smov [#allocation11]  }
  0x57   : > { %s233_s23 = sshll.u32 %s1696_s22, 4  ;;  %s257_s9 = sshll.u32 %s1697_s28, 4  ;;  %s234_s23 = int_to_ptr.vmem [resolvable:$true] %s233_s23  ;;  %s258_s9 = int_to_ptr.vmem [resolvable:$true] %s257_s9 }
  0x58   : > { %s1495_s15 = scalar_lea.hbm %s2188_s2, 16 }
  0x59   : > { %p1496_p7 = scmp.ne.s32.totalorder %s2188_s2, %s1495_s15  ;;  %p1502_p1 = scmp.lt.u32.totalorder %s1495_s15, %s2188_s2 }
  0x5b   : > { %p1498_p9 = pnand %p1496_p7, %p1799_p8 }
  0x5d   : > { %p1499_p4 = pneg %p1498_p9 }
  0x5f   : > { %p1504_p3 = pnand %p1502_p1, %p1499_p4 }
  0x61   : > { %1507 = shalt.err (!%p1504_p3)
}
  0x62   : > { %s1508_s13 = scalar_lea.vmem %s234_s23, 16  ;;  %s1515_s18 = scalar_lea.vmem %s234_s23, 32 }
  0x63   : > { %p1509_p10 = scmp.ne.s32.totalorder %s234_s23, %s1508_s13  ;;  %p1516_p13 = scmp.lt.s32.totalorder %s234_s23, %s234_s23 }
  0x64   : > { %p1517_p0 = scmp.lt.s32.totalorder %s1515_s18, %s1508_s13 }
  0x65   : > { %p1511_p11 = pnand %p1509_p10, %p1799_p8 }
  0x66   : > { %p1518_p2 = por %p1517_p0, %p1516_p13 }
  0x67   : > { %p1512_p12 = pneg %p1511_p11 }
  0x69   : > { %p1519_p5 = pnand %p1518_p2, %p1512_p12 }
  0x6b   : > { %1522 = shalt.err (!%p1519_p5)
}
  0x6c   : > { %1309 = dma.hbm_to_vmem [thread:$0]  (!%p1785_p6), %s2188_s2, 16, %s234_s23, [#allocation7]  }
  0x6d   : > { %s1523_s22 = scalar_lea.hbm %s2190_s4, 16 }
  0x6e   : > { %p1524_p7 = scmp.ne.s32.totalorder %s2190_s4, %s1523_s22  ;;  %p1530_p1 = scmp.lt.u32.totalorder %s1523_s22, %s2190_s4 }
  0x70   : > { %p1526_p9 = pnand %p1524_p7, %p1799_p8 }
  0x72   : > { %p1527_p4 = pneg %p1526_p9 }
  0x74   : > { %p1532_p3 = pnand %p1530_p1, %p1527_p4 }
  0x76   : > { %1535 = shalt.err (!%p1532_p3)
}
  0x77   : > { %s1536_s16 = scalar_lea.vmem %s258_s9, 16  ;;  %s1543_s23 = scalar_lea.vmem %s258_s9, 32 }
  0x78   : > { %p1537_p10 = scmp.ne.s32.totalorder %s258_s9, %s1536_s16  ;;  %p1544_p13 = scmp.lt.s32.totalorder %s258_s9, %s258_s9 }
  0x79   : > { %p1545_p0 = scmp.lt.s32.totalorder %s1543_s23, %s1536_s16 }
  0x7a   : > { %p1539_p11 = pnand %p1537_p10, %p1799_p8 }
  0x7b   : > { %p1546_p2 = por %p1545_p0, %p1544_p13 }
  0x7c   : > { %p1540_p12 = pneg %p1539_p11 }
  0x7e   : > { %p1547_p5 = pnand %p1546_p2, %p1540_p12 }
  0x80   : > { %1550 = shalt.err (!%p1547_p5)
}
  0x81   : > { %1315 = dma.hbm_to_vmem [thread:$0]  (!%p1785_p6), %s2190_s4, 16, %s258_s9, [#allocation10]  }
  0x82   : > { %s1698_s13 = smov [#allocation14]   ;;  %s1551_s1 = scalar_lea.hbm %s2192_s6, 16 }
  0x83   : > { %s281_s18 = sshll.u32 %s1698_s13, 4  ;;  %p1552_p7 = scmp.ne.s32.totalorder %s2192_s6, %s1551_s1  ;;  %s282_s18 = int_to_ptr.vmem [resolvable:$true] %s281_s18 }
  0x84   : > { %p1558_p1 = scmp.lt.u32.totalorder %s1551_s1, %s2192_s6 }
  0x85   : > { %p1554_p9 = pnand %p1552_p7, %p1799_p8 }
  0x87   : > { %p1555_p4 = pneg %p1554_p9 }
  0x89   : > { %p1560_p3 = pnand %p1558_p1, %p1555_p4 }
  0x8b   : > { %1563 = shalt.err (!%p1560_p3)
}
  0x8c   : > { %s1564_s9 = scalar_lea.vmem %s282_s18, 16  ;;  %s1571_s14 = scalar_lea.vmem %s282_s18, 32 }
  0x8d   : > { %p1565_p10 = scmp.ne.s32.totalorder %s282_s18, %s1564_s9  ;;  %p1572_p13 = scmp.lt.s32.totalorder %s282_s18, %s282_s18 }
  0x8e   : > { %p1573_p0 = scmp.lt.s32.totalorder %s1571_s14, %s1564_s9 }
  0x8f   : > { %p1567_p11 = pnand %p1565_p10, %p1799_p8 }
  0x90   : > { %p1574_p2 = por %p1573_p0, %p1572_p13 }
  0x91   : > { %p1568_p12 = pneg %p1567_p11 }
  0x93   : > { %p1575_p5 = pnand %p1574_p2, %p1568_p12 }
  0x95   : > { %1578 = shalt.err (!%p1575_p5)
}
  0x96   : > { %1321 = dma.hbm_to_vmem [thread:$0]  (!%p1785_p6), %s2192_s6, 16, %s282_s18, [#allocation13]  }
  0x97   : > { %s1189_s19 = sadd.s32 4294967294, %s1687_s27   ;;  %s1917_s11 = sadd.s32 1, %s1687_s27  }
  0x98   : > { %s30_s23 = ssub.s32 %s1687_s27, %s1917_s11  ;;  %s33_s17 = sadd.s32 1, %s1683_s26 }
  0x99   : > { %p31_p8 = scmp.eq.s32.totalorder %s30_s23, 0  ;;  %p40_p7 = scmp.ne.s32.totalorder %s1683_s26, %s1679_s25 }
  0x9a   : > { %p41_p9 = scmp.eq.s32.totalorder %s1687_s27, 0  ;;  %p46_p4 = scmp.ne.s32.totalorder %s1679_s25, %s1675_s24 }
  0x9b   : > { %s1928_s10 = scalar_select %p31_p8, %s1683_s26, %s33_s17  }
  0x9c   : > { %p1930_p1 = por %p41_p9, %p40_p7  ;;  %p2203_p3 = scmp.eq.s32.totalorder %s1769_s30, 0 }
  0x9d   : > { %p196_p10 = scmp.eq.s32.totalorder %s1769_s30, 1  ;;  %p202_p11 = scmp.eq.s32.totalorder %s1189_s19, 1 }
  0x9e   : > { %p1936_p6 = por %p2203_p3, %p46_p4  ;;  %p1336_p12 = scmp.lt.s32.totalorder %s1687_s27, 2 }
  0x9f   : > { %s292_s29 = sand.u32 1, %s1683_s26   ;;  %p1943_p13 = por %p196_p10, %p40_p7 }
  0xa0   : > { %p1947_p0 = por %p202_p11, %p46_p4  ;;  %s1198_s21 = sshll.u32 %s292_s29, 4 }
  0xa1   : > { %s2205_s20 = scalar_select %p1943_p13, 1, 0 }
  0xa2   : > { %s2206_s1 = scalar_select %p1947_p0, 1, 0 }
  0xa3   : > { %s1233_s22 = sshll.u32 %s1687_s27, 8  ;;  %s296_s14 = scalar_lea.vmem [#allocation3], %s1198_s21 }
  0xa4   : > { %s1955_s9 = scalar_lea.hbm %s2186_s0, %s1233_s22  ;;  %s303_s15 = sshll.u32 %s296_s14, 4  ;;  %s1957_s15 = int_to_ptr.vmem [resolvable:$true] %s303_s15 }
  0xa5   : > { %p1961_p2 = pnand %p1336_p12, %p1930_p1  ;;  %s1965_s19 = scalar_lea.sflag [#allocation4], %s292_s29 }
  0xa6   : > { %s1579_s23 = scalar_lea.hbm %s1955_s9, 256  ;;  %s1584_s13 = scalar_lea.hbm %s2186_s0, 512 }
  0xa7   : > { %p1580_p5 = scmp.ne.s32.totalorder %s1955_s9, %s1579_s23  ;;  %p1581_p8 = pneg %p1961_p2 }
  0xa8   : > { %p1585_p4 = scmp.lt.u32.totalorder %s1955_s9, %s2186_s0  ;;  %p1586_p1 = scmp.lt.u32.totalorder %s1584_s13, %s1579_s23 }
  0xa9   : > { %p1582_p7 = pnand %p1581_p8, %p1580_p5  ;;  %p1588_p10 = scmp.lt.u32.totalorder %s1579_s23, %s1955_s9 }
  0xaa   : > { %p1587_p3 = por %p1586_p1, %p1585_p4 }
  0xab   : > { %p1583_p9 = pneg %p1582_p7 }
  0xac   : > { %p1589_p11 = por %p1588_p10, %p1587_p3 }
  0xae   : > { %p1590_p12 = pnand %p1589_p11, %p1583_p9 }
  0xb0   : > { %1593 = shalt.err (!%p1590_p12)
}
  0xb1   : > { %s1594_s29 = scalar_lea.vmem %s1957_s15, 256  ;;  %s1699_s12 = smov [#allocation3]  }
  0xb2   : > { %p1595_p5 = scmp.ne.s32.totalorder %s1957_s15, %s1594_s29  ;;  %s1599_s14 = sshll.u32 %s1699_s12, 4  ;;  %s1600_s14 = int_to_ptr.vmem [resolvable:$false] %s1599_s14 }
  0xb3   : > { %s1601_s17 = scalar_lea.vmem %s1600_s14, 512  ;;  %p1602_p13 = scmp.lt.s32.totalorder %s1957_s15, %s1600_s14 }
  0xb4   : > { %p1597_p7 = pnand %p1595_p5, %p1581_p8  ;;  %p1603_p4 = scmp.lt.s32.totalorder %s1601_s17, %s1594_s29 }
  0xb6   : > { %p1598_p0 = pneg %p1597_p7  ;;  %p1604_p1 = por %p1603_p4, %p1602_p13 }
  0xb8   : > { %p1605_p3 = pnand %p1604_p1, %p1598_p0 }
  0xba   : > { %1608 = shalt.err (!%p1605_p3)
}
  0xbb   : > { %s1700_s23 = smov 32   ;;  %s1701_s21 = smov 2  }
  0xbc   : > { %1325 = dma.hbm_to_vmem [thread:$0]  (!%p1961_p2), %s1955_s9, 256, %s1957_s15, %s1965_s19, %s1700_s23, %s1700_s23, %s1701_s21  }
  0xbd   : > { %p2208_p8 = scmp.ne.s32.totalorder %s2198_s8, 0 }
  0xbe   : > { %s1996_s13 = sand.u32 (!%p2208_p8), 1, %s1679_s25  }
  0xbf   : > { %315 = sbr.rel (%p2208_p8) target bundleno = 840 (0x348), region = 48  ;;  %s1202_s22 = sshll.u32 (!%p2208_p8), %s1996_s13, 4 }
  0xc0   : > { %s318_s28 = scalar_lea.sflag (!%p2208_p8), [#allocation4], %s1996_s13  ;;  %s2000_s29 = scalar_lea.vmem (!%p2208_p8), [#allocation3], %s1202_s22 }
  0xc6   : > { %1654 = dma.done.wait (%p1936_p6), %s318_s28, 256  }
  0xc7   : > { %1656 = vsyncadd (%p1936_p6), %s318_s28, 4294967040  ;;  %p2209_p13 = scmp.eq.s32.totalorder %s1769_s30, 0 }
  0xc9   : > { %1658 = dma.done.wait (%p2209_p13), [#allocation7], 80   ;;  %p2210_p0 = pmov %p2209_p13 }
  0xcb   : > { %1660 = vsyncadd (%p2210_p0), [#allocation7], 4294967216  ;;  %p2211_p2 = pmov %p2210_p0 }
  0xcc   : > { %p2212_p9 = pmov %p2210_p0 }
  0xcd   : > { %1662 = dma.done.wait (%p2211_p2), [#allocation10], 272  }
  0xce   : > { %1664 = vsyncadd (%p2212_p9), [#allocation10], 4294967024  ;;  %p2213_p10 = pmov %p2210_p0 }
  0xcf   : > { %p2214_p11 = pmov %p2210_p0 }
  0xd0   : > { %1666 = dma.done.wait (%p2213_p10), [#allocation13], 144  }
  0xd1   : > { %1668 = vsyncadd (%p2214_p11), [#allocation13], 4294967152  ;;  %v424_v0 = vlaneseq  ;;  %v1702_v1 = vmov 0.0   ;;  %vm1703_vm0 = vmmov 0   ;;  %vm440_vm1 = vcmask 1043456   ;;  %s1704_s8 = smov 120  }
  0xd2   : > { %1245 = vmatprep.subr.bf16.mxu0 %v1702_v1  ;;  %1251 = vmatprep.subr.bf16.mxu1 %v1702_v1  ;;  %v1403_v3 = vld.sshfl [vmem:[%s2000_s29] sm:$0xf pattern:$0x76325410]  ;;  %vm436_vm2 = vcmask 64512   ;;  %vm377_vm3 = vcmask 126976  }
  0xd3   : > { %v2018_v2 = vshrl.u32 %v424_v0, 7  ;;  %1247 = vmatprep.mubr.msk.bf16.mxu0 %vm1703_vm0, %v1702_v1  ;;  %1253 = vmatprep.mubr.msk.bf16.mxu1 %vm1703_vm0, %v1702_v1  ;;  %v1404_v4 = vld.sshfl [vmem:[%s2000_s29 + $0x8] sm:$0xf pattern:$0x76325410]  ;;  %vm382_vm4 = vcmask 122880  }
  0xd4   : > { %v1405_v5 = vld.sshfl [vmem:[%s2000_s29 + $0x2] sm:$0xf pattern:$0x76325410]  ;;  %v531_v8 = vcombine.low %v1403_v3, %v1404_v4  ;;  %380 = vst.msk [vmem:[#allocation2 + $0x50] sm:$0x1f] %vm377_vm3, %v1702_v1 }
  0xd5   : > { %v1406_v6 = vld.sshfl [vmem:[%s2000_s29 + $0xa] sm:$0xf pattern:$0x76325410]  ;;  %v403_v7 = vld [vmem:[#allocation6] sm:$0xf] }
  0xd6   : > { %v442_v9 = vsel %vm440_vm1, %v403_v7, 0  ;;  %v1407_v10 = vld.sshfl [vmem:[%s2000_s29] sm:$0xf pattern:$0x76325410]  ;;  %532 = vrot.lane.b32.xlu0 %v531_v8, %s1704_s8  ;;  %v714_v12 = vcombine.low %v1405_v5, %v1406_v6  ;;  %v1402_v31 = vld [vmem:[#allocation12] sm:$0xff]  }
  0xd7   : > { %1246 = vmatpush3.bf16.msra.mxu0 %v442_v9  ;;  %v1408_v11 = vld.sshfl [vmem:[%s2000_s29 + $0x8] sm:$0xf pattern:$0x76325410]  ;;  %1252 = vmatpush3.bf16.msra.mxu1 %v442_v9  ;;  %381 = vst.msk [vmem:[#allocation2 + $0x78] sm:$0x1f] %vm377_vm3, %v1702_v1 }
  0xd8   : > { %1257 = vmatprep.subr.bf16.mxu0 %v1702_v1  ;;  %1263 = vmatprep.subr.bf16.mxu1 %v1702_v1  ;;  %v1409_v13 = vld.sshfl [vmem:[%s2000_s29 + $0x2] sm:$0xf pattern:$0x76325410]  ;;  %v435_v15 = vcombine.low %v1407_v10, %v1408_v11  ;;  %389 = vst.msk [vmem:[#allocation2 + $0x30] sm:$0x1] %vm382_vm4, %v1702_v1 }
  0xd9   : > { %v1410_v14 = vld.sshfl [vmem:[%s2000_s29 + $0xa] sm:$0xf pattern:$0x76325410]  ;;  %390 = vst.msk [vmem:[#allocation2 + $0x38] sm:$0x1] %vm382_vm4, %v1702_v1 }
  0xda   : > { %715 = vrot.lane.b32.xlu0 %v714_v12, %s1704_s8  ;;  %1248 = vmatmul.mubr.msk.bf16.vlgmr.msra.gmra.mrb[0].mxu0 %vm436_vm2, %v435_v15  ;;  %v624_v16 = vcombine.low %v1409_v13, %v1410_v14  ;;  %391 = vst.msk [vmem:[#allocation2 + $0x40] sm:$0x1] %vm382_vm4, %v1702_v1  ;;  %392 = vst.msk [vmem:[#allocation2 + $0x48] sm:$0x1] %vm382_vm4, %v1702_v1  ;;  %v2033_v19 = vld [vmem:[#allocation8] ss:$0 sm:$0xff] }
  0xdb   : > { %1258 = vmatpush3.bf16.msra.mxu0 %v442_v9  ;;  %1259 = vmatprep.mubr.msk.bf16.mxu0 %vm1703_vm0, %v1702_v1  ;;  %398 = vst.msk [vmem:[#allocation2 + $0x78] sm:$0x1] %vm382_vm4, %v1702_v1  ;;  %399 = vst.msk [vmem:[#allocation2 + $0x80] sm:$0x1] %vm382_vm4, %v1702_v1  ;;  %vm502_vm5 = vcmask 125952   ;;  %v791_v61 = vsub.s32 0, %v2018_v2 }
  0xdc   : > { %1269 = vmatprep.subr.bf16.mxu0 %v1702_v1  ;;  %400 = vst.msk [vmem:[#allocation2 + $0x88] sm:$0x1] %vm382_vm4, %v1702_v1  ;;  %401 = vst.msk [vmem:[#allocation2 + $0x90] sm:$0x1] %vm382_vm4, %v1702_v1  ;;  %v808_v62 = vsub.s32 1, %v2018_v2  ;;  %v2051_v5 = vld [vmem:[#allocation9] sm:$0xff] }
  0xdd   : > { %402 = vst.msk [vmem:[#allocation2 + $0x98] sm:$0x1] %vm382_vm4, %v1702_v1  ;;  %v2054_v6 = vrot.slane %v2051_v5, %v791_v61  ;;  %v824_v8 = vsub.s32 2, %v2018_v2  ;;  %v802_v12 = vld [vmem:[#allocation2 + $0x51] sm:$0xf]  ;;  %vm985_vm6 = vcmask 130048  }
  0xde   : > { %v2057_v7 = vrot.slane %v2051_v5, %v808_v62  ;;  %s1209_s18 = sshll.u32 %s1996_s13, 3  ;;  %vm1040_vm7 = vcmask 123904   ;;  %s1234_s16 = sshll.u32 %s1769_s30, 7 }
  0xdf   : > { %s375_s9 = scalar_lea.vmem [#allocation15], %s1209_s18  ;;  %s2139_s14 = scalar_lea.hbm %s2193_s7, %s1234_s16 }
  0xe0   : > { %s1059_s15 = sshll.u32 %s375_s9, 4  ;;  %s1046_s30 = scalar_lea.sflag [#allocation5], %s1996_s13  ;;  %s2134_s15 = int_to_ptr.vmem [resolvable:$true] %s1059_s15 }
  0xe1   : > { %s1609_s17 = scalar_lea.vmem %s2134_s15, 128  ;;  %p2215_p12 = scmp.ne.s32.totalorder %s2205_s20, 0 }
  0xe2   : > { %1260 = vmatmul.mubr.msk.bf16.vlgmr.msra.gmra.mrb[4].mxu0 %vm436_vm2, %v624_v16  ;;  %v785_v11 = vld [vmem:[#allocation2 + $0x78] sm:$0xf]  ;;  %p1610_p6 = scmp.ne.s32.totalorder %s2134_s15, %s1609_s17  ;;  %s1705_s23 = smov [#allocation15]  }
  0xe3   : > { %1271 = vmatprep.mubr.msk.bf16.mxu0 %vm1703_vm0, %v1702_v1  ;;  %1270 = vmatpush3.bf16.msra.mxu0 %v1402_v31  ;;  %s1613_s21 = sshll.u32 %s1705_s23, 4  ;;  %s1614_s21 = int_to_ptr.vmem [resolvable:$false] %s1613_s21 }
  0xe4   : > { %p1611_p5 = pnand %p1610_p6, %p2215_p12  ;;  %s1615_s22 = scalar_lea.vmem %s1614_s21, 256 }
  0xe5   : > { %p1616_p4 = scmp.lt.s32.totalorder %s2134_s15, %s1614_s21  ;;  %p1617_p1 = scmp.lt.s32.totalorder %s1615_s22, %s1609_s17 }
  0xe6   : > { %p1612_p7 = pneg %p1611_p5 }
  0xe7   : > { %p1618_p3 = por %p1617_p1, %p1616_p4 }
  0xe9   : > { %p1619_p8 = pnand %p1618_p3, %p1612_p7 }
 0x148   : > { %v533_v17 = vpop.permute.xlu0 %532 }
 0x149   : > { %1254 = vmatmul.mubr.msk.bf16.vlgmr.msra.gmra.mrb[0].mxu1 %vm436_vm2, %v533_v17 }
 0x14a   : > { %1264 = vmatpush3.bf16.msra.mxu1 %v442_v9  ;;  %1265 = vmatprep.mubr.msk.bf16.mxu1 %vm1703_vm0, %v1702_v1 }
 0x14c   : > { %v716_v18 = vpop.permute.xlu0 %715 }
 0x151   : > { %1266 = vmatmul.mubr.msk.bf16.vlgmr.msra.gmra.mrb[4].mxu1 %vm436_vm2, %v716_v18 }
 0x1ad   : > { %v478_v20 = vpop.f32.mrb[0].mxu0 }
 0x1ae   : > { %v479_v21 = vadd.f32 %v2033_v19, %v478_v20  ;;  %v1249_v22 = vpop.f32.mrb[1].mxu0  ;;  %v793_v20 = vmul.f32 %v2054_v6, %v785_v11 }
 0x1af   : > { %v481_v23 = vpop.f32.mrb[2].mxu0  ;;  %v2064_v22 = vrot.slane %v2051_v5, %v824_v8 }
 0x1b0   : > { %v485_v24 = vadd.f32 3.0, %v479_v21  ;;  %v482_v25 = vadd.f32 %v2033_v19, %v481_v23  ;;  %v1250_v26 = vpop.f32.mrb[3].mxu0 }
 0x1b2   : > { %v487_v27 = vmax.f32 %v485_v24, 0.0  ;;  %v486_v28 = vadd.f32 3.0, %v482_v25 }
 0x1b4   : > { %v489_v29 = vmin.f32 %v487_v27, 6.0  ;;  %v488_v30 = vmax.f32 %v486_v28, 0.0  ;;  %v818_v28 = vld [vmem:[#allocation2 + $0x79] sm:$0xf] }
 0x1b5   : > { %v662_v32 = vpop.f32.mrb[4].mxu0 }
 0x1b6   : > { %v491_v33 = vmul.f32 %v489_v29, %v479_v21  ;;  %v490_v34 = vmin.f32 %v488_v30, 6.0  ;;  %v663_v35 = vadd.f32 %v2033_v19, %v662_v32  ;;  %v1261_v36 = vpop.f32.mrb[5].mxu0  ;;  %v810_v21 = vmul.f32 %v2057_v7, %v802_v12 }
 0x1b7   : > { %v665_v37 = vpop.f32.mrb[6].mxu0  ;;  %v840_v29 = vsub.s32 3, %v2018_v2 }
 0x1b8   : > { %v493_v38 = vmul.f32 0.16666667, %v491_v33  ;;  %v492_v39 = vmul.f32 %v490_v34, %v482_v25  ;;  %v669_v40 = vadd.f32 3.0, %v663_v35  ;;  %v666_v41 = vadd.f32 %v2033_v19, %v665_v37  ;;  %v1262_v42 = vpop.f32.mrb[7].mxu0 }
 0x1b9   : > { %v814_v34 = vadd.f32 %v810_v21, %v793_v20 }
 0x1ba   : > { %v497_v43 = vcombine.high %v493_v38, %v493_v38  ;;  %503 = vst.msk [vmem:[#allocation2 + $0x9] sm:$0xf] %vm502_vm5, %v493_v38  ;;  %v494_v44 = vmul.f32 0.16666667, %v492_v39  ;;  %v671_v45 = vmax.f32 %v669_v40, 0.0  ;;  %v670_v46 = vadd.f32 3.0, %v666_v41 }
 0x1bb   : > { %v856_v38 = vsub.s32 4, %v2018_v2 }
 0x1bc   : > { %504 = vst.msk [vmem:[#allocation2 + $0x11] sm:$0xf] %vm502_vm5, %v497_v43  ;;  %v498_v47 = vcombine.high %v494_v44, %v494_v44  ;;  %505 = vst.msk [vmem:[#allocation2 + $0x19] sm:$0xf] %vm502_vm5, %v494_v44  ;;  %v673_v48 = vmin.f32 %v671_v45, 6.0  ;;  %v672_v49 = vmax.f32 %v670_v46, 0.0 }
 0x1bd   : > { %v2078_v46 = vrot.slane %v2051_v5, %v856_v38 }
 0x1be   : > { %506 = vst.msk [vmem:[#allocation2 + $0x21] sm:$0xf] %vm502_vm5, %v498_v47  ;;  %v675_v50 = vmul.f32 %v673_v48, %v663_v35  ;;  %v674_v51 = vmin.f32 %v672_v49, 6.0  ;;  %v872_v47 = vsub.s32 5, %v2018_v2 }
 0x1c0   : > { %v677_v52 = vmul.f32 0.16666667, %v675_v50  ;;  %v676_v53 = vmul.f32 %v674_v51, %v666_v41  ;;  %v2075_v41 = vrot.slane %v2051_v5, %v840_v29 }
 0x1c1   : > { %v850_v51 = vld [vmem:[#allocation2 + $0x9] sm:$0xf] }
 0x1c2   : > { %v681_v54 = vcombine.high %v677_v52, %v677_v52  ;;  %686 = vst.msk [vmem:[#allocation2 + $0x59] sm:$0xf] %vm502_vm5, %v677_v52  ;;  %v678_v55 = vmul.f32 0.16666667, %v676_v53  ;;  %v888_v52 = vsub.s32 6, %v2018_v2 }
 0x1c3   : > { %v851_v12 = vld [vmem:[#allocation2 + $0x11] sm:$0xf] }
 0x1c4   : > { %687 = vst.msk [vmem:[#allocation2 + $0x61] sm:$0xf] %vm502_vm5, %v681_v54  ;;  %v682_v56 = vcombine.high %v678_v55, %v678_v55  ;;  %688 = vst.msk [vmem:[#allocation2 + $0x69] sm:$0xf] %vm502_vm5, %v678_v55  ;;  %v858_v55 = vmul.f32 %v2078_v46, %v850_v51  ;;  %v859_v38 = vmul.f32 %v2078_v46, %v851_v12 }
 0x1c6   : > { %689 = vst.msk [vmem:[#allocation2 + $0x71] sm:$0xf] %vm502_vm5, %v682_v56  ;;  %v2088_v56 = vrot.slane %v2051_v5, %v872_v47 }
 0x1cb   : > { %v804_v62 = vld [vmem:[#allocation2 + $0x61] sm:$0xf] }
 0x21c   : > { %v571_v57 = vpop.f32.mrb[0].mxu1 }
 0x21d   : > { %v572_v58 = vadd.f32 %v2033_v19, %v571_v57  ;;  %v1255_v59 = vpop.f32.mrb[1].mxu1  ;;  %v904_v57 = vsub.s32 7, %v2018_v2 }
 0x21e   : > { %v574_v60 = vpop.f32.mrb[2].mxu1  ;;  %v2093_v59 = vrot.slane %v2051_v5, %v888_v52 }
 0x21f   : > { %v578_v63 = vadd.f32 3.0, %v572_v58  ;;  %v575_v0 = vadd.f32 %v2033_v19, %v574_v60  ;;  %v1256_v1 = vpop.f32.mrb[3].mxu1  ;;  %v803_v60 = vld [vmem:[#allocation2 + $0x59] sm:$0xf]  ;;  %v2097_v8 = vrot.slane %v2051_v5, %v904_v57 }
 0x221   : > { %v580_v3 = vmax.f32 %v578_v63, 0.0  ;;  %v579_v4 = vadd.f32 3.0, %v575_v0  ;;  %v805_v63 = vld [vmem:[#allocation2 + $0x69] sm:$0xf] }
 0x223   : > { %v582_v9 = vmin.f32 %v580_v3, 6.0  ;;  %v581_v10 = vmax.f32 %v579_v4, 0.0 }
 0x224   : > { %v754_v13 = vpop.f32.mrb[4].mxu1 }
 0x225   : > { %v584_v14 = vmul.f32 %v582_v9, %v572_v58  ;;  %v583_v15 = vmin.f32 %v581_v10, 6.0  ;;  %v755_v16 = vadd.f32 %v2033_v19, %v754_v13  ;;  %v1267_v17 = vpop.f32.mrb[5].mxu1  ;;  %v2099_v9 = vld [vmem:[#allocation9 + $0x8] ss:$0 sm:$0xff]  ;;  %v811_v10 = vmul.f32 %v2057_v7, %v803_v60 }
 0x226   : > { %v757_v18 = vpop.f32.mrb[6].mxu1  ;;  %v812_v17 = vmul.f32 %v2057_v7, %v804_v62 }
 0x227   : > { %v586_v23 = vmul.f32 0.16666667, %v584_v14  ;;  %v585_v24 = vmul.f32 %v583_v15, %v575_v0  ;;  %v761_v25 = vadd.f32 3.0, %v755_v16  ;;  %v758_v26 = vadd.f32 %v2033_v19, %v757_v18  ;;  %v1268_v27 = vpop.f32.mrb[7].mxu1  ;;  %v898_v14 = vld [vmem:[#allocation2 + $0x59] sm:$0xf] }
 0x228   : > { %v826_v19 = vmul.f32 %v2064_v22, %v818_v28  ;;  %v813_v18 = vmul.f32 %v2057_v7, %v805_v63  ;;  %v906_v7 = vmul.f32 %v2097_v8, %v898_v14 }
 0x229   : > { %v590_v30 = vcombine.high %v586_v23, %v586_v23  ;;  %595 = vst.msk [vmem:[#allocation2 + $0x31] sm:$0xf] %vm502_vm5, %v586_v23  ;;  %v587_v31 = vmul.f32 0.16666667, %v585_v24  ;;  %v763_v32 = vmax.f32 %v761_v25, 0.0  ;;  %v762_v33 = vadd.f32 3.0, %v758_v26 }
 0x22a   : > { %v830_v44 = vadd.f32 %v826_v19, %v814_v34 }
 0x22b   : > { %596 = vst.msk [vmem:[#allocation2 + $0x39] sm:$0xf] %vm502_vm5, %v590_v30  ;;  %v591_v35 = vcombine.high %v587_v31, %v587_v31  ;;  %597 = vst.msk [vmem:[#allocation2 + $0x41] sm:$0xf] %vm502_vm5, %v587_v31  ;;  %v765_v36 = vmin.f32 %v763_v32, 6.0  ;;  %v764_v37 = vmax.f32 %v762_v33, 0.0 }
 0x22d   : > { %598 = vst.msk [vmem:[#allocation2 + $0x49] sm:$0xf] %vm502_vm5, %v591_v35  ;;  %v767_v39 = vmul.f32 %v765_v36, %v755_v16  ;;  %v766_v40 = vmin.f32 %v764_v37, 6.0  ;;  %v853_v37 = vld [vmem:[#allocation2 + $0x21] sm:$0xf] }
 0x22e   : > { %v861_v51 = vmul.f32 %v2078_v46, %v853_v37 }
 0x22f   : > { %v769_v42 = vmul.f32 0.16666667, %v767_v39  ;;  %v768_v43 = vmul.f32 %v766_v40, %v758_v26 }
 0x230   : > { %v834_v45 = vld [vmem:[#allocation2 + $0x30] sm:$0xf] }
 0x231   : > { %v773_v48 = vcombine.high %v769_v42, %v769_v42  ;;  %778 = vst.msk [vmem:[#allocation2 + $0x81] sm:$0xf] %vm502_vm5, %v769_v42  ;;  %v770_v49 = vmul.f32 0.16666667, %v768_v43  ;;  %v842_v50 = vmul.f32 %v2075_v41, %v834_v45  ;;  %v866_v58 = vld [vmem:[#allocation2 + $0x31] sm:$0xf] }
 0x232   : > { %v874_v3 = vmul.f32 %v2088_v56, %v866_v58  ;;  %v835_v11 = vld [vmem:[#allocation2 + $0x38] sm:$0xf]  ;;  %v836_v27 = vld [vmem:[#allocation2 + $0x40] sm:$0xf] }
 0x233   : > { %779 = vst.msk [vmem:[#allocation2 + $0x89] sm:$0xf] %vm502_vm5, %v773_v48  ;;  %v774_v53 = vcombine.high %v770_v49, %v770_v49  ;;  %780 = vst.msk [vmem:[#allocation2 + $0x91] sm:$0xf] %vm502_vm5, %v770_v49  ;;  %v846_v54 = vadd.f32 %v842_v50, %v830_v44  ;;  %v843_v31 = vmul.f32 %v2075_v41, %v835_v11  ;;  %v867_v39 = vld [vmem:[#allocation2 + $0x39] sm:$0xf] }
 0x234   : > { %v837_v30 = vld [vmem:[#allocation2 + $0x48] sm:$0xf]  ;;  %v844_v19 = vmul.f32 %v2075_v41, %v836_v27  ;;  %v868_v48 = vld [vmem:[#allocation2 + $0x41] sm:$0xf]  ;;  %v875_v58 = vmul.f32 %v2088_v56, %v867_v39 }
 0x235   : > { %781 = vst.msk [vmem:[#allocation2 + $0x99] sm:$0xf] %vm502_vm5, %v774_v53  ;;  %v862_v61 = vadd.f32 %v858_v55, %v846_v54  ;;  %v845_v45 = vmul.f32 %v2075_v41, %v837_v30  ;;  %v869_v49 = vld [vmem:[#allocation2 + $0x49] sm:$0xf]  ;;  %v1224_v53 = vld [vmem:[#allocation11] ss:$0 sm:$0xff]  ;;  %v876_v62 = vmul.f32 %v2088_v56, %v868_v48 }
 0x236   : > { %v877_v41 = vmul.f32 %v2088_v56, %v869_v49 }
 0x237   : > { %v878_v5 = vadd.f32 %v874_v3, %v862_v61  ;;  %v899_v61 = vld [vmem:[#allocation2 + $0x61] sm:$0xf] }
 0x238   : > { %v786_v0 = vld [vmem:[#allocation2 + $0x80] sm:$0xf] }
 0x239   : > { %v819_v1 = vld [vmem:[#allocation2 + $0x81] sm:$0xf]  ;;  %v794_v2 = vmul.f32 %v2054_v6, %v786_v0 }
 0x23a   : > { %v882_v4 = vld [vmem:[#allocation2 + $0x80] sm:$0xf]  ;;  %v787_v15 = vld [vmem:[#allocation2 + $0x88] sm:$0xf]  ;;  %v788_v16 = vld [vmem:[#allocation2 + $0x90] sm:$0xf]  ;;  %v827_v26 = vmul.f32 %v2064_v22, %v819_v1 }
 0x23b   : > { %v890_v13 = vmul.f32 %v2093_v59, %v882_v4  ;;  %v820_v20 = vld [vmem:[#allocation2 + $0x89] sm:$0xf]  ;;  %v795_v21 = vmul.f32 %v2054_v6, %v787_v15  ;;  %v796_v23 = vmul.f32 %v2054_v6, %v788_v16  ;;  %v815_v24 = vadd.f32 %v811_v10, %v794_v2  ;;  %v821_v25 = vld [vmem:[#allocation2 + $0x91] sm:$0xf]  ;;  %v914_v28 = vld [vmem:[#allocation2 + $0x81] sm:$0xf] }
 0x23c   : > { %v828_v29 = vmul.f32 %v2064_v22, %v820_v20  ;;  %v829_v35 = vmul.f32 %v2064_v22, %v821_v25  ;;  %v852_v6 = vld [vmem:[#allocation2 + $0x19] sm:$0xf]  ;;  %v922_v42 = vmul.f32 %v2099_v9, %v914_v28  ;;  %v883_v50 = vld [vmem:[#allocation2 + $0x88] sm:$0xf]  ;;  %v884_v60 = vld [vmem:[#allocation2 + $0x90] sm:$0xf] }
 0x23d   : > { %v894_v32 = vadd.f32 %v890_v13, %v878_v5  ;;  %v816_v33 = vadd.f32 %v812_v17, %v795_v21  ;;  %v817_v34 = vadd.f32 %v813_v18, %v796_v23  ;;  %v831_v36 = vadd.f32 %v827_v26, %v815_v24  ;;  %v885_v63 = vld [vmem:[#allocation2 + $0x98] sm:$0xf]  ;;  %v901_v2 = vld [vmem:[#allocation2 + $0x71] sm:$0xf]  ;;  %v915_v10 = vld [vmem:[#allocation2 + $0x89] sm:$0xf] }
 0x23e   : > { %v860_v22 = vmul.f32 %v2078_v46, %v852_v6  ;;  %v891_v0 = vmul.f32 %v2093_v59, %v883_v50  ;;  %v900_v46 = vld [vmem:[#allocation2 + $0x69] sm:$0xf]  ;;  %v892_v12 = vmul.f32 %v2093_v59, %v884_v60  ;;  %v907_v13 = vmul.f32 %v2097_v8, %v899_v61  ;;  %v916_v56 = vld [vmem:[#allocation2 + $0x91] sm:$0xf]  ;;  %v917_v5 = vld [vmem:[#allocation2 + $0x99] sm:$0xf] }
 0x23f   : > { %v910_v40 = vadd.f32 %v906_v7, %v894_v32  ;;  %v832_v43 = vadd.f32 %v828_v29, %v816_v33  ;;  %v833_v44 = vadd.f32 %v829_v35, %v817_v34  ;;  %v847_v47 = vadd.f32 %v843_v31, %v831_v36 }
 0x240   : > { %v893_v16 = vmul.f32 %v2093_v59, %v885_v63  ;;  %v908_v18 = vmul.f32 %v2097_v8, %v900_v46  ;;  %v909_v20 = vmul.f32 %v2097_v8, %v901_v2  ;;  %v923_v21 = vmul.f32 %v2099_v9, %v915_v10 }
 0x241   : > { %v926_v52 = vadd.f32 %v922_v42, %v910_v40  ;;  %v848_v54 = vadd.f32 %v844_v19, %v832_v43  ;;  %v849_v55 = vadd.f32 %v845_v45, %v833_v44  ;;  %v863_v57 = vadd.f32 %v859_v38, %v847_v47 }
 0x242   : > { %v924_v27 = vmul.f32 %v2099_v9, %v916_v56  ;;  %v925_v30 = vmul.f32 %v2099_v9, %v917_v5 }
 0x243   : > { %v864_v1 = vadd.f32 %v860_v22, %v848_v54  ;;  %v865_v3 = vadd.f32 %v861_v51, %v849_v55  ;;  %v879_v4 = vadd.f32 %v875_v58, %v863_v57  ;;  %v937_v11 = vadd.f32 %v1224_v53, %v926_v52  ;;  %v1225_v54 = vld [vmem:[#allocation14] ss:$0 sm:$0xff] }
 0x245   : > { %v880_v14 = vadd.f32 %v876_v62, %v864_v1  ;;  %v881_v15 = vadd.f32 %v877_v41, %v865_v3  ;;  %v895_v17 = vadd.f32 %v891_v0, %v879_v4  ;;  %v941_v26 = vadd.f32 3.0, %v937_v11 }
 0x247   : > { %v896_v23 = vadd.f32 %v892_v12, %v880_v14  ;;  %v897_v24 = vadd.f32 %v893_v16, %v881_v15  ;;  %v911_v25 = vadd.f32 %v907_v13, %v895_v17  ;;  %v945_v33 = vmax.f32 %v941_v26, 0.0 }
 0x249   : > { %v912_v28 = vadd.f32 %v908_v18, %v896_v23  ;;  %v913_v29 = vadd.f32 %v909_v20, %v897_v24  ;;  %v927_v59 = vadd.f32 %v923_v21, %v911_v25  ;;  %v949_v19 = vmin.f32 %v945_v33, 6.0 }
 0x24b   : > { %v928_v31 = vadd.f32 %v924_v27, %v912_v28  ;;  %v929_v32 = vadd.f32 %v925_v30, %v913_v29  ;;  %v938_v7 = vadd.f32 %v1224_v53, %v927_v59  ;;  %v953_v44 = vmul.f32 %v949_v19, %v937_v11 }
 0x24d   : > { %v939_v34 = vadd.f32 %v1224_v53, %v928_v31  ;;  %v940_v8 = vadd.f32 %v1224_v53, %v929_v32  ;;  %v942_v35 = vadd.f32 3.0, %v938_v7  ;;  %v957_v49 = vmul.f32 0.16666667, %v953_v44 }
 0x24f   : > { %v943_v36 = vadd.f32 3.0, %v939_v34  ;;  %v944_v6 = vadd.f32 3.0, %v940_v8  ;;  %v946_v37 = vmax.f32 %v942_v35, 0.0 }
 0x251   : > { %v947_v38 = vmax.f32 %v943_v36, 0.0  ;;  %v948_v39 = vmax.f32 %v944_v6, 0.0  ;;  %v950_v40 = vmin.f32 %v946_v37, 6.0 }
 0x253   : > { %v951_v42 = vmin.f32 %v947_v38, 6.0  ;;  %v952_v43 = vmin.f32 %v948_v39, 6.0  ;;  %v954_v9 = vmul.f32 %v950_v40, %v938_v7 }
 0x255   : > { %v955_v45 = vmul.f32 %v951_v42, %v939_v34  ;;  %v956_v47 = vmul.f32 %v952_v43, %v940_v8  ;;  %v958_v48 = vmul.f32 0.16666667, %v954_v9 }
 0x257   : > { %v959_v50 = vmul.f32 0.16666667, %v955_v45  ;;  %v960_v22 = vmul.f32 0.16666667, %v956_v47  ;;  %v965_v51 = vcombine.low %v957_v49, %v958_v48 }
 0x259   : > { %v966_v52 = vcombine.low %v959_v50, %v960_v22 }
 0x25b   : > { %v969_v53 = vpack.c.bf16 %v966_v52, %v965_v51 }
 0x25d   : > { %1272 = vmatmul.mubr.msk.bf16.vlgmr.msra.gmra.mrb[8].mxu0 %vm985_vm6, %v969_v53 }
 0x330   : > { %v1023_v55 = vpop.f32.mrb[8].mxu0 }
 0x331   : > { %v1024_v57 = vadd.f32 %v1225_v54, %v1023_v55  ;;  %v1273_v58 = vpop.f32.mrb[9].mxu0 }
 0x332   : > { %v1026_v60 = vpop.f32.mrb[10].mxu0 }
 0x333   : > { %v1032_v61 = vcombine.high %v1024_v57, %v1024_v57  ;;  %v1036_v62 = vpack.c.bf16 %v1024_v57, %v1024_v57  ;;  %v1027_v41 = vadd.f32 %v1225_v54, %v1026_v60  ;;  %v1274_v63 = vpop.f32.mrb[11].mxu0 }
 0x335   : > { %v1037_v0 = vpack.c.bf16 %v1032_v61, %v1032_v61  ;;  %1041 = vst.msk [vmem:[%s375_s9] sm:$0x3] %vm1040_vm7, %v1036_v62  ;;  %v1033_v1 = vcombine.high %v1027_v41, %v1027_v41  ;;  %v1038_v3 = vpack.c.bf16 %v1027_v41, %v1027_v41 }
 0x337   : > { %1042 = vst.msk [vmem:[%s375_s9 + $0x2] sm:$0x3] %vm1040_vm7, %v1037_v0  ;;  %v1039_v4 = vpack.c.bf16 %v1033_v1, %v1033_v1  ;;  %1043 = vst.msk [vmem:[%s375_s9 + $0x4] sm:$0x3] %vm1040_vm7, %v1038_v3 }
 0x339   : > { %1044 = vst.msk [vmem:[%s375_s9 + $0x6] sm:$0x3] %vm1040_vm7, %v1039_v4 }
 0x33a   : > { %1622 = shalt.err (!%p1619_p8)
}
 0x33b   : > { %s1623_s28 = scalar_lea.hbm %s2139_s14, 128  ;;  %s1627_s18 = scalar_lea.hbm %s2193_s7, 256 }
 0x33c   : > { %p1624_p13 = scmp.ne.s32.totalorder %s2139_s14, %s1623_s28  ;;  %p1628_p9 = scmp.lt.u32.totalorder %s2139_s14, %s2193_s7 }
 0x33d   : > { %p1629_p10 = scmp.lt.u32.totalorder %s1627_s18, %s1623_s28  ;;  %p1631_p6 = scmp.lt.u32.totalorder %s1623_s28, %s2139_s14 }
 0x33e   : > { %p1625_p0 = pnand %p1624_p13, %p2215_p12 }
 0x33f   : > { %p1630_p11 = por %p1629_p10, %p1628_p9 }
 0x340   : > { %p1626_p2 = pneg %p1625_p0 }
 0x341   : > { %p1632_p5 = por %p1631_p6, %p1630_p11 }
 0x343   : > { %p1633_p7 = pnand %p1632_p5, %p1626_p2 }
 0x345   : > { %1636 = shalt.err (!%p1633_p7)
}
 0x346   : > { %s1706_s19 = smov 32   ;;  %s1707_s12 = smov 2  }
 0x347   : > { %1301 = dma.vmem_to_hbm [thread:$0]  (%p2215_p12), %s2134_s15, 128, %s2139_s14, %s1046_s30, %s1706_s19, %s1706_s19, %s1707_s12  }
 0x348 PF: > { %s1074_s17 = sand.u32 1, %s1675_s24   ;;  %p2216_p4 = scmp.ne.s32.totalorder %s2206_s1, 0 }
 0x349   : > { %p2217_p1 = scmp.ge.s32.totalorder %s1687_s27, 2  ;;  %s1075_s23 = scalar_lea.sflag [#allocation5], %s1074_s17 }
 0x34b   : > { %p1327_p3 = pnand %p2217_p1, %p2216_p4 }
 0x34d   : > { %1670 = dma.done.wait (!%p1327_p3), %s1075_s23, 128  }
 0x34e   : > { %1672 = vsyncadd (!%p1327_p3), %s1075_s23, 4294967168  ;;  %p23_p8 = scmp.ge.s32.totalorder %s1917_s11, 4   ;;  %s2218_s24 = smov %s1679_s25 }
 0x34f   : > { %s2219_s25 = smov %s1683_s26  ;;  %s2220_s26 = smov %s1928_s10 }
 0x350   : > { %s2221_s27 = smov %s1917_s11  ;;  %25 = sbr.rel (!%p23_p8) target bundleno = 10 (0xa), region = 124 }
 0x357   :  { %1080 = vsyncpa [#allocation4], 1 }
 0x358   :  { %1082 = vsyncpa [#allocation4 + $0x1], 1 }
 0x359   :  { %1083 = vsyncpa [#allocation7], 1 }
 0x35a   :  { %1084 = vsyncpa [#allocation10], 1 }
 0x35b   :  { %1085 = vsyncpa [#allocation13], 1 }
 0x35c   :  { %1086 = vsyncpa [#allocation5], 1 }
 0x35d   :  { %1088 = vsyncpa [#allocation5 + $0x1], 1 }

// kernel: encoder_forward.3
= control target key start
LH: loop header
LB: loop body
LE: loop exit
PB: predicated region body
PF: predicated region fallthrough
CT: control target
= control target key end

     0   :  { %8 = vsyncpa [#allocation4], 0  ;;  %s5261_s0 = inlined_call_operand.hbm [shape: bf16[2,16,16,4], index: 0, kind: input, shape index: {}]   ;;  %s5262_s1 = inlined_call_operand.hbm [shape: bf16[36,4], index: 1, kind: input, shape index: {}]   ;;  %s5263_s2 = inlined_call_operand.hbm [shape: f32[1,4], index: 2, kind: input, shape index: {}]   ;;  %s5264_s3 = inlined_call_operand.hbm [shape: bf16[2,16,16,4], index: 3, kind: output, shape index: {}]  }
   0x1   :  { %10 = vsyncpa [#allocation4 + $0x1], 0 }
   0x2   :  { %11 = vsyncpa [#allocation7], 0 }
   0x3   :  { %12 = vsyncpa [#allocation5], 0 }
   0x4   :  { %14 = vsyncpa [#allocation5 + $0x1], 0  ;;  %s3792_s12 = smov 0   ;;  %s3794_s13 = smov 0  }
   0x5   :  { %s3796_s14 = smov 0   ;;  %s3798_s15 = smov 0  }
   0x6 LB: > { %s3813_s16 = sadd.s32 4294967295, %s3754_s15   ;;  %s2620_s17 = sadd.s32 4294967294, %s3754_s15   ;;  %s3754_s15 = sphi %s3798_s15, %s5356_s15   ;;  %s3750_s14 = sphi %s3796_s14, %s5355_s14   ;;  %s3746_s13 = sphi %s3794_s13, %s5354_s13   ;;  %s3742_s12 = sphi %s3792_s12, %s5353_s12  }
   0x7   : > { %p40_p0 = scmp.ne.s32.totalorder %s3746_s13, %s3742_s12  ;;  %p5265_p1 = scmp.eq.s32.totalorder %s3813_s16, 0 }
   0x8   : > { %p112_p3 = scmp.eq.s32.totalorder %s2620_s17, 1  ;;  %p2621_p5 = scmp.ge.s32.totalorder %s3754_s15, 1 }
   0x9   : > { %p3822_p4 = por %p5265_p1, %p40_p0  ;;  %p119_p7 = scmp.lt.s32.totalorder %s3754_s15, 3 }
   0xa   : > { %p3827_p6 = por %p112_p3, %p40_p0  ;;  %s3756_s21 = smov [#allocation6]  }
   0xb   : > { %s5281_s18 = scalar_select %p3822_p4, 1, 0 }
   0xc   : > { %s5282_s19 = scalar_select %p3827_p6, 1, 0 }
   0xd   : > { %p3832_p8 = pnand %p2621_p5, %p119_p7  ;;  %s131_s22 = sshll.u32 %s3756_s21, 4  ;;  %s3836_s22 = int_to_ptr.vmem [resolvable:$true] %s131_s22 }
   0xe   : > { %s3757_s24 = smov [#allocation8]   ;;  %s3598_s28 = scalar_lea.hbm %s5262_s1, 320 }
   0xf   : > { %p2880_p9 = pneg %p3832_p8  ;;  %s145_s25 = sshll.u32 %s3757_s24, 4  ;;  %s3847_s25 = int_to_ptr.vmem [resolvable:$true] %s145_s25 }
  0x10   : > { %p3599_p12 = scmp.ne.s32.totalorder %s5262_s1, %s3598_s28  ;;  %p3605_p5 = scmp.lt.u32.totalorder %s3598_s28, %s5262_s1 }
  0x11   : > { %p3843_p11 = pnand %p2880_p9, %p5265_p1 }
  0x13   : > { %p3600_p13 = pneg %p3843_p11 }
  0x15   : > { %p3601_p0 = pnand %p3600_p13, %p3599_p12 }
  0x17   : > { %p3602_p3 = pneg %p3601_p0 }
  0x19   : > { %p3607_p7 = pnand %p3605_p5, %p3602_p3 }
  0x1b   : > { %3610 = shalt.err (!%p3607_p7)
}
  0x1c   : > { %s3611_s6 = scalar_lea.vmem %s3836_s22, 320  ;;  %p3619_p2 = scmp.lt.s32.totalorder %s3836_s22, %s3836_s22 }
  0x1d   : > { %p3612_p9 = scmp.ne.s32.totalorder %s3836_s22, %s3611_s6  ;;  %p3620_p12 = scmp.lt.s32.totalorder %s3611_s6, %s3611_s6 }
  0x1f   : > { %p3614_p10 = pnand %p3612_p9, %p3600_p13  ;;  %p3621_p0 = por %p3620_p12, %p3619_p2 }
  0x21   : > { %p3615_p1 = pneg %p3614_p10 }
  0x23   : > { %p3622_p6 = pnand %p3621_p0, %p3615_p1 }
  0x25   : > { %3625 = shalt.err (!%p3622_p6)
}
  0x26   : > { %s3758_s7 = smov 64   ;;  %s3759_s8 = smov 4  }
  0x27   : > { %2883 = dma.hbm_to_vmem [thread:$0]  (!%p3843_p11), %s5262_s1, 320, %s3836_s22, [#allocation7], %s3758_s7, %s3758_s7, %s3759_s8  }
  0x28   : > { %s3626_s21 = scalar_lea.hbm %s5263_s2, 16 }
  0x29   : > { %p3627_p1 = scmp.ne.s32.totalorder %s5263_s2, %s3626_s21  ;;  %p3633_p10 = scmp.lt.u32.totalorder %s3626_s21, %s5263_s2 }
  0x2b   : > { %p3629_p2 = pnand %p3627_p1, %p3600_p13 }
  0x2d   : > { %p3630_p6 = pneg %p3629_p2 }
  0x2f   : > { %p3635_p3 = pnand %p3633_p10, %p3630_p6 }
  0x31   : > { %3638 = shalt.err (!%p3635_p3)
}
  0x32   : > { %s3639_s22 = scalar_lea.vmem %s3847_s25, 16  ;;  %s3646_s29 = scalar_lea.vmem %s3847_s25, 32 }
  0x33   : > { %p3640_p5 = scmp.ne.s32.totalorder %s3847_s25, %s3639_s22  ;;  %p3647_p12 = scmp.lt.s32.totalorder %s3847_s25, %s3847_s25 }
  0x34   : > { %p3648_p0 = scmp.lt.s32.totalorder %s3646_s29, %s3639_s22 }
  0x35   : > { %p3642_p7 = pnand %p3640_p5, %p3600_p13 }
  0x36   : > { %p3649_p1 = por %p3648_p0, %p3647_p12 }
  0x37   : > { %p3643_p9 = pneg %p3642_p7 }
  0x39   : > { %p3650_p2 = pnand %p3649_p1, %p3643_p9 }
  0x3b   : > { %3653 = shalt.err (!%p3650_p2)
}
  0x3c   : > { %2886 = dma.hbm_to_vmem [thread:$0]  (!%p3843_p11), %s5263_s2, 16, %s3847_s25, [#allocation7]  }
  0x3d   : > { %s3906_s5 = sadd.s32 1, %s3754_s15   ;;  %s27_s23 = sadd.s32 1, %s3750_s14 }
  0x3e   : > { %s24_s6 = ssub.s32 %s3754_s15, %s3906_s5  ;;  %p34_p13 = scmp.ne.s32.totalorder %s3750_s14, %s3746_s13 }
  0x3f   : > { %p25_p6 = scmp.eq.s32.totalorder %s24_s6, 0  ;;  %p35_p10 = scmp.eq.s32.totalorder %s3754_s15, 0 }
  0x40   : > { %p5285_p3 = scmp.eq.s32.totalorder %s3813_s16, 1  ;;  %p2897_p7 = scmp.lt.s32.totalorder %s3754_s15, 2 }
  0x41   : > { %s3922_s10 = scalar_select %p25_p6, %s3750_s14, %s27_s23  }
  0x42   : > { %p3916_p5 = por %p5285_p3, %p34_p13  ;;  %p36_p9 = por %p35_p10, %p34_p13 }
  0x43   : > { %s156_s11 = sand.u32 1, %s3750_s14   ;;  %s2690_s25 = sshll.u32 %s3754_s15, 11 }
  0x44   : > { %s5286_s9 = scalar_select %p3916_p5, 1, 0 }
  0x45   : > { %s2625_s17 = sshll.u32 %s156_s11, 7  ;;  %s3929_s26 = scalar_lea.hbm %s5261_s0, %s2690_s25 }
  0x46   : > { %s160_s27 = scalar_lea.vmem [#allocation3], %s2625_s17  ;;  %p3933_p11 = pnand %p2897_p7, %p36_p9 }
  0x47   : > { %s167_s28 = sshll.u32 %s160_s27, 4  ;;  %s3937_s29 = scalar_lea.sflag [#allocation4], %s156_s11  ;;  %s3931_s28 = int_to_ptr.vmem [resolvable:$true] %s167_s28 }
  0x48   : > { %s3654_s30 = scalar_lea.hbm %s3929_s26, 2048  ;;  %p3656_p0 = pneg %p3933_p11 }
  0x49   : > { %p3655_p12 = scmp.ne.s32.totalorder %s3929_s26, %s3654_s30  ;;  %s3659_s6 = scalar_lea.hbm %s5261_s0, 4096 }
  0x4a   : > { %p3660_p13 = scmp.lt.u32.totalorder %s3929_s26, %s5261_s0  ;;  %p3661_p6 = scmp.lt.u32.totalorder %s3659_s6, %s3654_s30 }
  0x4b   : > { %p3657_p1 = pnand %p3656_p0, %p3655_p12  ;;  %p3663_p3 = scmp.lt.u32.totalorder %s3654_s30, %s3929_s26 }
  0x4c   : > { %p3662_p10 = por %p3661_p6, %p3660_p13 }
  0x4d   : > { %p3658_p2 = pneg %p3657_p1 }
  0x4e   : > { %p3664_p7 = por %p3663_p3, %p3662_p10 }
  0x50   : > { %p3665_p9 = pnand %p3664_p7, %p3658_p2 }
  0x52   : > { %3668 = shalt.err (!%p3665_p9)
}
  0x53   : > { %s3669_s11 = scalar_lea.vmem %s3931_s28, 2048  ;;  %s3760_s21 = smov [#allocation3]  }
  0x54   : > { %p3670_p12 = scmp.ne.s32.totalorder %s3931_s28, %s3669_s11  ;;  %s3674_s24 = sshll.u32 %s3760_s21, 4  ;;  %s3675_s24 = int_to_ptr.vmem [resolvable:$false] %s3674_s24 }
  0x55   : > { %s3676_s27 = scalar_lea.vmem %s3675_s24, 4096  ;;  %p3677_p4 = scmp.lt.s32.totalorder %s3931_s28, %s3675_s24 }
  0x56   : > { %p3672_p1 = pnand %p3670_p12, %p3656_p0  ;;  %p3678_p13 = scmp.lt.s32.totalorder %s3676_s27, %s3669_s11 }
  0x58   : > { %p3673_p5 = pneg %p3672_p1  ;;  %p3679_p6 = por %p3678_p13, %p3677_p4 }
  0x5a   : > { %p3680_p10 = pnand %p3679_p6, %p3673_p5 }
  0x5c   : > { %3683 = shalt.err (!%p3680_p10)
}
  0x5d   : > { %2890 = dma.hbm_to_vmem [thread:$0]  (!%p3933_p11), %s3929_s26, 2048, %s3931_s28, %s3937_s29, %s3758_s7, %s3758_s7, %s3759_s8  }
  0x5e   : > { %179 = sbr.rel (%p3832_p8) target bundleno = 757 (0x2f5), region = 32 }
  0x65   : > { %s3971_s30 = sand.u32 1, %s3746_s13   ;;  %p5288_p4 = scmp.ne.s32.totalorder %s5281_s18, 0 }
  0x66   : > { %s2629_s4 = sshll.u32 %s3971_s30, 7  ;;  %s182_s23 = scalar_lea.sflag [#allocation4], %s3971_s30 }
  0x67   : > { %s3977_s22 = scalar_lea.vmem [#allocation3], %s2629_s4 }
  0x68   : > { %3729 = dma.done.wait (%p5288_p4), %s182_s23, 2048  }
  0x69   : > { %3731 = vsyncadd (%p5288_p4), %s182_s23, 4294965248  ;;  %p5289_p5 = scmp.eq.s32.totalorder %s3813_s16, 0 }
  0x6b   : > { %3733 = dma.done.wait (%p5289_p5), [#allocation7], 336   ;;  %p5290_p8 = pmov %p5289_p5 }
  0x6c   : > { %vm217_vm0 = vcmask 31744   ;;  %vm220_vm1 = vcmask 25600   ;;  %vm226_vm2 = vcmask 24576   ;;  %v3761_v0 = vmov 0.0   ;;  %v2788_v1 = vld [vmem:[%s3977_s22 + $0x8] sm:$0xff]   ;;  %v2725_v2 = vld [vmem:[%s3977_s22] sm:$0xff]  }
  0x6d   : > { %3735 = vsyncadd (%p5290_p8), [#allocation7], 4294966960  ;;  %218 = vst.msk [vmem:[#allocation2] sm:$0xff] %vm217_vm0, %v3761_v0  ;;  %v2789_v3 = vld [vmem:[%s3977_s22 + $0x10] sm:$0xff]   ;;  %v2730_v6 = vunpack.c.l.bf16 %v2788_v1  ;;  %v2731_v7 = vunpack.c.h.bf16 %v2788_v1  ;;  %v2726_v8 = vunpack.c.l.bf16 %v2725_v2  ;;  %v2727_v9 = vunpack.c.h.bf16 %v2725_v2  ;;  %v2790_v10 = vld [vmem:[%s3977_s22 + $0x18] sm:$0xff]   ;;  %s3762_s18 = smov 4  }
  0x6e   : > { %219 = vst.msk [vmem:[#allocation2 + $0x8] sm:$0xff] %vm217_vm0, %v3761_v0  ;;  %223 = vst.msk [vmem:[#allocation2 + $0x198] sm:$0xff] %vm217_vm0, %v3761_v0  ;;  %v2734_v12 = vunpack.c.l.bf16 %v2789_v3  ;;  %v2735_v13 = vunpack.c.h.bf16 %v2789_v3  ;;  %v2738_v14 = vunpack.c.l.bf16 %v2790_v10  ;;  %v2791_v15 = vld [vmem:[%s3977_s22 + $0x20] sm:$0xff]   ;;  %v2792_v16 = vld [vmem:[%s3977_s22 + $0x28] sm:$0xff]   ;;  %v2739_v18 = vunpack.c.h.bf16 %v2790_v10  ;;  %s3763_s20 = smov 8   ;;  %s3764_s7 = smov 12  }
  0x6f   : > { %221 = vst.msk [vmem:[#allocation2 + $0x10] sm:$0x3] %vm220_vm1, %v3761_v0  ;;  %225 = vst.msk [vmem:[#allocation2 + $0x1a8] sm:$0x3] %vm220_vm1, %v3761_v0  ;;  %v2793_v17 = vld [vmem:[%s3977_s22 + $0x30] sm:$0xff]   ;;  %v2742_v19 = vunpack.c.l.bf16 %v2791_v15  ;;  %v2743_v20 = vunpack.c.h.bf16 %v2791_v15  ;;  %v2746_v21 = vunpack.c.l.bf16 %v2792_v16  ;;  %v2794_v22 = vld [vmem:[%s3977_s22 + $0x38] sm:$0xff]   ;;  %v2747_v25 = vunpack.c.h.bf16 %v2792_v16 }
  0x70   : > { %224 = vst.msk [vmem:[#allocation2 + $0x1a0] sm:$0xff] %vm217_vm0, %v3761_v0  ;;  %330 = vst.msk [vmem:[#allocation2 + $0x31] sm:$0xff] %vm217_vm0, %v2730_v6  ;;  %v2795_v23 = vld [vmem:[%s3977_s22 + $0x40] sm:$0xff]   ;;  %v2796_v24 = vld [vmem:[%s3977_s22 + $0x48] sm:$0xff]   ;;  %v2750_v26 = vunpack.c.l.bf16 %v2793_v17  ;;  %v2751_v27 = vunpack.c.h.bf16 %v2793_v17  ;;  %v2754_v28 = vunpack.c.l.bf16 %v2794_v22  ;;  %v2755_v32 = vunpack.c.h.bf16 %v2794_v22  ;;  %s3765_s8 = smov 16   ;;  %s3766_s26 = smov 20  }
  0x71   : > { %228 = vst.msk [vmem:[#allocation2 + $0x18] sm:$0x1] %vm226_vm2, %v3761_v0  ;;  %229 = vst.msk [vmem:[#allocation2 + $0x30] sm:$0x1] %vm226_vm2, %v3761_v0  ;;  %v2797_v29 = vld [vmem:[%s3977_s22 + $0x50] sm:$0xff]   ;;  %v2798_v30 = vld [vmem:[%s3977_s22 + $0x58] sm:$0xff]   ;;  %v2758_v33 = vunpack.c.l.bf16 %v2795_v23  ;;  %v2759_v34 = vunpack.c.h.bf16 %v2795_v23  ;;  %v2762_v35 = vunpack.c.l.bf16 %v2796_v24  ;;  %v2763_v38 = vunpack.c.h.bf16 %v2796_v24 }
  0x72   : > { %230 = vst.msk [vmem:[#allocation2 + $0x48] sm:$0x1] %vm226_vm2, %v3761_v0  ;;  %231 = vst.msk [vmem:[#allocation2 + $0x60] sm:$0x1] %vm226_vm2, %v3761_v0  ;;  %v2799_v31 = vld [vmem:[%s3977_s22 + $0x60] sm:$0xff]   ;;  %v2800_v36 = vld [vmem:[%s3977_s22 + $0x68] sm:$0xff]   ;;  %v2766_v39 = vunpack.c.l.bf16 %v2797_v29  ;;  %v2767_v40 = vunpack.c.h.bf16 %v2797_v29  ;;  %v2770_v41 = vunpack.c.l.bf16 %v2798_v30  ;;  %v2771_v43 = vunpack.c.h.bf16 %v2798_v30 }
  0x73   : > { %232 = vst.msk [vmem:[#allocation2 + $0x78] sm:$0x1] %vm226_vm2, %v3761_v0  ;;  %233 = vst.msk [vmem:[#allocation2 + $0x90] sm:$0x1] %vm226_vm2, %v3761_v0  ;;  %v2801_v37 = vld [vmem:[%s3977_s22 + $0x70] sm:$0xff]   ;;  %v2802_v42 = vld [vmem:[%s3977_s22 + $0x78] sm:$0xff]   ;;  %v2774_v44 = vunpack.c.l.bf16 %v2799_v31  ;;  %v2775_v45 = vunpack.c.h.bf16 %v2799_v31  ;;  %v2778_v46 = vunpack.c.l.bf16 %v2800_v36  ;;  %v2779_v47 = vunpack.c.h.bf16 %v2800_v36 }
  0x74   : > { %234 = vst.msk [vmem:[#allocation2 + $0xa8] sm:$0x1] %vm226_vm2, %v3761_v0  ;;  %235 = vst.msk [vmem:[#allocation2 + $0xc0] sm:$0x1] %vm226_vm2, %v3761_v0  ;;  %v2782_v48 = vunpack.c.l.bf16 %v2801_v37  ;;  %v2783_v49 = vunpack.c.h.bf16 %v2801_v37  ;;  %v2786_v50 = vunpack.c.l.bf16 %v2802_v42  ;;  %v2787_v51 = vunpack.c.h.bf16 %v2802_v42  ;;  %s3767_s28 = smov 24   ;;  %s3768_s29 = smov 28  }
  0x75   : > { %236 = vst.msk [vmem:[#allocation2 + $0xd8] sm:$0x1] %vm226_vm2, %v3761_v0  ;;  %237 = vst.msk [vmem:[#allocation2 + $0xf0] sm:$0x1] %vm226_vm2, %v3761_v0  ;;  %v392_v4 = vld [vmem:[#allocation2 + $0x1] sm:$0xff]  ;;  %vm2028_vm3 = vcmask 1041408  }
  0x76   : > { %238 = vst.msk [vmem:[#allocation2 + $0x108] sm:$0x1] %vm226_vm2, %v3761_v0  ;;  %239 = vst.msk [vmem:[#allocation2 + $0x120] sm:$0x1] %vm226_vm2, %v3761_v0  ;;  %v393_v5 = vld [vmem:[#allocation2 + $0x9] sm:$0xff]  ;;  %s3769_s6 = smov 32  }
  0x77   : > { %240 = vst.msk [vmem:[#allocation2 + $0x138] sm:$0x1] %vm226_vm2, %v3761_v0  ;;  %241 = vst.msk [vmem:[#allocation2 + $0x150] sm:$0x1] %vm226_vm2, %v3761_v0  ;;  %v2947_v11 = vpack.i.bf16 %v393_v5, %v392_v4  ;;  %v396_v52 = vld [vmem:[#allocation2 + $0x31] sm:$0xff]  ;;  %vm1705_vm4 = vcmask 64512  }
  0x78   : > { %242 = vst.msk [vmem:[#allocation2 + $0x168] sm:$0x1] %vm226_vm2, %v3761_v0  ;;  %243 = vst.msk [vmem:[#allocation2 + $0x180] sm:$0x1] %vm226_vm2, %v3761_v0  ;;  %vm1738_vm5 = vcmask 97280   ;;  %vm1771_vm6 = vcmask 130048  }
  0x79   : > { %246 = vst.msk [vmem:[#allocation2 + $0x29] sm:$0x1] %vm226_vm2, %v3761_v0  ;;  %247 = vst.msk [vmem:[#allocation2 + $0x41] sm:$0x1] %vm226_vm2, %v3761_v0  ;;  %2948 = vrot.lane.b32.xlu0 %v2947_v11, %s3762_s18  ;;  %vm1804_vm7 = vcmask 162816   ;;  %vm1837_vm8 = vcmask 195584  }
  0x7a   : > { %248 = vst.msk [vmem:[#allocation2 + $0x59] sm:$0x1] %vm226_vm2, %v3761_v0  ;;  %249 = vst.msk [vmem:[#allocation2 + $0x71] sm:$0x1] %vm226_vm2, %v3761_v0  ;;  %vm1870_vm9 = vcmask 228352   ;;  %vm1903_vm10 = vcmask 261120  }
  0x7b   : > { %250 = vst.msk [vmem:[#allocation2 + $0x89] sm:$0x1] %vm226_vm2, %v3761_v0  ;;  %251 = vst.msk [vmem:[#allocation2 + $0xa1] sm:$0x1] %vm226_vm2, %v3761_v0  ;;  %vm1979_vm11 = vcmask 293888   ;;  %vm2481_vm12 = vcmask 27648  }
  0x7c   : > { %252 = vst.msk [vmem:[#allocation2 + $0xb9] sm:$0x1] %vm226_vm2, %v3761_v0  ;;  %253 = vst.msk [vmem:[#allocation2 + $0xd1] sm:$0x1] %vm226_vm2, %v3761_v0  ;;  %s5119_s17 = scalar_lea.vmem [#allocation9], %s2629_s4  ;;  %s2723_s25 = sshll.u32 %s3813_s16, 11 }
  0x7d   : > { %254 = vst.msk [vmem:[#allocation2 + $0xe9] sm:$0x1] %vm226_vm2, %v3761_v0  ;;  %255 = vst.msk [vmem:[#allocation2 + $0x101] sm:$0x1] %vm226_vm2, %v3761_v0  ;;  %s2528_s11 = sshll.u32 %s5119_s17, 4  ;;  %s5208_s24 = scalar_lea.hbm %s5264_s3, %s2723_s25  ;;  %s5212_s11 = int_to_ptr.vmem [resolvable:$true] %s2528_s11 }
  0x7e   : > { %256 = vst.msk [vmem:[#allocation2 + $0x119] sm:$0x1] %vm226_vm2, %v3761_v0  ;;  %257 = vst.msk [vmem:[#allocation2 + $0x131] sm:$0x1] %vm226_vm2, %v3761_v0  ;;  %s2515_s27 = scalar_lea.sflag [#allocation5], %s3971_s30  ;;  %s3684_s4 = scalar_lea.vmem %s5212_s11, 2048 }
  0x7f   : > { %258 = vst.msk [vmem:[#allocation2 + $0x149] sm:$0x1] %vm226_vm2, %v3761_v0  ;;  %259 = vst.msk [vmem:[#allocation2 + $0x161] sm:$0x1] %vm226_vm2, %v3761_v0  ;;  %p3685_p11 = scmp.ne.s32.totalorder %s5212_s11, %s3684_s4  ;;  %p5350_p0 = scmp.ne.s32.totalorder %s5286_s9, 0 }
  0x80   : > { %260 = vst.msk [vmem:[#allocation2 + $0x179] sm:$0x1] %vm226_vm2, %v3761_v0  ;;  %261 = vst.msk [vmem:[#allocation2 + $0x191] sm:$0x1] %vm226_vm2, %v3761_v0  ;;  %s3770_s23 = smov [#allocation9]  }
  0x81   : > { %227 = vst.msk [vmem:[#allocation2] sm:$0x1] %vm226_vm2, %v3761_v0  ;;  %245 = vst.msk [vmem:[#allocation2 + $0x11] sm:$0x1] %vm226_vm2, %v3761_v0  ;;  %p3686_p2 = pnand %p3685_p11, %p5350_p0  ;;  %s3688_s22 = sshll.u32 %s3770_s23, 4  ;;  %s3689_s22 = int_to_ptr.vmem [resolvable:$false] %s3688_s22 }
  0x82   : > { %262 = vst.msk [vmem:[#allocation2 + $0x1a9] sm:$0x1] %vm226_vm2, %v3761_v0  ;;  %244 = vst.msk [vmem:[#allocation2 + $0x198] sm:$0x1] %vm226_vm2, %v3761_v0  ;;  %p3691_p7 = scmp.lt.s32.totalorder %s5212_s11, %s3689_s22 }
  0x83   : > { %331 = vst.msk [vmem:[#allocation2 + $0x39] sm:$0xff] %vm217_vm0, %v2731_v7  ;;  %328 = vst.msk [vmem:[#allocation2 + $0x19] sm:$0xff] %vm217_vm0, %v2726_v8  ;;  %p3687_p3 = pneg %p3686_p2 }
  0x84   : > { %329 = vst.msk [vmem:[#allocation2 + $0x21] sm:$0xff] %vm217_vm0, %v2727_v9  ;;  %332 = vst.msk [vmem:[#allocation2 + $0x49] sm:$0xff] %vm217_vm0, %v2734_v12 }
  0x85   : > { %333 = vst.msk [vmem:[#allocation2 + $0x51] sm:$0xff] %vm217_vm0, %v2735_v13  ;;  %334 = vst.msk [vmem:[#allocation2 + $0x61] sm:$0xff] %vm217_vm0, %v2738_v14 }
  0x86   : > { %335 = vst.msk [vmem:[#allocation2 + $0x69] sm:$0xff] %vm217_vm0, %v2739_v18  ;;  %336 = vst.msk [vmem:[#allocation2 + $0x79] sm:$0xff] %vm217_vm0, %v2742_v19 }
  0x87   : > { %337 = vst.msk [vmem:[#allocation2 + $0x81] sm:$0xff] %vm217_vm0, %v2743_v20  ;;  %338 = vst.msk [vmem:[#allocation2 + $0x91] sm:$0xff] %vm217_vm0, %v2746_v21 }
  0x88   : > { %339 = vst.msk [vmem:[#allocation2 + $0x99] sm:$0xff] %vm217_vm0, %v2747_v25  ;;  %340 = vst.msk [vmem:[#allocation2 + $0xa9] sm:$0xff] %vm217_vm0, %v2750_v26 }
  0x89   : > { %341 = vst.msk [vmem:[#allocation2 + $0xb1] sm:$0xff] %vm217_vm0, %v2751_v27  ;;  %342 = vst.msk [vmem:[#allocation2 + $0xc1] sm:$0xff] %vm217_vm0, %v2754_v28 }
  0x8a   : > { %343 = vst.msk [vmem:[#allocation2 + $0xc9] sm:$0xff] %vm217_vm0, %v2755_v32  ;;  %344 = vst.msk [vmem:[#allocation2 + $0xd9] sm:$0xff] %vm217_vm0, %v2758_v33  ;;  %v397_v53 = vld [vmem:[#allocation2 + $0x39] sm:$0xff]  ;;  %v424_v32 = vld [vmem:[#allocation2 + $0x2] sm:$0xff] }
  0x8b   : > { %345 = vst.msk [vmem:[#allocation2 + $0xe1] sm:$0xff] %vm217_vm0, %v2759_v34  ;;  %346 = vst.msk [vmem:[#allocation2 + $0xf1] sm:$0xff] %vm217_vm0, %v2762_v35  ;;  %v394_v54 = vld [vmem:[#allocation2 + $0x19] sm:$0xff]  ;;  %v4074_v55 = vpack.i.bf16 %v397_v53, %v396_v52  ;;  %v395_v56 = vld [vmem:[#allocation2 + $0x21] sm:$0xff] }
  0x8c   : > { %347 = vst.msk [vmem:[#allocation2 + $0xf9] sm:$0xff] %vm217_vm0, %v2763_v38  ;;  %348 = vst.msk [vmem:[#allocation2 + $0x109] sm:$0xff] %vm217_vm0, %v2766_v39  ;;  %v398_v57 = vld [vmem:[#allocation2 + $0x49] sm:$0xff]  ;;  %v399_v58 = vld [vmem:[#allocation2 + $0x51] sm:$0xff]  ;;  %v4078_v59 = vpack.i.bf16 %v395_v56, %v394_v54 }
  0x8d   : > { %349 = vst.msk [vmem:[#allocation2 + $0x111] sm:$0xff] %vm217_vm0, %v2767_v40  ;;  %350 = vst.msk [vmem:[#allocation2 + $0x121] sm:$0xff] %vm217_vm0, %v2770_v41  ;;  %v400_v60 = vld [vmem:[#allocation2 + $0x61] sm:$0xff]  ;;  %v401_v61 = vld [vmem:[#allocation2 + $0x69] sm:$0xff]  ;;  %2958 = vrot.lane.b32.xlu1 %v4074_v55, %s3762_s18  ;;  %v4082_v62 = vpack.i.bf16 %v399_v58, %v398_v57 }
  0x8e   : > { %351 = vst.msk [vmem:[#allocation2 + $0x129] sm:$0xff] %vm217_vm0, %v2771_v43  ;;  %352 = vst.msk [vmem:[#allocation2 + $0x139] sm:$0xff] %vm217_vm0, %v2774_v44  ;;  %2953 = vrot.lane.b32.xlu0 %v4078_v59, %s3762_s18  ;;  %v4086_v63 = vpack.i.bf16 %v401_v61, %v400_v60  ;;  %v402_v0 = vld [vmem:[#allocation2 + $0x79] sm:$0xff]  ;;  %v403_v1 = vld [vmem:[#allocation2 + $0x81] sm:$0xff] }
  0x8f   : > { %353 = vst.msk [vmem:[#allocation2 + $0x141] sm:$0xff] %vm217_vm0, %v2775_v45  ;;  %354 = vst.msk [vmem:[#allocation2 + $0x151] sm:$0xff] %vm217_vm0, %v2778_v46  ;;  %v404_v2 = vld [vmem:[#allocation2 + $0x91] sm:$0xff]  ;;  %v405_v3 = vld [vmem:[#allocation2 + $0x99] sm:$0xff]  ;;  %v2972_v4 = vpack.i.bf16 %v403_v1, %v402_v0 }
  0x90   : > { %355 = vst.msk [vmem:[#allocation2 + $0x159] sm:$0xff] %vm217_vm0, %v2779_v47  ;;  %356 = vst.msk [vmem:[#allocation2 + $0x169] sm:$0xff] %vm217_vm0, %v2782_v48  ;;  %v2977_v5 = vpack.i.bf16 %v405_v3, %v404_v2  ;;  %v406_v6 = vld [vmem:[#allocation2 + $0xa9] sm:$0xff]  ;;  %v407_v7 = vld [vmem:[#allocation2 + $0xb1] sm:$0xff] }
  0x91   : > { %357 = vst.msk [vmem:[#allocation2 + $0x171] sm:$0xff] %vm217_vm0, %v2783_v49  ;;  %358 = vst.msk [vmem:[#allocation2 + $0x181] sm:$0xff] %vm217_vm0, %v2786_v50  ;;  %2963 = vrot.lane.b32.xlu1 %v4082_v62, %s3762_s18  ;;  %v408_v8 = vld [vmem:[#allocation2 + $0xc1] sm:$0xff]  ;;  %v409_v9 = vld [vmem:[#allocation2 + $0xc9] sm:$0xff]  ;;  %v2982_v10 = vpack.i.bf16 %v407_v7, %v406_v6 }
  0x92   : > { %359 = vst.msk [vmem:[#allocation2 + $0x189] sm:$0xff] %vm217_vm0, %v2787_v51  ;;  %2968 = vrot.lane.b32.xlu0 %v4086_v63, %s3762_s18  ;;  %v2987_v11 = vpack.i.bf16 %v409_v9, %v408_v8  ;;  %v410_v12 = vld [vmem:[#allocation2 + $0xd9] sm:$0xff]  ;;  %v411_v13 = vld [vmem:[#allocation2 + $0xe1] sm:$0xff]  ;;  %v412_v14 = vld [vmem:[#allocation2 + $0xf1] sm:$0xff] }
  0x93   : > { %v413_v15 = vld [vmem:[#allocation2 + $0xf9] sm:$0xff]  ;;  %v4095_v16 = vpack.i.bf16 %v411_v13, %v410_v12  ;;  %v414_v18 = vld [vmem:[#allocation2 + $0x109] sm:$0xff] }
  0x94   : > { %v4098_v17 = vpack.i.bf16 %v413_v15, %v412_v14  ;;  %v415_v19 = vld [vmem:[#allocation2 + $0x111] sm:$0xff]  ;;  %v416_v20 = vld [vmem:[#allocation2 + $0x121] sm:$0xff] }
  0x95   : > { %2973 = vrot.lane.b32.xlu1 %v2972_v4, %s3762_s18  ;;  %v417_v21 = vld [vmem:[#allocation2 + $0x129] sm:$0xff]  ;;  %v4102_v22 = vpack.i.bf16 %v415_v19, %v414_v18  ;;  %v418_v24 = vld [vmem:[#allocation2 + $0x139] sm:$0xff] }
  0x96   : > { %2978 = vrot.lane.b32.xlu0 %v2977_v5, %s3762_s18  ;;  %v4106_v23 = vpack.i.bf16 %v417_v21, %v416_v20  ;;  %v419_v25 = vld [vmem:[#allocation2 + $0x141] sm:$0xff]  ;;  %v420_v26 = vld [vmem:[#allocation2 + $0x151] sm:$0xff] }
  0x97   : > { %v421_v27 = vld [vmem:[#allocation2 + $0x159] sm:$0xff]  ;;  %v4110_v28 = vpack.i.bf16 %v419_v25, %v418_v24  ;;  %v422_v30 = vld [vmem:[#allocation2 + $0x169] sm:$0xff] }
  0x98   : > { %v3017_v29 = vpack.i.bf16 %v421_v27, %v420_v26  ;;  %v423_v31 = vld [vmem:[#allocation2 + $0x171] sm:$0xff]  ;;  %v426_v36 = vld [vmem:[#allocation2 + $0x1a] sm:$0xff]  ;;  %v427_v37 = vld [vmem:[#allocation2 + $0x22] sm:$0xff] }
  0x99   : > { %2983 = vrot.lane.b32.xlu1 %v2982_v10, %s3762_s18  ;;  %v425_v33 = vld [vmem:[#allocation2 + $0xa] sm:$0xff]  ;;  %v3022_v34 = vpack.i.bf16 %v423_v31, %v422_v30  ;;  %v428_v38 = vld [vmem:[#allocation2 + $0x32] sm:$0xff]  ;;  %v429_v39 = vld [vmem:[#allocation2 + $0x3a] sm:$0xff]  ;;  %v4118_v40 = vpack.i.bf16 %v427_v37, %v426_v36 }
  0x9a   : > { %2988 = vrot.lane.b32.xlu0 %v2987_v11, %s3762_s18  ;;  %v3027_v35 = vpack.i.bf16 %v425_v33, %v424_v32  ;;  %v4121_v41 = vpack.i.bf16 %v429_v39, %v428_v38  ;;  %v430_v42 = vld [vmem:[#allocation2 + $0x4a] sm:$0xff]  ;;  %v431_v43 = vld [vmem:[#allocation2 + $0x52] sm:$0xff]  ;;  %v432_v44 = vld [vmem:[#allocation2 + $0x62] sm:$0xff] }
  0x9b   : > { %v433_v45 = vld [vmem:[#allocation2 + $0x6a] sm:$0xff]  ;;  %v4125_v46 = vpack.i.bf16 %v431_v43, %v430_v42  ;;  %v434_v48 = vld [vmem:[#allocation2 + $0x7a] sm:$0xff]  ;;  %v435_v49 = vld [vmem:[#allocation2 + $0x82] sm:$0xff] }
  0x9c   : > { %v4129_v47 = vpack.i.bf16 %v433_v45, %v432_v44  ;;  %v436_v50 = vld [vmem:[#allocation2 + $0x92] sm:$0xff]  ;;  %v437_v51 = vld [vmem:[#allocation2 + $0x9a] sm:$0xff]  ;;  %v4133_v52 = vpack.i.bf16 %v435_v49, %v434_v48  ;;  %v438_v54 = vld [vmem:[#allocation2 + $0xaa] sm:$0xff] }
  0x9d   : > { %2993 = vrot.lane.b32.xlu1 %v4095_v16, %s3762_s18  ;;  %v3057_v53 = vpack.i.bf16 %v437_v51, %v436_v50  ;;  %v439_v56 = vld [vmem:[#allocation2 + $0xb2] sm:$0xff]  ;;  %v440_v57 = vld [vmem:[#allocation2 + $0xc2] sm:$0xff]  ;;  %v441_v58 = vld [vmem:[#allocation2 + $0xca] sm:$0xff] }
  0x9e   : > { %2998 = vrot.lane.b32.xlu0 %v4098_v17, %s3762_s18  ;;  %v3062_v60 = vpack.i.bf16 %v439_v56, %v438_v54  ;;  %v3067_v61 = vpack.i.bf16 %v441_v58, %v440_v57  ;;  %v442_v0 = vld [vmem:[#allocation2 + $0xda] sm:$0xff]  ;;  %v443_v1 = vld [vmem:[#allocation2 + $0xe2] sm:$0xff]  ;;  %v444_v2 = vld [vmem:[#allocation2 + $0xf2] sm:$0xff] }
  0x9f   : > { %v445_v3 = vld [vmem:[#allocation2 + $0xfa] sm:$0xff]  ;;  %v4141_v4 = vpack.i.bf16 %v443_v1, %v442_v0  ;;  %v446_v6 = vld [vmem:[#allocation2 + $0x10a] sm:$0xff]  ;;  %v447_v7 = vld [vmem:[#allocation2 + $0x112] sm:$0xff] }
  0xa0   : > { %v4144_v5 = vpack.i.bf16 %v445_v3, %v444_v2  ;;  %v448_v8 = vld [vmem:[#allocation2 + $0x122] sm:$0xff]  ;;  %v449_v9 = vld [vmem:[#allocation2 + $0x12a] sm:$0xff]  ;;  %v4148_v10 = vpack.i.bf16 %v447_v7, %v446_v6  ;;  %v450_v12 = vld [vmem:[#allocation2 + $0x13a] sm:$0xff] }
  0xa1   : > { %3003 = vrot.lane.b32.xlu1 %v4102_v22, %s3762_s18  ;;  %v4152_v11 = vpack.i.bf16 %v449_v9, %v448_v8  ;;  %v451_v13 = vld [vmem:[#allocation2 + $0x142] sm:$0xff]  ;;  %v452_v14 = vld [vmem:[#allocation2 + $0x152] sm:$0xff]  ;;  %v453_v15 = vld [vmem:[#allocation2 + $0x15a] sm:$0xff] }
  0xa2   : > { %3008 = vrot.lane.b32.xlu0 %v4106_v23, %s3762_s18  ;;  %v4156_v18 = vpack.i.bf16 %v451_v13, %v450_v12  ;;  %v4160_v19 = vpack.i.bf16 %v453_v15, %v452_v14  ;;  %v454_v20 = vld [vmem:[#allocation2 + $0x16a] sm:$0xff]  ;;  %v455_v21 = vld [vmem:[#allocation2 + $0x172] sm:$0xff]  ;;  %v4164_v25 = vld [vmem:[#allocation2 + $0x20] sm:$0xff] }
  0xa3   : > { %v4162_v24 = vld [vmem:[#allocation2 + $0x18] sm:$0xff]  ;;  %v3102_v26 = vpack.i.bf16 %v455_v21, %v454_v20  ;;  %v460_v31 = vld [vmem:[#allocation2 + $0x48] sm:$0xff]  ;;  %v461_v32 = vld [vmem:[#allocation2 + $0x50] sm:$0xff] }
  0xa4   : > { %v3107_v27 = vpack.i.bf16 %v4164_v25, %v4162_v24  ;;  %v459_v30 = vld [vmem:[#allocation2 + $0x38] sm:$0xff]  ;;  %v4180_v36 = vld [vmem:[#allocation2 + $0x68] sm:$0xff]  ;;  %v4184_v38 = vld [vmem:[#allocation2 + $0x80] sm:$0xff] }
  0xa5   : > { %3013 = vrot.lane.b32.xlu1 %v4110_v28, %s3762_s18  ;;  %v4182_v37 = vld [vmem:[#allocation2 + $0x78] sm:$0xff]  ;;  %v4198_v43 = vld [vmem:[#allocation2 + $0x90] sm:$0xff]  ;;  %v4202_v45 = vld [vmem:[#allocation2 + $0xa8] sm:$0xff] }
  0xa6   : > { %3018 = vrot.lane.b32.xlu0 %v3017_v29, %s3762_s18  ;;  %v458_v29 = vld [vmem:[#allocation2 + $0x30] sm:$0xff]  ;;  %v4196_v42 = vpack.i.bf16 %v4184_v38, %v4182_v37  ;;  %v4200_v44 = vld [vmem:[#allocation2 + $0x98] sm:$0xff]  ;;  %v4218_v51 = vld [vmem:[#allocation2 + $0xc0] sm:$0xff] }
  0xa7   : > { %v4173_v33 = vpack.i.bf16 %v459_v30, %v458_v29  ;;  %v4204_v48 = vld [vmem:[#allocation2 + $0xb0] sm:$0xff]  ;;  %v4210_v49 = vpack.i.bf16 %v4200_v44, %v4198_v43  ;;  %5291 = vst [vmem:[#allocation13_spill] sm:$0xff] %v4218_v51  ;;  %v4222_v54 = vld [vmem:[#allocation2 + $0xd8] sm:$0xff]  ;;  %v4224_v56 = vld [vmem:[#allocation2 + $0xe0] sm:$0xff] }
  0xa8   : > { %v4216_v50 = vpack.i.bf16 %v4204_v48, %v4202_v45  ;;  %5293 = vst [vmem:[#allocation15_spill] sm:$0xff] %v4222_v54  ;;  %5294 = vst [vmem:[#allocation16_spill] sm:$0xff] %v4224_v56  ;;  %v3147_v58 = vpack.i.bf16 %v4224_v56, %v4222_v54  ;;  %v476_v0 = vld [vmem:[#allocation2 + $0x108] sm:$0xff]  ;;  %v477_v1 = vld [vmem:[#allocation2 + $0x110] sm:$0xff] }
  0xa9   : > { %3023 = vrot.lane.b32.xlu1 %v3022_v34, %s3762_s18  ;;  %v4176_v34 = vpack.i.bf16 %v461_v32, %v460_v31  ;;  %v3157_v3 = vpack.i.bf16 %v477_v1, %v476_v0  ;;  %v4236_v6 = vld [vmem:[#allocation2 + $0x120] sm:$0xff]  ;;  %v4238_v7 = vld [vmem:[#allocation2 + $0x128] sm:$0xff]  ;;  %v4240_v8 = vld [vmem:[#allocation2 + $0x138] sm:$0xff] }
  0xaa   : > { %3028 = vrot.lane.b32.xlu0 %v3027_v35, %s3763_s20  ;;  %v4178_v35 = vld [vmem:[#allocation2 + $0x60] sm:$0xff]  ;;  %v4247_v12 = vpack.i.bf16 %v4238_v7, %v4236_v6  ;;  %v4254_v14 = vld [vmem:[#allocation2 + $0x150] sm:$0xff]  ;;  %v4256_v15 = vld [vmem:[#allocation2 + $0x158] sm:$0xff] }
  0xab   : > { %v4190_v39 = vpack.i.bf16 %v4180_v36, %v4178_v35  ;;  %v4242_v9 = vld [vmem:[#allocation2 + $0x140] sm:$0xff]  ;;  %v4258_v20 = vld [vmem:[#allocation2 + $0x168] sm:$0xff]  ;;  %v4260_v21 = vld [vmem:[#allocation2 + $0x170] sm:$0xff] }
  0xac   : > { %v4252_v13 = vpack.i.bf16 %v4242_v9, %v4240_v8  ;;  %v486_v29 = vld [vmem:[#allocation2 + $0x180] sm:$0xff]  ;;  %v487_v30 = vld [vmem:[#allocation2 + $0x188] sm:$0xff] }
  0xad   : > { %3033 = vrot.lane.b32.xlu1 %v4118_v40, %s3763_s20  ;;  %v3182_v31 = vpack.i.bf16 %v487_v30, %v486_v29  ;;  %v589_v30 = vld [vmem:[#allocation2 + $0x61] sm:$0xff] }
  0xae   : > { %3038 = vrot.lane.b32.xlu0 %v4121_v41, %s3763_s20 }
  0xb1   : > { %3043 = vrot.lane.b32.xlu1 %v4125_v46, %s3763_s20 }
  0xb2   : > { %3048 = vrot.lane.b32.xlu0 %v4129_v47, %s3763_s20 }
  0xb5   : > { %3053 = vrot.lane.b32.xlu1 %v4133_v52, %s3763_s20 }
  0xb6   : > { %3058 = vrot.lane.b32.xlu0 %v3057_v53, %s3763_s20  ;;  %v4220_v53 = vld [vmem:[#allocation2 + $0xc8] sm:$0xff] }
  0xb7   : > { %5292 = vst [vmem:[#allocation14_spill] sm:$0xff] %v4220_v53  ;;  %v3142_v57 = vpack.i.bf16 %v4220_v53, %v4218_v51 }
  0xb9   : > { %3063 = vrot.lane.b32.xlu1 %v3062_v60, %s3763_s20  ;;  %v474_v60 = vld [vmem:[#allocation2 + $0xf0] sm:$0xff] }
  0xba   : > { %3068 = vrot.lane.b32.xlu0 %v3067_v61, %s3763_s20  ;;  %v475_v61 = vld [vmem:[#allocation2 + $0xf8] sm:$0xff] }
  0xbb   : > { %v3152_v2 = vpack.i.bf16 %v475_v61, %v474_v60 }
  0xbd   : > { %3073 = vrot.lane.b32.xlu1 %v4141_v4, %s3763_s20 }
  0xbe   : > { %3078 = vrot.lane.b32.xlu0 %v4144_v5, %s3763_s20 }
  0xc1   : > { %3083 = vrot.lane.b32.xlu1 %v4148_v10, %s3763_s20 }
  0xc2   : > { %3088 = vrot.lane.b32.xlu0 %v4152_v11, %s3763_s20 }
  0xc5   : > { %3093 = vrot.lane.b32.xlu1 %v4156_v18, %s3763_s20 }
  0xc6   : > { %3098 = vrot.lane.b32.xlu0 %v4160_v19, %s3763_s20 }
  0xc9   : > { %3103 = vrot.lane.b32.xlu1 %v3102_v26, %s3763_s20  ;;  %v4266_v26 = vpack.i.bf16 %v4256_v15, %v4254_v14  ;;  %s3690_s20 = scalar_lea.vmem %s3689_s22, 4096 }
  0xca   : > { %3108 = vrot.lane.b32.xlu0 %v3107_v27, %s3764_s7  ;;  %v4272_v27 = vpack.i.bf16 %v4260_v21, %v4258_v20  ;;  %p3692_p9 = scmp.lt.s32.totalorder %s3690_s20, %s3684_s4 }
  0xcc   : > { %p3693_p12 = por %p3692_p9, %p3691_p7 }
  0xcd   : > { %3113 = vrot.lane.b32.xlu1 %v4173_v33, %s3764_s7 }
  0xce   : > { %3118 = vrot.lane.b32.xlu0 %v4176_v34, %s3764_s7  ;;  %p3694_p1 = pnand %p3693_p12, %p3687_p3 }
  0xd1   : > { %3123 = vrot.lane.b32.xlu1 %v4190_v39, %s3764_s7 }
  0xd2   : > { %3128 = vrot.lane.b32.xlu0 %v4196_v42, %s3764_s7 }
  0xd5   : > { %3133 = vrot.lane.b32.xlu1 %v4210_v49, %s3764_s7 }
  0xd6   : > { %3138 = vrot.lane.b32.xlu0 %v4216_v50, %s3764_s7 }
  0xd9   : > { %3143 = vrot.lane.b32.xlu1 %v3142_v57, %s3764_s7 }
  0xda   : > { %3148 = vrot.lane.b32.xlu0 %v3147_v58, %s3764_s7 }
  0xdd   : > { %3153 = vrot.lane.b32.xlu1 %v3152_v2, %s3764_s7 }
  0xde   : > { %3158 = vrot.lane.b32.xlu0 %v3157_v3, %s3764_s7 }
  0xe1   : > { %3163 = vrot.lane.b32.xlu1 %v4247_v12, %s3764_s7 }
  0xe2   : > { %3168 = vrot.lane.b32.xlu0 %v4252_v13, %s3764_s7 }
  0xe5   : > { %3173 = vrot.lane.b32.xlu1 %v4266_v26, %s3764_s7 }
  0xe6   : > { %3178 = vrot.lane.b32.xlu0 %v4272_v27, %s3764_s7 }
  0xe9   : > { %3183 = vrot.lane.b32.xlu1 %v3182_v31, %s3764_s7  ;;  %v590_v31 = vld [vmem:[#allocation2 + $0x69] sm:$0xff] }
  0xea   : > { %3188 = vrot.lane.b32.xlu0 %v4078_v59, %s3765_s8  ;;  %v3587_v59 = vld [vmem:[#allocation6] sm:$0xff]  }
  0xeb   : > { %2822 = vmatprep.subr.bf16.mxu0 %v3587_v59  ;;  %2860 = vmatprep.subr.bf16.mxu1 %v3587_v59 }
  0xec   : > { %2823 = vmatpush3.bf16.msra.mxu0 %v3587_v59  ;;  %2863 = vmatpush3.bf16.msra.mxu1 %v3587_v59 }
  0xed   : > { %3193 = vrot.lane.b32.xlu1 %v4095_v16, %s3765_s8  ;;  %v4297_v16 = vpop.permute.xlu0 %2948 }
  0xee   : > { %3198 = vrot.lane.b32.xlu0 %v4074_v55, %s3765_s8 }
  0xf1   : > { %3203 = vrot.lane.b32.xlu1 %v4098_v17, %s3765_s8 }
  0xf2   : > { %3208 = vrot.lane.b32.xlu0 %v4118_v40, %s3766_s26  ;;  %v3588_v40 = vld [vmem:[#allocation6 + $0x8] sm:$0xff]  }
  0xf3   : > { %2824 = vmatprep.subr.bf16.mxu0 %v3588_v40  ;;  %2861 = vmatprep.subr.bf16.mxu1 %v3588_v40 }
  0xf4   : > { %2825 = vmatpush3.bf16.msra.mxu0 %v3588_v40  ;;  %2864 = vmatpush3.bf16.msra.mxu1 %v3588_v40 }
  0xf5   : > { %3213 = vrot.lane.b32.xlu1 %v4141_v4, %s3766_s26 }
  0xf6   : > { %3218 = vrot.lane.b32.xlu0 %v4121_v41, %s3766_s26 }
  0xf9   : > { %3223 = vrot.lane.b32.xlu1 %v4144_v5, %s3766_s26 }
  0xfa   : > { %3228 = vrot.lane.b32.xlu0 %v4173_v33, %s3767_s28  ;;  %v3589_v33 = vld [vmem:[#allocation6 + $0x10] ss:$0 sps:$4 sm:$0x33]  }
  0xfb   : > { %2866 = vmatprep.subr.msk.bf16.mxu0 %vm2028_vm3, %v3589_v33  ;;  %v2030_v57 = vsel %vm2028_vm3, %v3589_v33, 0  ;;  %2867 = vmatprep.subr.msk.bf16.mxu1 %vm2028_vm3, %v3589_v33  ;;  %v591_v33 = vld [vmem:[#allocation2 + $0x79] sm:$0xff] }
  0xfc   : > { %2827 = vmatpush3.bf16.msra.mxu0 %v2030_v57  ;;  %2865 = vmatpush3.bf16.msra.mxu1 %v2030_v57  ;;  %v592_v57 = vld [vmem:[#allocation2 + $0x81] sm:$0xff] }
  0xfd   : > { %3233 = vrot.lane.b32.xlu1 %v3152_v2, %s3767_s28 }
  0xfe   : > { %3238 = vrot.lane.b32.xlu0 %v4176_v34, %s3767_s28 }
  0xff   : > { %v4302_v4 = vpop.permute.xlu1 %2958 }
 0x100   : > { %5295 = vst [vmem:[#allocation17_spill] sm:$0xff] %v4302_v4  ;;  %v4304_v32 = vpop.permute.xlu0 %2953 }
 0x101   : > { %3243 = vrot.lane.b32.xlu1 %v3157_v3, %s3767_s28 }
 0x102   : > { %3248 = vrot.lane.b32.xlu0 %v4074_v55, %s3768_s29 }
 0x103   : > { %v4309_v58 = vpop.permute.xlu1 %2963 }
 0x104   : > { %5296 = vst [vmem:[#allocation18_spill] sm:$0xff] %v4309_v58  ;;  %v4311_v34 = vpop.permute.xlu0 %2968 }
 0x105   : > { %3253 = vrot.lane.b32.xlu1 %v4098_v17, %s3768_s29 }
 0x106   : > { %3258 = vrot.lane.b32.xlu0 %v4082_v62, %s3768_s29 }
 0x107   : > { %v4317_v60 = vpop.permute.xlu1 %2973 }
 0x108   : > { %v4319_v61 = vpop.permute.xlu0 %2978 }
 0x109   : > { %3263 = vrot.lane.b32.xlu1 %v4102_v22, %s3768_s29 }
 0x10a   : > { %3268 = vrot.lane.b32.xlu0 %v4121_v41, %s3769_s6 }
 0x10b   : > { %v4325_v55 = vpop.permute.xlu1 %2983 }
 0x10c   : > { %v4327_v0 = vpop.permute.xlu0 %2988 }
 0x10d   : > { %3273 = vrot.lane.b32.xlu1 %v4144_v5, %s3769_s6 }
 0x10e   : > { %3278 = vrot.lane.b32.xlu0 %v4125_v46, %s3769_s6 }
 0x10f   : > { %v4333_v17 = vpop.permute.xlu1 %2993 }
 0x110   : > { %v4335_v1 = vpop.permute.xlu0 %2998 }
 0x111   : > { %5297 = vst [vmem:[#allocation19_spill] sm:$0xff] %v4335_v1  ;;  %3283 = vrot.lane.b32.xlu1 %v4148_v10, %s3769_s6 }
 0x112   : > { %3288 = vrot.lane.b32.xlu0 %v4082_v62, %s3765_s8 }
 0x113   : > { %v4341_v41 = vpop.permute.xlu1 %3003 }
 0x114   : > { %5298 = vst [vmem:[#allocation20_spill] sm:$0xff] %v4341_v41  ;;  %v4343_v2 = vpop.permute.xlu0 %3008 }
 0x115   : > { %3293 = vrot.lane.b32.xlu1 %v4102_v22, %s3765_s8 }
 0x116   : > { %3298 = vrot.lane.b32.xlu0 %v4086_v63, %s3765_s8 }
 0x117   : > { %v4349_v5 = vpop.permute.xlu1 %3013 }
 0x118   : > { %v3019_v3 = vpop.permute.xlu0 %3018 }
 0x119   : > { %3303 = vrot.lane.b32.xlu1 %v4106_v23, %s3765_s8 }
 0x11a   : > { %3308 = vrot.lane.b32.xlu0 %v4125_v46, %s3766_s26 }
 0x11b   : > { %v4355_v62 = vpop.permute.xlu1 %3023 }
 0x11c   : > { %v4357_v29 = vpop.permute.xlu0 %3028  ;;  %v3025_v58 = vunpack.i.l.bf16 %v4355_v62 }
 0x11d   : > { %3313 = vrot.lane.b32.xlu1 %v4148_v10, %s3766_s26  ;;  %v3347_v10 = vpack.i.bf16 %v590_v31, %v589_v30  ;;  %v513_v31 = vld [vmem:[#allocation2 + $0x141] sm:$0xff] }
 0x11e   : > { %3318 = vrot.lane.b32.xlu0 %v4129_v47, %s3766_s26 }
 0x11f   : > { %v4363_v63 = vpop.permute.xlu1 %3033 }
 0x120   : > { %v4365_v22 = vpop.permute.xlu0 %3038 }
 0x121   : > { %5299 = vst [vmem:[#allocation21_spill] sm:$0xff] %v4365_v22  ;;  %3323 = vrot.lane.b32.xlu1 %v4152_v11, %s3766_s26 }
 0x122   : > { %3328 = vrot.lane.b32.xlu0 %v4190_v39, %s3767_s28  ;;  %v3357_v39 = vpack.i.bf16 %v592_v57, %v591_v33  ;;  %v3020_v33 = vunpack.i.l.bf16 %v3019_v3 }
 0x123   : > { %v4371_v46 = vpop.permute.xlu1 %3043 }
 0x124   : > { %5300 = vst [vmem:[#allocation22_spill] sm:$0xff] %v4371_v46  ;;  %v4373_v59 = vpop.permute.xlu0 %3048 }
 0x125   : > { %3333 = vrot.lane.b32.xlu1 %v4247_v12, %s3767_s28 }
 0x126   : > { %3338 = vrot.lane.b32.xlu0 %v4196_v42, %s3767_s28 }
 0x127   : > { %v4379_v40 = vpop.permute.xlu1 %3053 }
 0x128   : > { %v4381_v22 = vpop.permute.xlu0 %3058 }
 0x129   : > { %3343 = vrot.lane.b32.xlu1 %v4252_v13, %s3767_s28 }
 0x12a   : > { %3348 = vrot.lane.b32.xlu0 %v3347_v10, %s3768_s29  ;;  %v3021_v10 = vunpack.i.h.bf16 %v3019_v3  ;;  %v1701_v3 = vsel %vm217_vm0, %v4254_v14, %v3020_v33  ;;  %v2975_v33 = vunpack.i.l.bf16 %v4317_v60 }
 0x12b   : > { %v4386_v46 = vpop.permute.xlu1 %3063 }
 0x12c   : > { %v4388_v41 = vpop.permute.xlu0 %3068 }
 0x12d   : > { %3353 = vrot.lane.b32.xlu1 %v4106_v23, %s3768_s29  ;;  %v512_v23 = vld [vmem:[#allocation2 + $0x139] sm:$0xff] }
 0x12e   : > { %3358 = vrot.lane.b32.xlu0 %v3357_v39, %s3768_s29 }
 0x12f   : > { %v4393_v42 = vpop.permute.xlu1 %3073 }
 0x130   : > { %5301 = vst [vmem:[#allocation23_spill] sm:$0xff] %v4393_v42  ;;  %v4395_v12 = vpop.permute.xlu0 %3078 }
 0x131   : > { %5302 = vst [vmem:[#allocation24_spill] sm:$0xff] %v4395_v12  ;;  %3363 = vrot.lane.b32.xlu1 %v4110_v28, %s3768_s29  ;;  %v498_v28 = vld [vmem:[#allocation2 + $0x91] sm:$0xff]  ;;  %v499_v12 = vld [vmem:[#allocation2 + $0x99] sm:$0xff] }
 0x132   : > { %3368 = vrot.lane.b32.xlu0 %v4129_v47, %s3769_s6  ;;  %v3392_v47 = vpack.i.bf16 %v513_v31, %v512_v23  ;;  %v4420_v54 = vpack.i.bf16 %v499_v12, %v498_v28  ;;  %v514_v23 = vld [vmem:[#allocation2 + $0x151] sm:$0xff]  ;;  %v515_v31 = vld [vmem:[#allocation2 + $0x159] sm:$0xff]  ;;  %v2980_v28 = vunpack.i.l.bf16 %v4319_v61 }
 0x133   : > { %v4401_v13 = vpop.permute.xlu1 %3083  ;;  %v4435_v12 = vpack.i.bf16 %v515_v31, %v514_v23  ;;  %v3056_v31 = vunpack.i.h.bf16 %v4379_v40 }
 0x134   : > { %5303 = vst [vmem:[#allocation25_spill] sm:$0xff] %v4401_v13  ;;  %v4403_v30 = vpop.permute.xlu0 %3088  ;;  %v3026_v13 = vunpack.i.h.bf16 %v4355_v62 }
 0x135   : > { %3373 = vrot.lane.b32.xlu1 %v4152_v11, %s3769_s6  ;;  %v1702_v11 = vsel %vm217_vm0, %v4256_v15, %v3021_v10  ;;  %v2976_v10 = vunpack.i.h.bf16 %v4317_v60 }
 0x136   : > { %3378 = vrot.lane.b32.xlu0 %v4133_v52, %s3769_s6  ;;  %v1704_v14 = vsel %vm217_vm0, %v4260_v21, %v3026_v13  ;;  %v2970_v21 = vunpack.i.l.bf16 %v4311_v34 }
 0x137   : > { %v4409_v57 = vpop.permute.xlu1 %3093  ;;  %v1684_v23 = vsel %vm217_vm0, %v4184_v38, %v2976_v10 }
 0x138   : > { %v3099_v1 = vpop.permute.xlu0 %3098  ;;  %v1717_v10 = vsel %vm1705_vm4, %v1684_v23, %v3056_v31 }
 0x139   : > { %v3101_v4 = vunpack.i.h.bf16 %v3099_v1  ;;  %v3100_v42 = vunpack.i.l.bf16 %v3099_v1  ;;  %3383 = vrot.lane.b32.xlu1 %v4156_v18, %s3769_s6 }
 0x13a   : > { %3388 = vrot.lane.b32.xlu0 %v3357_v39, %s3765_s8  ;;  %v1703_v39 = vsel %vm217_vm0, %v4258_v20, %v3025_v58  ;;  %v530_v20 = vld [vmem:[#allocation2 + $0x92] sm:$0xff]  ;;  %v531_v58 = vld [vmem:[#allocation2 + $0x9a] sm:$0xff] }
 0x13b   : > { %v4423_v62 = vsel %vm1705_vm4, %v1701_v3, %v3100_v42  ;;  %v4426_v1 = vsel %vm1705_vm4, %v1702_v11, %v3101_v4  ;;  %v3104_v56 = vpop.permute.xlu1 %3103  ;;  %v4461_v11 = vpack.i.bf16 %v531_v58, %v530_v20  ;;  %v1681_v3 = vsel %vm217_vm0, %v4178_v35, %v2970_v21 }
 0x13c   : > { %v3106_v51 = vunpack.i.h.bf16 %v3104_v56  ;;  %v3105_v53 = vunpack.i.l.bf16 %v3104_v56  ;;  %v4428_v15 = vpop.permute.xlu0 %3108  ;;  %v2971_v56 = vunpack.i.h.bf16 %v4311_v34  ;;  %v3050_v34 = vunpack.i.l.bf16 %v4373_v59 }
 0x13d   : > { %3393 = vrot.lane.b32.xlu1 %v3392_v47, %s3765_s8  ;;  %v3051_v47 = vunpack.i.h.bf16 %v4373_v59  ;;  %v1683_v59 = vsel %vm217_vm0, %v4182_v37, %v2975_v33  ;;  %v1685_v35 = vsel %vm217_vm0, %v4198_v43, %v2980_v28  ;;  %v3061_v21 = vunpack.i.h.bf16 %v4381_v22 }
 0x13e   : > { %v4438_v42 = vsel %vm1705_vm4, %v1704_v14, %v3106_v51  ;;  %v4441_v4 = vsel %vm1705_vm4, %v1703_v39, %v3105_v53  ;;  %3398 = vrot.lane.b32.xlu0 %v4420_v54, %s3765_s8  ;;  %v2981_v53 = vunpack.i.h.bf16 %v4319_v61  ;;  %v1682_v60 = vsel %vm217_vm0, %v4180_v36, %v2971_v56 }
 0x13f   : > { %v4447_v13 = vpop.permute.xlu1 %3113  ;;  %v1714_v38 = vsel %vm1705_vm4, %v1681_v3, %v3050_v34  ;;  %v1715_v37 = vsel %vm1705_vm4, %v1682_v60, %v3051_v47  ;;  %v2985_v43 = vunpack.i.l.bf16 %v4325_v55  ;;  %v3066_v47 = vunpack.i.h.bf16 %v4386_v46 }
 0x140   : > { %v4451_v51 = vpop.permute.xlu0 %3118  ;;  %v1686_v36 = vsel %vm217_vm0, %v4200_v44, %v2981_v53  ;;  %v2986_v44 = vunpack.i.h.bf16 %v4325_v55  ;;  %v3065_v34 = vunpack.i.l.bf16 %v4386_v46 }
 0x141   : > { %3403 = vrot.lane.b32.xlu1 %v4435_v12, %s3765_s8 }
 0x142   : > { %3408 = vrot.lane.b32.xlu0 %v4133_v52, %s3766_s26  ;;  %v3055_v52 = vunpack.i.l.bf16 %v4379_v40  ;;  %v3060_v40 = vunpack.i.l.bf16 %v4381_v22 }
 0x143   : > { %v4467_v61 = vpop.permute.xlu1 %3123 }
 0x144   : > { %v3129_v14 = vpop.permute.xlu0 %3128  ;;  %v1716_v33 = vsel %vm1705_vm4, %v1683_v59, %v3055_v52  ;;  %v1718_v3 = vsel %vm1705_vm4, %v1685_v35, %v3060_v40  ;;  %v1688_v52 = vsel %vm217_vm0, %v4204_v48, %v2986_v44  ;;  %v595_v48 = vld [vmem:[#allocation2 + $0xa9] sm:$0xff]  ;;  %v596_v40 = vld [vmem:[#allocation2 + $0xb1] sm:$0xff]  ;;  %v3011_v44 = vunpack.i.h.bf16 %v4343_v2 }
 0x145   : > { %v3131_v39 = vunpack.i.h.bf16 %v3129_v14  ;;  %v3130_v56 = vunpack.i.l.bf16 %v3129_v14  ;;  %3413 = vrot.lane.b32.xlu1 %v4156_v18, %s3766_s26  ;;  %v1719_v14 = vsel %vm1705_vm4, %v1686_v36, %v3061_v21  ;;  %v1687_v36 = vsel %vm217_vm0, %v4202_v45, %v2985_v43 }
 0x146   : > { %3418 = vrot.lane.b32.xlu0 %v4461_v11, %s3766_s26  ;;  %v3010_v43 = vunpack.i.l.bf16 %v4343_v2  ;;  %v1698_v2 = vsel %vm217_vm0, %v4238_v7, %v3011_v44 }
 0x147   : > { %v4490_v20 = vsel %vm1738_vm5, %v1714_v38, %v3130_v56  ;;  %v4493_v18 = vsel %vm1738_vm5, %v1715_v37, %v3131_v39  ;;  %v3134_v58 = vpop.permute.xlu1 %3133  ;;  %v1721_v38 = vsel %vm1705_vm4, %v1688_v52, %v3066_v47 }
 0x148   : > { %v3136_v53 = vunpack.i.h.bf16 %v3134_v58  ;;  %v3135_v22 = vunpack.i.l.bf16 %v3134_v58  ;;  %v3139_v28 = vpop.permute.xlu0 %3138  ;;  %v1697_v47 = vsel %vm217_vm0, %v4236_v6, %v3010_v43 }
 0x149   : > { %v3141_v60 = vunpack.i.h.bf16 %v3139_v28  ;;  %v3140_v55 = vunpack.i.l.bf16 %v3139_v28  ;;  %3423 = vrot.lane.b32.xlu1 %v4160_v19, %s3766_s26 }
 0x14a   : > { %v4504_v23 = vsel %vm1738_vm5, %v1717_v10, %v3136_v53  ;;  %v4507_v59 = vsel %vm1738_vm5, %v1716_v33, %v3135_v22  ;;  %3428 = vrot.lane.b32.xlu0 %v4210_v49, %s3767_s28  ;;  %v1720_v49 = vsel %vm1705_vm4, %v1687_v36, %v3065_v34  ;;  %v612_v10 = vld [vmem:[#allocation2 + $0x171] sm:$0xff]  ;;  %v3091_v33 = vunpack.i.h.bf16 %v4403_v30 }
 0x14b   : > { %5304 = vst [vmem:[#allocation26_spill] sm:$0xff] %v4504_v23  ;;  %5305 = vst [vmem:[#allocation27_spill] sm:$0xff] %v4507_v59  ;;  %v4512_v46 = vsel %vm1738_vm5, %v1718_v3, %v3140_v55  ;;  %v4515_v31 = vsel %vm1738_vm5, %v1719_v14, %v3141_v60  ;;  %v3144_v19 = vpop.permute.xlu1 %3143  ;;  %v3090_v53 = vunpack.i.l.bf16 %v4403_v30  ;;  %v3015_v34 = vunpack.i.l.bf16 %v4349_v5  ;;  %v641_v60 = vld [vmem:[#allocation2 + $0x152] sm:$0xff]  ;;  %v642_v55 = vld [vmem:[#allocation2 + $0x15a] sm:$0xff] }
 0x14c   : > { %5306 = vst [vmem:[#allocation28_spill] sm:$0xff] %v4512_v46  ;;  %5307 = vst [vmem:[#allocation29_spill] sm:$0xff] %v4515_v31  ;;  %v3146_v35 = vunpack.i.h.bf16 %v3144_v19  ;;  %v3145_v39 = vunpack.i.l.bf16 %v3144_v19  ;;  %v4521_v56 = vpop.permute.xlu0 %3148  ;;  %v3095_v3 = vunpack.i.l.bf16 %v4409_v57  ;;  %v1731_v6 = vsel %vm1705_vm4, %v1698_v2, %v3091_v33  ;;  %v644_v2 = vld [vmem:[#allocation2 + $0x172] sm:$0xff]  ;;  %v5318_v46 = vld [vmem:[#allocation13_spill] sm:$0xff] }
 0x14d   : > { %3433 = vrot.lane.b32.xlu1 %v4266_v26, %s3767_s28  ;;  %v611_v26 = vld [vmem:[#allocation2 + $0x169] sm:$0xff]  ;;  %v1730_v7 = vsel %vm1705_vm4, %v1697_v47, %v3090_v53  ;;  %v3070_v31 = vunpack.i.l.bf16 %v4388_v41  ;;  %v5321_v23 = vld [vmem:[#allocation23_spill] sm:$0xff] }
 0x14e   : > { %v4528_v37 = vsel %vm1738_vm5, %v1721_v38, %v3146_v35  ;;  %v4531_v21 = vsel %vm1738_vm5, %v1720_v49, %v3145_v39  ;;  %3438 = vrot.lane.b32.xlu0 %v4216_v50, %s3767_s28  ;;  %v4547_v50 = vpack.i.bf16 %v596_v40, %v595_v48  ;;  %v4551_v28 = vpack.i.bf16 %v612_v10, %v611_v26  ;;  %v627_v35 = vld [vmem:[#allocation2 + $0xaa] sm:$0xff]  ;;  %v628_v39 = vld [vmem:[#allocation2 + $0xb2] sm:$0xff] }
 0x14f   : > { %5308 = vst [vmem:[#allocation30_spill] sm:$0xff] %v4528_v37  ;;  %5309 = vst [vmem:[#allocation31_spill] sm:$0xff] %v4531_v21  ;;  %v4535_v45 = vpop.permute.xlu1 %3153  ;;  %v1699_v38 = vsel %vm217_vm0, %v4240_v8, %v3015_v34  ;;  %v4589_v8 = vpack.i.bf16 %v628_v39, %v627_v35  ;;  %v643_v53 = vld [vmem:[#allocation2 + $0x16a] sm:$0xff]  ;;  %v2995_v21 = vunpack.i.l.bf16 %v4333_v17 }
 0x150   : > { %v4539_v58 = vpop.permute.xlu0 %3158  ;;  %v1732_v43 = vsel %vm1705_vm4, %v1699_v38, %v3095_v3  ;;  %v503_v3 = vld [vmem:[#allocation2 + $0xc9] sm:$0xff]  ;;  %v4622_v38 = vld [vmem:[#allocation2 + $0x180] sm:$0xff] }
 0x151   : > { %3443 = vrot.lane.b32.xlu1 %v4272_v27, %s3767_s28  ;;  %v3016_v27 = vunpack.i.h.bf16 %v4349_v5  ;;  %v551_v35 = vld [vmem:[#allocation2 + $0x18a] sm:$0xff] }
 0x152   : > { %3448 = vrot.lane.b32.xlu0 %v4420_v54, %s3768_s29  ;;  %v3096_v54 = vunpack.i.h.bf16 %v4409_v57  ;;  %v3472_v57 = vpack.i.bf16 %v642_v55, %v641_v60 }
 0x153   : > { %v4549_v22 = vpop.permute.xlu1 %3163 }
 0x154   : > { %v3169_v30 = vpop.permute.xlu0 %3168 }
 0x155   : > { %v3171_v14 = vunpack.i.h.bf16 %v3169_v30  ;;  %v3170_v19 = vunpack.i.l.bf16 %v3169_v30  ;;  %3453 = vrot.lane.b32.xlu1 %v4435_v12, %s3768_s29  ;;  %v1700_v12 = vsel %vm217_vm0, %v4242_v9, %v3016_v27 }
 0x156   : > { %3458 = vrot.lane.b32.xlu0 %v4547_v50, %s3768_s29  ;;  %v1733_v44 = vsel %vm1705_vm4, %v1700_v12, %v3096_v54  ;;  %v502_v54 = vld [vmem:[#allocation2 + $0xc1] sm:$0xff] }
 0x157   : > { %v4568_v5 = vsel %vm1738_vm5, %v1730_v7, %v3170_v19  ;;  %v4571_v52 = vsel %vm1738_vm5, %v1731_v6, %v3171_v14  ;;  %v3174_v36 = vpop.permute.xlu1 %3173  ;;  %v519_v19 = vld [vmem:[#allocation2 + $0x189] sm:$0xff]  ;;  %v4618_v12 = vld [vmem:[#allocation2 + $0xc0] sm:$0xff] }
 0x158   : > { %5310 = vst [vmem:[#allocation32_spill] sm:$0xff] %v4571_v52  ;;  %v3176_v49 = vunpack.i.h.bf16 %v3174_v36  ;;  %v3175_v48 = vunpack.i.l.bf16 %v3174_v36  ;;  %v3179_v40 = vpop.permute.xlu0 %3178  ;;  %v534_v7 = vld [vmem:[#allocation2 + $0xc2] sm:$0xff]  ;;  %v535_v36 = vld [vmem:[#allocation2 + $0xca] sm:$0xff]  ;;  %v3076_v52 = vunpack.i.h.bf16 %v5321_v23 }
 0x159   : > { %v3181_v26 = vunpack.i.h.bf16 %v3179_v40  ;;  %v3180_v10 = vunpack.i.l.bf16 %v3179_v40  ;;  %3463 = vrot.lane.b32.xlu1 %v4551_v28, %s3768_s29  ;;  %v4631_v40 = vld [vmem:[#allocation2 + $0xe0] sm:$0xff] }
 0x15a   : > { %v4582_v33 = vsel %vm1738_vm5, %v1733_v44, %v3176_v49  ;;  %v4585_v9 = vsel %vm1738_vm5, %v1732_v43, %v3175_v48  ;;  %3468 = vrot.lane.b32.xlu0 %v4461_v11, %s3769_s6  ;;  %v4602_v11 = vpack.i.bf16 %v644_v2, %v643_v53  ;;  %v4627_v49 = vld [vmem:[#allocation2 + $0x188] sm:$0xff]  ;;  %v4629_v48 = vld [vmem:[#allocation2 + $0xd8] sm:$0xff]  ;;  %v2950_v43 = vunpack.i.l.bf16 %v4297_v16  ;;  %v4640_v53 = vld [vmem:[#allocation2 + $0x1a0] sm:$0xff] }
 0x15b   : > { %5311 = vst [vmem:[#allocation33_spill] sm:$0xff] %v4582_v33  ;;  %5312 = vst [vmem:[#allocation34_spill] sm:$0xff] %v4585_v9  ;;  %v4593_v47 = vsel %vm1738_vm5, %v4423_v62, %v3180_v10  ;;  %v4597_v27 = vsel %vm1738_vm5, %v4426_v1, %v3181_v26  ;;  %v3184_v34 = vpop.permute.xlu1 %3183  ;;  %v518_v1 = vld [vmem:[#allocation2 + $0x181] sm:$0xff]  ;;  %v4636_v26 = vpack.i.bf16 %v503_v3, %v502_v54  ;;  %v4638_v10 = vld [vmem:[#allocation2 + $0x198] sm:$0xff]  ;;  %v2955_v54 = vunpack.i.l.bf16 %v4304_v32 }
 0x15c   : > { %5313 = vst [vmem:[#allocation35_spill] sm:$0xff] %v4593_v47  ;;  %5314 = vst [vmem:[#allocation36_spill] sm:$0xff] %v4597_v27  ;;  %v3186_v30 = vunpack.i.h.bf16 %v3184_v34  ;;  %v3185_v60 = vunpack.i.l.bf16 %v3184_v34  ;;  %v4599_v55 = vpop.permute.xlu0 %3188  ;;  %v361_v44 = vld [vmem:[#allocation2 + $0x8] sm:$0xff]  ;;  %v360_v2 = vld [vmem:[#allocation2] sm:$0xff]  ;;  %v2956_v34 = vunpack.i.h.bf16 %v4304_v32  ;;  %v2990_v32 = vunpack.i.l.bf16 %v4327_v0 }
 0x15d   : > { %3473 = vrot.lane.b32.xlu1 %v3472_v57, %s3769_s6  ;;  %v550_v57 = vld [vmem:[#allocation2 + $0x182] sm:$0xff]  ;;  %v1673_v37 = vsel %vm217_vm0, %v360_v2, %v2950_v43  ;;  %v3030_v43 = vunpack.i.l.bf16 %v4357_v29  ;;  %v1675_v27 = vsel %vm217_vm0, %v4162_v24, %v2955_v54  ;;  %v3035_v47 = vunpack.i.l.bf16 %v4363_v63  ;;  %v5320_v9 = vld [vmem:[#allocation15_spill] sm:$0xff] }
 0x15e   : > { %v4606_v14 = vsel %vm1738_vm5, %v4438_v42, %v3186_v30  ;;  %v4610_v62 = vsel %vm1738_vm5, %v4441_v4, %v3185_v60  ;;  %3478 = vrot.lane.b32.xlu0 %v4589_v8, %s3769_s6  ;;  %v4620_v42 = vld [vmem:[#allocation2 + $0xc8] sm:$0xff]  ;;  %v2951_v4 = vunpack.i.h.bf16 %v4297_v16  ;;  %v4645_v60 = vpack.i.bf16 %v519_v19, %v518_v1  ;;  %v4651_v16 = vld [vmem:[#allocation2 + $0xd9] sm:$0xff] }
 0x15f   : > { %5315 = vst [vmem:[#allocation37_spill] sm:$0xff] %v4606_v14  ;;  %5316 = vst [vmem:[#allocation38_spill] sm:$0xff] %v4610_v62  ;;  %v4614_v6 = vpop.permute.xlu1 %3193  ;;  %v4647_v14 = vpack.i.bf16 %v535_v36, %v534_v7  ;;  %v4649_v62 = vpack.i.bf16 %v551_v35, %v550_v57  ;;  %v4664_v19 = vld [vmem:[#allocation2 + $0x199] sm:$0xff]  ;;  %v4666_v7 = vld [vmem:[#allocation2 + $0x1a1] sm:$0xff]  ;;  %v2991_v57 = vunpack.i.h.bf16 %v4327_v0  ;;  %v2996_v1 = vunpack.i.h.bf16 %v4333_v17 }
 0x160   : > { %v4616_v39 = vpop.permute.xlu0 %3198  ;;  %v1674_v36 = vsel %vm217_vm0, %v361_v44, %v2951_v4  ;;  %v4682_v44 = vld [vmem:[#allocation2 + $0xda] sm:$0xff]  ;;  %v4684_v0 = vld [vmem:[#allocation2 + $0xe2] sm:$0xff]  ;;  %v3031_v35 = vunpack.i.h.bf16 %v4357_v29  ;;  %v3036_v4 = vunpack.i.h.bf16 %v4363_v63  ;;  %v1689_v33 = vsel %vm217_vm0, %v5318_v46, %v2990_v32 }
 0x161   : > { %3483 = vrot.lane.b32.xlu1 %v4602_v11, %s3769_s6  ;;  %v3071_v17 = vunpack.i.h.bf16 %v4388_v41  ;;  %v5319_v63 = vld [vmem:[#allocation16_spill] sm:$0xff]  ;;  %v1691_v59 = vsel %vm217_vm0, %v5320_v9, %v2995_v21  ;;  %v1706_v41 = vsel %vm1705_vm4, %v1673_v37, %v3030_v43  ;;  %v3111_v32 = vunpack.i.h.bf16 %v4428_v15 }
 0x162   : > { %3488 = vrot.lane.b32.xlu0 %v4547_v50, %s3765_s8  ;;  %v4653_v50 = vld [vmem:[#allocation2 + $0xe1] sm:$0xff]  ;;  %v1692_v54 = vsel %vm217_vm0, %v5319_v63, %v2996_v1  ;;  %v1707_v46 = vsel %vm1705_vm4, %v1674_v36, %v3031_v35  ;;  %v1708_v1 = vsel %vm1705_vm4, %v1675_v27, %v3035_v47  ;;  %v1722_v9 = vsel %vm1705_vm4, %v1689_v33, %v3070_v31 }
 0x163   : > { %v4643_v30 = vpop.permute.xlu1 %3203  ;;  %v3116_v36 = vunpack.i.h.bf16 %v4447_v13  ;;  %v3151_v35 = vunpack.i.h.bf16 %v4521_v56  ;;  %v1725_v47 = vsel %vm1705_vm4, %v1692_v54, %v3076_v52  ;;  %v3156_v33 = vunpack.i.h.bf16 %v4535_v45 }
 0x164   : > { %v4656_v3 = vpop.permute.xlu0 %3208  ;;  %v3155_v27 = vunpack.i.l.bf16 %v4535_v45  ;;  %v3195_v43 = vunpack.i.l.bf16 %v4614_v6  ;;  %v3200_v45 = vunpack.i.l.bf16 %v4616_v39 }
 0x165   : > { %3493 = vrot.lane.b32.xlu1 %v4551_v28, %s3765_s8  ;;  %v1676_v28 = vsel %vm217_vm0, %v4164_v25, %v2956_v34  ;;  %v5317_v34 = vld [vmem:[#allocation14_spill] sm:$0xff] }
 0x166   : > { %3498 = vrot.lane.b32.xlu0 %v4636_v26, %s3765_s8  ;;  %v1690_v29 = vsel %vm217_vm0, %v5317_v34, %v2991_v57  ;;  %v3075_v57 = vunpack.i.l.bf16 %v5321_v23  ;;  %v3110_v34 = vunpack.i.l.bf16 %v4428_v15  ;;  %v1709_v21 = vsel %vm1705_vm4, %v1676_v28, %v3036_v4 }
 0x167   : > { %v4690_v2 = vpop.permute.xlu1 %3213  ;;  %v3115_v23 = vunpack.i.l.bf16 %v4447_v13  ;;  %v1723_v37 = vsel %vm1705_vm4, %v1690_v29, %v3071_v17  ;;  %v3150_v15 = vunpack.i.l.bf16 %v4521_v56  ;;  %v1740_v4 = vsel %vm1738_vm5, %v1707_v46, %v3111_v32 }
 0x168   : > { %v4699_v25 = vpop.permute.xlu0 %3218  ;;  %v1724_v31 = vsel %vm1705_vm4, %v1691_v59, %v3075_v57  ;;  %v1739_v13 = vsel %vm1738_vm5, %v1706_v41, %v3110_v34  ;;  %v3191_v56 = vunpack.i.h.bf16 %v4599_v55  ;;  %v3190_v28 = vunpack.i.l.bf16 %v4599_v55 }
 0x169   : > { %3503 = vrot.lane.b32.xlu1 %v4645_v60, %s3765_s8  ;;  %v1741_v52 = vsel %vm1738_vm5, %v1708_v1, %v3115_v23  ;;  %v3196_v59 = vunpack.i.h.bf16 %v4614_v6  ;;  %v1742_v29 = vsel %vm1738_vm5, %v1709_v21, %v3116_v36  ;;  %v1755_v63 = vsel %vm1738_vm5, %v1722_v9, %v3150_v15 }
 0x16a   : > { %3508 = vrot.lane.b32.xlu0 %v4589_v8, %s3766_s26  ;;  %v1756_v54 = vsel %vm1738_vm5, %v1723_v37, %v3151_v35  ;;  %v3201_v55 = vunpack.i.h.bf16 %v4616_v39  ;;  %v1758_v57 = vsel %vm1738_vm5, %v1725_v47, %v3156_v33  ;;  %v1757_v6 = vsel %vm1738_vm5, %v1724_v31, %v3155_v27 }
 0x16b   : > { %v4722_v24 = vpop.permute.xlu1 %3223  ;;  %v3206_v41 = vunpack.i.h.bf16 %v4643_v30  ;;  %v3205_v46 = vunpack.i.l.bf16 %v4643_v30  ;;  %v5322_v32 = vpack.i.bf16 %v4620_v42, %v4618_v12  ;;  %v1772_v34 = vsel %vm1771_vm6, %v1739_v13, %v3190_v28 }
 0x16c   : > { %v4728_v8 = vpop.permute.xlu0 %3228  ;;  %v1773_v39 = vsel %vm1771_vm6, %v1740_v4, %v3191_v56  ;;  %v3211_v1 = vunpack.i.h.bf16 %v4656_v3  ;;  %v3210_v21 = vunpack.i.l.bf16 %v4656_v3  ;;  %v1788_v23 = vsel %vm1771_vm6, %v1755_v63, %v3195_v43 }
 0x16d   : > { %3513 = vrot.lane.b32.xlu1 %v4602_v11, %s3766_s26  ;;  %v1789_v30 = vsel %vm1771_vm6, %v1756_v54, %v3196_v59  ;;  %v1774_v37 = vsel %vm1771_vm6, %v1741_v52, %v3200_v45  ;;  %v3215_v12 = vunpack.i.l.bf16 %v4690_v2  ;;  %v1775_v36 = vsel %vm1771_vm6, %v1742_v29, %v3201_v55 }
 0x16e   : > { %3518 = vrot.lane.b32.xlu0 %v4647_v14, %s3766_s26  ;;  %v3216_v35 = vunpack.i.h.bf16 %v4690_v2  ;;  %v3221_v15 = vunpack.i.h.bf16 %v4699_v25  ;;  %v3220_v3 = vunpack.i.l.bf16 %v4699_v25  ;;  %v5323_v47 = vpack.i.bf16 %v4627_v49, %v4622_v38 }
 0x16f   : > { %v4746_v11 = vpop.permute.xlu1 %3233  ;;  %v1790_v31 = vsel %vm1771_vm6, %v1757_v6, %v3205_v46  ;;  %v1791_v33 = vsel %vm1771_vm6, %v1758_v57, %v3206_v41  ;;  %v3226_v27 = vunpack.i.h.bf16 %v4722_v24  ;;  %v3225_v13 = vunpack.i.l.bf16 %v4722_v24 }
 0x170   : > { %v4752_v17 = vpop.permute.xlu0 %3238  ;;  %v5324_v2 = vpack.i.bf16 %v4631_v40, %v4629_v48  ;;  %v1805_v25 = vsel %vm1804_vm7, %v1772_v34, %v3210_v21  ;;  %v1806_v4 = vsel %vm1804_vm7, %v1773_v39, %v3211_v1  ;;  %v3231_v38 = vunpack.i.h.bf16 %v4728_v8 }
 0x171   : > { %3523 = vrot.lane.b32.xlu1 %v4649_v62, %s3766_s26  ;;  %v3230_v49 = vunpack.i.l.bf16 %v4728_v8  ;;  %v1821_v28 = vsel %vm1804_vm7, %v1788_v23, %v3215_v12  ;;  %v3236_v52 = vunpack.i.h.bf16 %v4746_v11  ;;  %v3235_v24 = vunpack.i.l.bf16 %v4746_v11 }
 0x172   : > { %3528 = vrot.lane.b32.xlu0 %v5322_v32, %s3767_s28  ;;  %v3240_v59 = vunpack.i.l.bf16 %v4752_v17  ;;  %v1822_v40 = vsel %vm1804_vm7, %v1789_v30, %v3216_v35  ;;  %v1807_v43 = vsel %vm1804_vm7, %v1774_v37, %v3220_v3  ;;  %v1808_v45 = vsel %vm1804_vm7, %v1775_v36, %v3221_v15 }
 0x173   : > { %v4772_v9 = vpop.permute.xlu1 %3243  ;;  %v3241_v29 = vunpack.i.h.bf16 %v4752_v17  ;;  %v5325_v8 = vpack.i.bf16 %v4640_v53, %v4638_v10  ;;  %v1823_v63 = vsel %vm1804_vm7, %v1790_v31, %v3225_v13  ;;  %v1824_v11 = vsel %vm1804_vm7, %v1791_v33, %v3226_v27 }
 0x174   : > { %v3249_v42 = vpop.permute.xlu0 %3248  ;;  %v1838_v57 = vsel %vm1837_vm8, %v1805_v25, %v3230_v49  ;;  %v1839_v6 = vsel %vm1837_vm8, %v1806_v4, %v3231_v38  ;;  %v1854_v32 = vsel %vm1837_vm8, %v1821_v28, %v3235_v24  ;;  %v1855_v10 = vsel %vm1837_vm8, %v1822_v40, %v3236_v52  ;;  %v647_v28 = vld [vmem:[#allocation2 + $0x19a] sm:$0xff]  ;;  %v648_v52 = vld [vmem:[#allocation2 + $0x1a2] sm:$0xff] }
 0x175   : > { %3533 = vrot.lane.b32.xlu1 %v5323_v47, %s3767_s28  ;;  %v3251_v54 = vunpack.i.h.bf16 %v3249_v42  ;;  %v3250_v55 = vunpack.i.l.bf16 %v3249_v42  ;;  %v1840_v53 = vsel %vm1837_vm8, %v1807_v43, %v3240_v59  ;;  %v1841_v1 = vsel %vm1837_vm8, %v1808_v45, %v3241_v29 }
 0x176   : > { %3538 = vrot.lane.b32.xlu0 %v5324_v2, %s3767_s28  ;;  %v3246_v21 = vunpack.i.h.bf16 %v4772_v9  ;;  %v3245_v30 = vunpack.i.l.bf16 %v4772_v9  ;;  %v5326_v12 = vpack.i.bf16 %v4653_v50, %v4651_v16  ;;  %v5327_v4 = vpack.i.bf16 %v4666_v7, %v4664_v19 }
 0x177   : > { %v3254_v56 = vpop.permute.xlu1 %3253  ;;  %v1871_v42 = vsel %vm1870_vm9, %v1838_v57, %v3250_v55  ;;  %v1872_v36 = vsel %vm1870_vm9, %v1839_v6, %v3251_v54 }
 0x178   : > { %v3259_v48 = vpop.permute.xlu0 %3258  ;;  %v3256_v41 = vunpack.i.h.bf16 %v3254_v56  ;;  %v3255_v17 = vunpack.i.l.bf16 %v3254_v56  ;;  %v1856_v24 = vsel %vm1837_vm8, %v1823_v63, %v3245_v30  ;;  %v1857_v40 = vsel %vm1837_vm8, %v1824_v11, %v3246_v21  ;;  %v3590_v30 = vld [vmem:[#allocation2 + $0x30] sm:$0xff] }
 0x179   : > { %3543 = vrot.lane.b32.xlu1 %v5325_v8, %s3767_s28  ;;  %v3260_v34 = vunpack.i.l.bf16 %v3259_v48  ;;  %v3261_v37 = vunpack.i.h.bf16 %v3259_v48  ;;  %v3582_v63 = vpack.i.bf16 %v648_v52, %v647_v28  ;;  %v5328_v11 = vpack.i.bf16 %v4684_v0, %v4682_v44  ;;  %v5330_v44 = vld [vmem:[#allocation18_spill] sm:$0xff] }
 0x17a   : > { %3548 = vrot.lane.b32.xlu0 %v4636_v26, %s3768_s29  ;;  %v1887_v47 = vsel %vm1870_vm9, %v1854_v32, %v3255_v17  ;;  %v2966_v0 = vunpack.i.h.bf16 %v5330_v44  ;;  %v3596_v52 = vld [vmem:[#allocation2 + $0x110] sm:$0xff] }
 0x17b   : > { %v3264_v46 = vpop.permute.xlu1 %3263  ;;  %v1873_v9 = vsel %vm1870_vm9, %v1840_v53, %v3260_v34  ;;  %v1874_v38 = vsel %vm1870_vm9, %v1841_v1, %v3261_v37  ;;  %v2965_v34 = vunpack.i.l.bf16 %v5330_v44 }
 0x17c   : > { %v3269_v39 = vpop.permute.xlu0 %3268  ;;  %v3266_v50 = vunpack.i.h.bf16 %v3264_v46  ;;  %v3265_v13 = vunpack.i.l.bf16 %v3264_v46 }
 0x17d   : > { %v3271_v26 = vunpack.i.h.bf16 %v3269_v39  ;;  %v3270_v23 = vunpack.i.l.bf16 %v3269_v39  ;;  %3553 = vrot.lane.b32.xlu1 %v4645_v60, %s3768_s29  ;;  %v1888_v60 = vsel %vm1870_vm9, %v1855_v10, %v3256_v41  ;;  %v5331_v39 = vld [vmem:[#allocation19_spill] sm:$0xff] }
 0x17e   : > { %3558 = vrot.lane.b32.xlu0 %v5326_v12, %s3768_s29  ;;  %v1889_v8 = vsel %vm1870_vm9, %v1856_v24, %v3265_v13  ;;  %v1890_v54 = vsel %vm1870_vm9, %v1857_v40, %v3266_v50  ;;  %v3001_v1 = vunpack.i.h.bf16 %v5331_v39  ;;  %v3000_v21 = vunpack.i.l.bf16 %v5331_v39  ;;  %v3592_v50 = vld [vmem:[#allocation2 + $0x50] sm:$0xff] }
 0x17f   : > { %v3274_v35 = vpop.permute.xlu1 %3273  ;;  %v1904_v15 = vsel %vm1903_vm10, %v1871_v42, %v3270_v23  ;;  %v1905_v3 = vsel %vm1903_vm10, %v1872_v36, %v3271_v26  ;;  %v5332_v26 = vld [vmem:[#allocation20_spill] sm:$0xff]  ;;  %v5333_v42 = vld [vmem:[#allocation21_spill] sm:$0xff]  ;;  %v1680_v13 = vsel %vm217_vm0, %v3592_v50, %v2966_v0  ;;  %v3166_v39 = vunpack.i.h.bf16 %v4549_v22 }
 0x180   : > { %v3276_v31 = vunpack.i.h.bf16 %v3274_v35  ;;  %v3275_v33 = vunpack.i.l.bf16 %v3274_v35  ;;  %v3279_v27 = vpop.permute.xlu0 %3278  ;;  %v1936_v16 = vpack.c.bf16 %v1905_v3, %v1904_v15  ;;  %v3006_v23 = vunpack.i.h.bf16 %v5332_v26  ;;  %v3591_v3 = vld [vmem:[#allocation2 + $0x38] sm:$0xff] }
 0x181   : > { %v3281_v2 = vunpack.i.h.bf16 %v3279_v27  ;;  %v3280_v25 = vunpack.i.l.bf16 %v3279_v27  ;;  %3563 = vrot.lane.b32.xlu1 %v5327_v4, %s3768_s29  ;;  %v3005_v12 = vunpack.i.l.bf16 %v5332_v26  ;;  %v3041_v36 = vunpack.i.h.bf16 %v5333_v42  ;;  %v3594_v4 = vld [vmem:[#allocation2 + $0xf8] sm:$0xff] }
 0x182   : > { %3568 = vrot.lane.b32.xlu0 %v4647_v14, %s3769_s6  ;;  %2828 = vmatprep.mubr.msk.bf16.mxu0 %vm1979_vm11, %v1936_v16  ;;  %v1920_v49 = vsel %vm1903_vm10, %v1887_v47, %v3275_v33  ;;  %v1921_v56 = vsel %vm1903_vm10, %v1888_v60, %v3276_v31  ;;  %v3040_v35 = vunpack.i.l.bf16 %v5333_v42  ;;  %v5334_v60 = vld [vmem:[#allocation22_spill] sm:$0xff]  ;;  %v5335_v33 = vld [vmem:[#allocation24_spill] sm:$0xff]  ;;  %v1696_v24 = vsel %vm217_vm0, %v3596_v52, %v3006_v23 }
 0x183   : > { %v1906_v59 = vsel %vm1903_vm10, %v1873_v9, %v3280_v25  ;;  %v1907_v19 = vsel %vm1903_vm10, %v1874_v38, %v3281_v2  ;;  %v3284_v7 = vpop.permute.xlu1 %3283  ;;  %v1944_v48 = vpack.c.bf16 %v1921_v56, %v1920_v49  ;;  %v3046_v9 = vunpack.i.h.bf16 %v5334_v60  ;;  %v3593_v2 = vld [vmem:[#allocation2 + $0x48] sm:$0xff]  ;;  %v3595_v56 = vld [vmem:[#allocation2 + $0xf0] sm:$0xff] }
 0x184   : > { %v1937_v43 = vpack.c.bf16 %v1907_v19, %v1906_v59  ;;  %v3286_v14 = vunpack.i.h.bf16 %v3284_v7  ;;  %v3285_v45 = vunpack.i.l.bf16 %v3284_v7  ;;  %v4849_v29 = vpop.permute.xlu0 %3288  ;;  %v3045_v31 = vunpack.i.l.bf16 %v5334_v60  ;;  %v5336_v59 = vld [vmem:[#allocation25_spill] sm:$0xff] }
 0x185   : > { %3573 = vrot.lane.b32.xlu1 %v4649_v62, %s3769_s6  ;;  %2844 = vmatprep.mubr.msk.bf16.mxu1 %vm1979_vm11, %v1944_v48  ;;  %v5329_v62 = vld [vmem:[#allocation17_spill] sm:$0xff]  ;;  %v3080_v27 = vunpack.i.l.bf16 %v5335_v33  ;;  %v1679_v25 = vsel %vm217_vm0, %v3593_v2, %v2965_v34  ;;  %v1694_v38 = vsel %vm217_vm0, %v3594_v4, %v3001_v1  ;;  %v3081_v49 = vunpack.i.h.bf16 %v5335_v33 }
 0x186   : > { %v1922_v55 = vsel %vm1903_vm10, %v1889_v8, %v3285_v45  ;;  %v1923_v57 = vsel %vm1903_vm10, %v1890_v54, %v3286_v14  ;;  %3578 = vrot.lane.b32.xlu0 %v5328_v11, %s3769_s6  ;;  %2829 = vmatmul.mubr.msk.bf16.vlgmr.msra.gmra.mrb[0].mxu0 %vm1979_vm11, %v1937_v43  ;;  %v2960_v46 = vunpack.i.l.bf16 %v5329_v62  ;;  %v2961_v10 = vunpack.i.h.bf16 %v5329_v62  ;;  %v3597_v48 = vld [vmem:[#allocation2 + $0x108] sm:$0xff] }
 0x187   : > { %v1945_v6 = vpack.c.bf16 %v1923_v57, %v1922_v55  ;;  %v4863_v41 = vpop.permute.xlu1 %3293  ;;  %v1693_v28 = vsel %vm217_vm0, %v3595_v56, %v3000_v21  ;;  %v3086_v19 = vunpack.i.h.bf16 %v5336_v59  ;;  %v3085_v7 = vunpack.i.l.bf16 %v5336_v59 }
 0x188   : > { %v4865_v17 = vpop.permute.xlu0 %3298  ;;  %v1677_v37 = vsel %vm217_vm0, %v3590_v30, %v2960_v46  ;;  %v1678_v47 = vsel %vm217_vm0, %v3591_v3, %v2961_v10  ;;  %v1695_v40 = vsel %vm217_vm0, %v3597_v48, %v3005_v12  ;;  %v3120_v45 = vunpack.i.l.bf16 %v4451_v51 }
 0x189   : > { %3583 = vrot.lane.b32.xlu1 %v3582_v63, %s3769_s6  ;;  %2845 = vmatmul.mubr.msk.bf16.vlgmr.msra.gmra.mrb[0].mxu1 %vm1979_vm11, %v1945_v6  ;;  %v1711_v43 = vsel %vm1705_vm4, %v1678_v47, %v3041_v36  ;;  %v1710_v14 = vsel %vm1705_vm4, %v1677_v37, %v3040_v35  ;;  %v1713_v54 = vsel %vm1705_vm4, %v1680_v13, %v3046_v9  ;;  %v3121_v57 = vunpack.i.h.bf16 %v4451_v51 }
 0x18a   : > { %v1712_v63 = vsel %vm1705_vm4, %v1679_v25, %v3045_v31  ;;  %v1726_v55 = vsel %vm1705_vm4, %v1693_v28, %v3080_v27  ;;  %v1727_v6 = vsel %vm1705_vm4, %v1694_v38, %v3081_v49  ;;  %v3126_v62 = vunpack.i.h.bf16 %v4467_v61 }
 0x18b   : > { %v4870_v32 = vpop.permute.xlu1 %3303  ;;  %v3125_v46 = vunpack.i.l.bf16 %v4467_v61  ;;  %v3160_v10 = vunpack.i.l.bf16 %v4539_v58  ;;  %v1729_v44 = vsel %vm1705_vm4, %v1696_v24, %v3086_v19  ;;  %v1728_v0 = vsel %vm1705_vm4, %v1695_v40, %v3085_v7 }
 0x18c   : > { %v4873_v53 = vpop.permute.xlu0 %3308  ;;  %v3161_v34 = vunpack.i.h.bf16 %v4539_v58  ;;  %v1743_v51 = vsel %vm1738_vm5, %v1710_v14, %v3120_v45  ;;  %v3165_v1 = vunpack.i.l.bf16 %v4549_v22  ;;  %v3291_v21 = vunpack.i.h.bf16 %v4849_v29 }
 0x18d   : > { %v3290_v26 = vunpack.i.l.bf16 %v4849_v29  ;;  %v1744_v61 = vsel %vm1738_vm5, %v1711_v43, %v3121_v57  ;;  %v3296_v30 = vunpack.i.h.bf16 %v4863_v41  ;;  %v3295_v37 = vunpack.i.l.bf16 %v4863_v41 }
 0x18e   : > { %v3301_v12 = vunpack.i.h.bf16 %v4865_v17  ;;  %v1746_v42 = vsel %vm1738_vm5, %v1713_v54, %v3126_v62  ;;  %v1745_v36 = vsel %vm1738_vm5, %v1712_v63, %v3125_v46  ;;  %v1759_v22 = vsel %vm1738_vm5, %v1726_v55, %v3160_v10 }
 0x18f   : > { %v4884_v15 = vpop.permute.xlu1 %3313  ;;  %v3300_v35 = vunpack.i.l.bf16 %v4865_v17  ;;  %v1760_v29 = vsel %vm1738_vm5, %v1727_v6, %v3161_v34  ;;  %v1762_v3 = vsel %vm1738_vm5, %v1729_v44, %v3166_v39  ;;  %v3306_v47 = vunpack.i.h.bf16 %v4870_v32 }
 0x190   : > { %v4890_v16 = vpop.permute.xlu0 %3318  ;;  %v3305_v60 = vunpack.i.l.bf16 %v4870_v32  ;;  %v1761_v41 = vsel %vm1738_vm5, %v1728_v0, %v3165_v1  ;;  %v1776_v9 = vsel %vm1771_vm6, %v1743_v51, %v3290_v26  ;;  %v1777_v31 = vsel %vm1771_vm6, %v1744_v61, %v3291_v21 }
 0x191   : > { %v3310_v33 = vunpack.i.l.bf16 %v4873_v53  ;;  %v1792_v17 = vsel %vm1771_vm6, %v1759_v22, %v3295_v37  ;;  %v1793_v50 = vsel %vm1771_vm6, %v1760_v29, %v3296_v30  ;;  %v1779_v13 = vsel %vm1771_vm6, %v1746_v42, %v3301_v12 }
 0x192   : > { %v3311_v2 = vunpack.i.h.bf16 %v4873_v53  ;;  %v1778_v32 = vsel %vm1771_vm6, %v1745_v36, %v3300_v35  ;;  %v3316_v4 = vunpack.i.h.bf16 %v4884_v15  ;;  %v3315_v38 = vunpack.i.l.bf16 %v4884_v15 }
 0x193   : > { %v4904_v8 = vpop.permute.xlu1 %3323  ;;  %v3320_v49 = vunpack.i.l.bf16 %v4890_v16  ;;  %v1794_v56 = vsel %vm1771_vm6, %v1761_v41, %v3305_v60  ;;  %v1795_v28 = vsel %vm1771_vm6, %v1762_v3, %v3306_v47  ;;  %v3321_v52 = vunpack.i.h.bf16 %v4890_v16 }
 0x194   : > { %v4910_v11 = vpop.permute.xlu0 %3328  ;;  %v3325_v24 = vunpack.i.l.bf16 %v4904_v8  ;;  %v1809_v59 = vsel %vm1804_vm7, %v1776_v9, %v3310_v33  ;;  %v3326_v53 = vunpack.i.h.bf16 %v4904_v8  ;;  %v1810_v15 = vsel %vm1804_vm7, %v1777_v31, %v3311_v2 }
 0x195   : > { %v3331_v19 = vunpack.i.h.bf16 %v4910_v11  ;;  %v3330_v7 = vunpack.i.l.bf16 %v4910_v11  ;;  %v1825_v54 = vsel %vm1804_vm7, %v1792_v17, %v3315_v38  ;;  %v1826_v16 = vsel %vm1804_vm7, %v1793_v50, %v3316_v4 }
 0x196   : > { %v1811_v63 = vsel %vm1804_vm7, %v1778_v32, %v3320_v49  ;;  %v1812_v8 = vsel %vm1804_vm7, %v1779_v13, %v3321_v52  ;;  %v1827_v57 = vsel %vm1804_vm7, %v1794_v56, %v3325_v24  ;;  %v1828_v62 = vsel %vm1804_vm7, %v1795_v28, %v3326_v53 }
 0x197   : > { %v3334_v23 = vpop.permute.xlu1 %3333  ;;  %v1842_v46 = vsel %vm1837_vm8, %v1809_v59, %v3330_v7  ;;  %v1843_v10 = vsel %vm1837_vm8, %v1810_v15, %v3331_v19 }
 0x198   : > { %v3339_v58 = vpop.permute.xlu0 %3338  ;;  %v3336_v40 = vunpack.i.h.bf16 %v3334_v23  ;;  %v3335_v43 = vunpack.i.l.bf16 %v3334_v23 }
 0x199   : > { %v3340_v14 = vunpack.i.l.bf16 %v3339_v58  ;;  %v3341_v55 = vunpack.i.h.bf16 %v3339_v58 }
 0x19a   : > { %v1858_v34 = vsel %vm1837_vm8, %v1825_v54, %v3335_v43  ;;  %v1859_v39 = vsel %vm1837_vm8, %v1826_v16, %v3336_v40 }
 0x19b   : > { %v4940_v27 = vpop.permute.xlu1 %3343  ;;  %v1844_v51 = vsel %vm1837_vm8, %v1811_v63, %v3340_v14  ;;  %v1845_v26 = vsel %vm1837_vm8, %v1812_v8, %v3341_v55 }
 0x19c   : > { %v3349_v25 = vpop.permute.xlu0 %3348  ;;  %v3346_v23 = vunpack.i.h.bf16 %v4940_v27  ;;  %v3345_v36 = vunpack.i.l.bf16 %v4940_v27 }
 0x19d   : > { %v3351_v6 = vunpack.i.h.bf16 %v3349_v25  ;;  %v3350_v11 = vunpack.i.l.bf16 %v3349_v25 }
 0x19e   : > { %v1860_v4 = vsel %vm1837_vm8, %v1827_v57, %v3345_v36  ;;  %v1861_v52 = vsel %vm1837_vm8, %v1828_v62, %v3346_v23 }
 0x19f   : > { %v3354_v48 = vpop.permute.xlu1 %3353  ;;  %v1875_v37 = vsel %vm1870_vm9, %v1842_v46, %v3350_v11  ;;  %v1876_v12 = vsel %vm1870_vm9, %v1843_v10, %v3351_v6 }
 0x1a0   : > { %v3359_v45 = vpop.permute.xlu0 %3358  ;;  %v3355_v44 = vunpack.i.l.bf16 %v3354_v48  ;;  %v3356_v1 = vunpack.i.h.bf16 %v3354_v48 }
 0x1a1   : > { %v3361_v58 = vunpack.i.h.bf16 %v3359_v45  ;;  %v3360_v42 = vunpack.i.l.bf16 %v3359_v45 }
 0x1a2   : > { %v1891_v22 = vsel %vm1870_vm9, %v1858_v34, %v3355_v44  ;;  %v1892_v47 = vsel %vm1870_vm9, %v1859_v39, %v3356_v1 }
 0x1a3   : > { %v3364_v0 = vpop.permute.xlu1 %3363  ;;  %v1877_v2 = vsel %vm1870_vm9, %v1844_v51, %v3360_v42  ;;  %v1878_v27 = vsel %vm1870_vm9, %v1845_v26, %v3361_v58 }
 0x1a4   : > { %v3369_v21 = vpop.permute.xlu0 %3368  ;;  %v3366_v33 = vunpack.i.h.bf16 %v3364_v0  ;;  %v3365_v17 = vunpack.i.l.bf16 %v3364_v0 }
 0x1a5   : > { %v3371_v61 = vunpack.i.h.bf16 %v3369_v21  ;;  %v3370_v30 = vunpack.i.l.bf16 %v3369_v21 }
 0x1a6   : > { %v1893_v7 = vsel %vm1870_vm9, %v1860_v4, %v3365_v17  ;;  %v1894_v48 = vsel %vm1870_vm9, %v1861_v52, %v3366_v33 }
 0x1a7   : > { %v1908_v35 = vsel %vm1903_vm10, %v1875_v37, %v3370_v30  ;;  %v1909_v29 = vsel %vm1903_vm10, %v1876_v12, %v3371_v61  ;;  %v3374_v3 = vpop.permute.xlu1 %3373  ;;  %v5337_v30 = vld [vmem:[#allocation32_spill] sm:$0xff]  ;;  %v5338_v12 = vld [vmem:[#allocation26_spill] sm:$0xff] }
 0x1a8   : > { %v1938_v60 = vpack.c.bf16 %v1909_v29, %v1908_v35  ;;  %v3376_v41 = vunpack.i.h.bf16 %v3374_v3  ;;  %v3375_v9 = vunpack.i.l.bf16 %v3374_v3  ;;  %v3379_v31 = vpop.permute.xlu0 %3378  ;;  %v5340_v3 = vld [vmem:[#allocation34_spill] sm:$0xff] }
 0x1a9   : > { %v3381_v50 = vunpack.i.h.bf16 %v3379_v31  ;;  %v3380_v13 = vunpack.i.l.bf16 %v3379_v31 }
 0x1aa   : > { %v1924_v25 = vsel %vm1903_vm10, %v1891_v22, %v3375_v9  ;;  %v1925_v32 = vsel %vm1903_vm10, %v1892_v47, %v3376_v41  ;;  %2832 = vmatprep.mubr.msk.bf16.mxu0 %vm1979_vm11, %v1938_v60  ;;  %v5339_v22 = vld [vmem:[#allocation27_spill] sm:$0xff]  ;;  %v5341_v60 = vld [vmem:[#allocation33_spill] sm:$0xff] }
 0x1ab   : > { %v1946_v38 = vpack.c.bf16 %v1925_v32, %v1924_v25  ;;  %v1910_v49 = vsel %vm1903_vm10, %v1877_v2, %v3380_v13  ;;  %v1911_v56 = vsel %vm1903_vm10, %v1878_v27, %v3381_v50  ;;  %v3384_v28 = vpop.permute.xlu1 %3383 }
 0x1ac   : > { %v1939_v24 = vpack.c.bf16 %v1911_v56, %v1910_v49  ;;  %v3386_v59 = vunpack.i.h.bf16 %v3384_v28  ;;  %v3385_v53 = vunpack.i.l.bf16 %v3384_v28  ;;  %v3389_v19 = vpop.permute.xlu0 %3388 }
 0x1ad   : > { %2848 = vmatprep.mubr.msk.bf16.mxu1 %vm1979_vm11, %v1946_v38  ;;  %v3391_v6 = vunpack.i.h.bf16 %v3389_v19  ;;  %v3390_v11 = vunpack.i.l.bf16 %v3389_v19 }
 0x1ae   : > { %v1926_v15 = vsel %vm1903_vm10, %v1893_v7, %v3385_v53  ;;  %v1927_v40 = vsel %vm1903_vm10, %v1894_v48, %v3386_v59  ;;  %2833 = vmatmul.mubr.msk.bf16.gmra.mrb[4].mxu0 %vm1979_vm11, %v1939_v24 }
 0x1af   : > { %v1947_v43 = vpack.c.bf16 %v1927_v40, %v1926_v15  ;;  %v3394_v14 = vpop.permute.xlu1 %3393  ;;  %v1780_v1 = vsel %vm1771_vm6, %v4490_v20, %v3390_v11  ;;  %v1781_v21 = vsel %vm1771_vm6, %v4493_v18, %v3391_v6 }
 0x1b0   : > { %v3399_v45 = vpop.permute.xlu0 %3398  ;;  %v3396_v46 = vunpack.i.h.bf16 %v3394_v14  ;;  %v3395_v10 = vunpack.i.l.bf16 %v3394_v14 }
 0x1b1   : > { %2849 = vmatmul.mubr.msk.bf16.gmra.mrb[4].mxu1 %vm1979_vm11, %v1947_v43  ;;  %v3401_v44 = vunpack.i.h.bf16 %v3399_v45  ;;  %v3400_v34 = vunpack.i.l.bf16 %v3399_v45 }
 0x1b2   : > { %v1796_v61 = vsel %vm1771_vm6, %v4568_v5, %v3395_v10  ;;  %v1797_v37 = vsel %vm1771_vm6, %v5337_v30, %v3396_v46 }
 0x1b3   : > { %v3404_v54 = vpop.permute.xlu1 %3403  ;;  %v1783_v58 = vsel %vm1771_vm6, %v5338_v12, %v3401_v44  ;;  %v1782_v20 = vsel %vm1771_vm6, %v5339_v22, %v3400_v34 }
 0x1b4   : > { %v3409_v16 = vpop.permute.xlu0 %3408  ;;  %v3406_v39 = vunpack.i.h.bf16 %v3404_v54  ;;  %v3405_v51 = vunpack.i.l.bf16 %v3404_v54 }
 0x1b5   : > { %v3410_v26 = vunpack.i.l.bf16 %v3409_v16  ;;  %v3411_v42 = vunpack.i.h.bf16 %v3409_v16 }
 0x1b6   : > { %v1798_v47 = vsel %vm1771_vm6, %v5340_v3, %v3405_v51  ;;  %v1799_v5 = vsel %vm1771_vm6, %v5341_v60, %v3406_v39 }
 0x1b7   : > { %v3414_v63 = vpop.permute.xlu1 %3413  ;;  %v1813_v31 = vsel %vm1804_vm7, %v1780_v1, %v3410_v26  ;;  %v1814_v2 = vsel %vm1804_vm7, %v1781_v21, %v3411_v42 }
 0x1b8   : > { %v3419_v55 = vpop.permute.xlu0 %3418  ;;  %v3416_v35 = vunpack.i.h.bf16 %v3414_v63  ;;  %v3415_v29 = vunpack.i.l.bf16 %v3414_v63 }
 0x1b9   : > { %v3420_v18 = vunpack.i.l.bf16 %v3419_v55  ;;  %v3421_v41 = vunpack.i.h.bf16 %v3419_v55 }
 0x1ba   : > { %v1829_v38 = vsel %vm1804_vm7, %v1796_v61, %v3415_v29  ;;  %v1830_v49 = vsel %vm1804_vm7, %v1797_v37, %v3416_v35 }
 0x1bb   : > { %v3424_v8 = vpop.permute.xlu1 %3423  ;;  %v1815_v56 = vsel %vm1804_vm7, %v1782_v20, %v3420_v18  ;;  %v1816_v52 = vsel %vm1804_vm7, %v1783_v58, %v3421_v41 }
 0x1bc   : > { %v3429_v57 = vpop.permute.xlu0 %3428  ;;  %v3425_v9 = vunpack.i.l.bf16 %v3424_v8  ;;  %v3426_v33 = vunpack.i.h.bf16 %v3424_v8 }
 0x1bd   : > { %v3431_v17 = vunpack.i.h.bf16 %v3429_v57  ;;  %v3430_v50 = vunpack.i.l.bf16 %v3429_v57 }
 0x1be   : > { %v1831_v24 = vsel %vm1804_vm7, %v1798_v47, %v3425_v9  ;;  %v1832_v19 = vsel %vm1804_vm7, %v1799_v5, %v3426_v33 }
 0x1bf   : > { %v3434_v62 = vpop.permute.xlu1 %3433  ;;  %v1846_v7 = vsel %vm1837_vm8, %v1813_v31, %v3430_v50  ;;  %v1847_v48 = vsel %vm1837_vm8, %v1814_v2, %v3431_v17 }
 0x1c0   : > { %v3439_v0 = vpop.permute.xlu0 %3438  ;;  %v3436_v27 = vunpack.i.h.bf16 %v3434_v62  ;;  %v3435_v25 = vunpack.i.l.bf16 %v3434_v62 }
 0x1c1   : > { %v3440_v32 = vunpack.i.l.bf16 %v3439_v0  ;;  %v3441_v28 = vunpack.i.h.bf16 %v3439_v0 }
 0x1c2   : > { %v1862_v43 = vsel %vm1837_vm8, %v1829_v38, %v3435_v25  ;;  %v1863_v14 = vsel %vm1837_vm8, %v1830_v49, %v3436_v27 }
 0x1c3   : > { %v4999_v23 = vpop.permute.xlu1 %3443  ;;  %v1848_v45 = vsel %vm1837_vm8, %v1815_v56, %v3440_v32  ;;  %v1849_v63 = vsel %vm1837_vm8, %v1816_v52, %v3441_v28 }
 0x1c4   : > { %v3449_v36 = vpop.permute.xlu0 %3448  ;;  %v3446_v55 = vunpack.i.h.bf16 %v4999_v23  ;;  %v3445_v10 = vunpack.i.l.bf16 %v4999_v23 }
 0x1c5   : > { %v3451_v59 = vunpack.i.h.bf16 %v3449_v36  ;;  %v3450_v53 = vunpack.i.l.bf16 %v3449_v36 }
 0x1c6   : > { %v1864_v20 = vsel %vm1837_vm8, %v1831_v24, %v3445_v10  ;;  %v1865_v47 = vsel %vm1837_vm8, %v1832_v19, %v3446_v55  ;;  %v5344_v55 = vld [vmem:[#allocation35_spill] sm:$0xff] }
 0x1c7   : > { %v3454_v13 = vpop.permute.xlu1 %3453  ;;  %v1879_v6 = vsel %vm1870_vm9, %v1846_v7, %v3450_v53  ;;  %v1880_v11 = vsel %vm1870_vm9, %v1847_v48, %v3451_v59 }
 0x1c8   : > { %v3459_v4 = vpop.permute.xlu0 %3458  ;;  %v3455_v15 = vunpack.i.l.bf16 %v3454_v13  ;;  %v3456_v54 = vunpack.i.h.bf16 %v3454_v13 }
 0x1c9   : > { %v3461_v62 = vunpack.i.h.bf16 %v3459_v4  ;;  %v3460_v46 = vunpack.i.l.bf16 %v3459_v4 }
 0x1ca   : > { %v1895_v44 = vsel %vm1870_vm9, %v1862_v43, %v3455_v15  ;;  %v1896_v51 = vsel %vm1870_vm9, %v1863_v14, %v3456_v54  ;;  %v5342_v43 = vld [vmem:[#allocation28_spill] sm:$0xff] }
 0x1cb   : > { %v3464_v40 = vpop.permute.xlu1 %3463  ;;  %v1881_v42 = vsel %vm1870_vm9, %v1848_v45, %v3460_v46  ;;  %v1882_v23 = vsel %vm1870_vm9, %v1849_v63, %v3461_v62  ;;  %v5343_v45 = vld [vmem:[#allocation29_spill] sm:$0xff] }
 0x1cc   : > { %v3469_v16 = vpop.permute.xlu0 %3468  ;;  %v3466_v30 = vunpack.i.h.bf16 %v3464_v40  ;;  %v3465_v37 = vunpack.i.l.bf16 %v3464_v40 }
 0x1cd   : > { %v3471_v8 = vunpack.i.h.bf16 %v3469_v16  ;;  %v3470_v57 = vunpack.i.l.bf16 %v3469_v16 }
 0x1ce   : > { %v1897_v31 = vsel %vm1870_vm9, %v1864_v20, %v3465_v37  ;;  %v1898_v33 = vsel %vm1870_vm9, %v1865_v47, %v3466_v30 }
 0x1cf   : > { %v1912_v0 = vsel %vm1903_vm10, %v1879_v6, %v3470_v57  ;;  %v1913_v34 = vsel %vm1903_vm10, %v1880_v11, %v3471_v8  ;;  %v3474_v39 = vpop.permute.xlu1 %3473  ;;  %v5345_v57 = vld [vmem:[#allocation36_spill] sm:$0xff]  ;;  %v5346_v11 = vld [vmem:[#allocation30_spill] sm:$0xff] }
 0x1d0   : > { %v1940_v1 = vpack.c.bf16 %v1913_v34, %v1912_v0  ;;  %v3476_v21 = vunpack.i.h.bf16 %v3474_v39  ;;  %v3475_v26 = vunpack.i.l.bf16 %v3474_v39  ;;  %v3479_v61 = vpop.permute.xlu0 %3478 }
 0x1d1   : > { %v3481_v12 = vunpack.i.h.bf16 %v3479_v61  ;;  %v3480_v58 = vunpack.i.l.bf16 %v3479_v61 }
 0x1d2   : > { %v1928_v36 = vsel %vm1903_vm10, %v1895_v44, %v3475_v26  ;;  %v1929_v22 = vsel %vm1903_vm10, %v1896_v51, %v3476_v21  ;;  %2836 = vmatprep.mubr.msk.bf16.mxu0 %vm1979_vm11, %v1940_v1  ;;  %v5347_v44 = vld [vmem:[#allocation31_spill] sm:$0xff]  ;;  %v5348_v1 = vld [vmem:[#allocation38_spill] sm:$0xff]  ;;  %v5349_v26 = vld [vmem:[#allocation37_spill] sm:$0xff] }
 0x1d3   : > { %v1948_v35 = vpack.c.bf16 %v1929_v22, %v1928_v36  ;;  %v1914_v29 = vsel %vm1903_vm10, %v1881_v42, %v3480_v58  ;;  %v1915_v18 = vsel %vm1903_vm10, %v1882_v23, %v3481_v12  ;;  %v3484_v3 = vpop.permute.xlu1 %3483 }
 0x1d4   : > { %v1941_v60 = vpack.c.bf16 %v1915_v18, %v1914_v29  ;;  %v3486_v5 = vunpack.i.h.bf16 %v3484_v3  ;;  %v3485_v41 = vunpack.i.l.bf16 %v3484_v3  ;;  %v3489_v9 = vpop.permute.xlu0 %3488 }
 0x1d5   : > { %2852 = vmatprep.mubr.msk.bf16.mxu1 %vm1979_vm11, %v1948_v35  ;;  %v3491_v28 = vunpack.i.h.bf16 %v3489_v9  ;;  %v3490_v52 = vunpack.i.l.bf16 %v3489_v9 }
 0x1d6   : > { %v1930_v17 = vsel %vm1903_vm10, %v1897_v31, %v3485_v41  ;;  %v1931_v50 = vsel %vm1903_vm10, %v1898_v33, %v3486_v5  ;;  %2837 = vmatmul.mubr.msk.bf16.gmra.mrb[8].mxu0 %vm1979_vm11, %v1941_v60 }
 0x1d7   : > { %v1949_v13 = vpack.c.bf16 %v1931_v50, %v1930_v17  ;;  %v3494_v2 = vpop.permute.xlu1 %3493  ;;  %v1784_v14 = vsel %vm1771_vm6, %v5342_v43, %v3490_v52  ;;  %v1785_v54 = vsel %vm1771_vm6, %v5343_v45, %v3491_v28 }
 0x1d8   : > { %v3499_v27 = vpop.permute.xlu0 %3498  ;;  %v3496_v59 = vunpack.i.h.bf16 %v3494_v2  ;;  %v3495_v53 = vunpack.i.l.bf16 %v3494_v2 }
 0x1d9   : > { %2853 = vmatmul.mubr.msk.bf16.gmra.mrb[8].mxu1 %vm1979_vm11, %v1949_v13  ;;  %v3501_v19 = vunpack.i.h.bf16 %v3499_v27  ;;  %v3500_v48 = vunpack.i.l.bf16 %v3499_v27 }
 0x1da   : > { %v1800_v8 = vsel %vm1771_vm6, %v5344_v55, %v3495_v53  ;;  %v1801_v6 = vsel %vm1771_vm6, %v5345_v57, %v3496_v59 }
 0x1db   : > { %v3504_v25 = vpop.permute.xlu1 %3503  ;;  %v1787_v62 = vsel %vm1771_vm6, %v5346_v11, %v3501_v19  ;;  %v1786_v0 = vsel %vm1771_vm6, %v5347_v44, %v3500_v48 }
 0x1dc   : > { %v3509_v32 = vpop.permute.xlu0 %3508  ;;  %v3506_v15 = vunpack.i.h.bf16 %v3504_v25  ;;  %v3505_v40 = vunpack.i.l.bf16 %v3504_v25 }
 0x1dd   : > { %v3510_v16 = vunpack.i.l.bf16 %v3509_v32  ;;  %v3511_v46 = vunpack.i.h.bf16 %v3509_v32 }
 0x1de   : > { %v1802_v21 = vsel %vm1771_vm6, %v5348_v1, %v3505_v40  ;;  %v1803_v61 = vsel %vm1771_vm6, %v5349_v26, %v3506_v15 }
 0x1df   : > { %v3514_v4 = vpop.permute.xlu1 %3513  ;;  %v1817_v12 = vsel %vm1804_vm7, %v1784_v14, %v3510_v16  ;;  %v1818_v22 = vsel %vm1804_vm7, %v1785_v54, %v3511_v46 }
 0x1e0   : > { %v3519_v38 = vpop.permute.xlu0 %3518  ;;  %v3516_v34 = vunpack.i.h.bf16 %v3514_v4  ;;  %v3515_v39 = vunpack.i.l.bf16 %v3514_v4 }
 0x1e1   : > { %v3520_v51 = vunpack.i.l.bf16 %v3519_v38  ;;  %v3521_v30 = vunpack.i.h.bf16 %v3519_v38 }
 0x1e2   : > { %v1833_v3 = vsel %vm1804_vm7, %v1800_v8, %v3515_v39  ;;  %v1834_v47 = vsel %vm1804_vm7, %v1801_v6, %v3516_v34 }
 0x1e3   : > { %v3524_v49 = vpop.permute.xlu1 %3523  ;;  %v1819_v60 = vsel %vm1804_vm7, %v1786_v0, %v3520_v51  ;;  %v1820_v41 = vsel %vm1804_vm7, %v1787_v62, %v3521_v30 }
 0x1e4   : > { %v3529_v56 = vpop.permute.xlu0 %3528  ;;  %v3525_v37 = vunpack.i.l.bf16 %v3524_v49  ;;  %v3526_v58 = vunpack.i.h.bf16 %v3524_v49 }
 0x1e5   : > { %v3531_v42 = vunpack.i.h.bf16 %v3529_v56  ;;  %v3530_v23 = vunpack.i.l.bf16 %v3529_v56 }
 0x1e6   : > { %v1835_v9 = vsel %vm1804_vm7, %v1802_v21, %v3525_v37  ;;  %v1836_v17 = vsel %vm1804_vm7, %v1803_v61, %v3526_v58 }
 0x1e7   : > { %v3534_v24 = vpop.permute.xlu1 %3533  ;;  %v1850_v50 = vsel %vm1837_vm8, %v1817_v12, %v3530_v23  ;;  %v1851_v13 = vsel %vm1837_vm8, %v1818_v22, %v3531_v42 }
 0x1e8   : > { %v3539_v7 = vpop.permute.xlu0 %3538  ;;  %v3536_v20 = vunpack.i.h.bf16 %v3534_v24  ;;  %v3535_v35 = vunpack.i.l.bf16 %v3534_v24 }
 0x1e9   : > { %v3540_v29 = vunpack.i.l.bf16 %v3539_v7  ;;  %v3541_v5 = vunpack.i.h.bf16 %v3539_v7 }
 0x1ea   : > { %v1866_v25 = vsel %vm1837_vm8, %v1833_v3, %v3535_v35  ;;  %v1867_v32 = vsel %vm1837_vm8, %v1834_v47, %v3536_v20 }
 0x1eb   : > { %v5055_v63 = vpop.permute.xlu1 %3543  ;;  %v1852_v4 = vsel %vm1837_vm8, %v1819_v60, %v3540_v29  ;;  %v1853_v56 = vsel %vm1837_vm8, %v1820_v41, %v3541_v5 }
 0x1ec   : > { %v3549_v10 = vpop.permute.xlu0 %3548  ;;  %v3546_v28 = vunpack.i.h.bf16 %v5055_v63  ;;  %v3545_v48 = vunpack.i.l.bf16 %v5055_v63 }
 0x1ed   : > { %v3551_v31 = vunpack.i.h.bf16 %v3549_v10  ;;  %v3550_v33 = vunpack.i.l.bf16 %v3549_v10 }
 0x1ee   : > { %v1869_v0 = vsel %vm1837_vm8, %v1836_v17, %v3546_v28  ;;  %v1868_v21 = vsel %vm1837_vm8, %v1835_v9, %v3545_v48 }
 0x1ef   : > { %v3554_v36 = vpop.permute.xlu1 %3553  ;;  %v1883_v59 = vsel %vm1870_vm9, %v1850_v50, %v3550_v33  ;;  %v1884_v53 = vsel %vm1870_vm9, %v1851_v13, %v3551_v31 }
 0x1f0   : > { %v3559_v18 = vpop.permute.xlu0 %3558  ;;  %v3555_v2 = vunpack.i.l.bf16 %v3554_v36  ;;  %v3556_v38 = vunpack.i.h.bf16 %v3554_v36  ;;  %v5107_v36 = vld [vmem:[#allocation8] ss:$0 sm:$0xff] }
 0x1f1   : > { %v3561_v19 = vunpack.i.h.bf16 %v3559_v18  ;;  %v3560_v7 = vunpack.i.l.bf16 %v3559_v18 }
 0x1f2   : > { %v1899_v15 = vsel %vm1870_vm9, %v1866_v25, %v3555_v2  ;;  %v1900_v45 = vsel %vm1870_vm9, %v1867_v32, %v3556_v38 }
 0x1f3   : > { %v3564_v27 = vpop.permute.xlu1 %3563  ;;  %v1885_v46 = vsel %vm1870_vm9, %v1852_v4, %v3560_v7  ;;  %v1886_v63 = vsel %vm1870_vm9, %v1853_v56, %v3561_v19 }
 0x1f4   : > { %v3569_v49 = vpop.permute.xlu0 %3568  ;;  %v3566_v57 = vunpack.i.h.bf16 %v3564_v27  ;;  %v3565_v6 = vunpack.i.l.bf16 %v3564_v27 }
 0x1f5   : > { %v3571_v52 = vunpack.i.h.bf16 %v3569_v49  ;;  %v3570_v24 = vunpack.i.l.bf16 %v3569_v49 }
 0x1f6   : > { %v1901_v37 = vsel %vm1870_vm9, %v1868_v21, %v3565_v6  ;;  %v1902_v12 = vsel %vm1870_vm9, %v1869_v0, %v3566_v57 }
 0x1f7   : > { %v1916_v40 = vsel %vm1903_vm10, %v1883_v59, %v3570_v24  ;;  %v1917_v43 = vsel %vm1903_vm10, %v1884_v53, %v3571_v52  ;;  %v3574_v14 = vpop.permute.xlu1 %3573 }
 0x1f8   : > { %v1942_v54 = vpack.c.bf16 %v1917_v43, %v1916_v40  ;;  %v3576_v16 = vunpack.i.h.bf16 %v3574_v14  ;;  %v3575_v55 = vunpack.i.l.bf16 %v3574_v14  ;;  %v3579_v8 = vpop.permute.xlu0 %3578 }
 0x1f9   : > { %v3581_v11 = vunpack.i.h.bf16 %v3579_v8  ;;  %v3580_v62 = vunpack.i.l.bf16 %v3579_v8 }
 0x1fa   : > { %v1932_v10 = vsel %vm1903_vm10, %v1899_v15, %v3575_v55  ;;  %v1933_v44 = vsel %vm1903_vm10, %v1900_v45, %v3576_v16  ;;  %2840 = vmatprep.mubr.msk.bf16.mxu0 %vm1979_vm11, %v1942_v54 }
 0x1fb   : > { %v1950_v34 = vpack.c.bf16 %v1933_v44, %v1932_v10  ;;  %v1918_v39 = vsel %vm1903_vm10, %v1885_v46, %v3580_v62  ;;  %v1919_v51 = vsel %vm1903_vm10, %v1886_v63, %v3581_v11  ;;  %v3584_v1 = vpop.permute.xlu1 %3583 }
 0x1fc   : > { %v1943_v26 = vpack.c.bf16 %v1919_v51, %v1918_v39  ;;  %v3586_v61 = vunpack.i.h.bf16 %v3584_v1  ;;  %v3585_v30 = vunpack.i.l.bf16 %v3584_v1 }
 0x1fd   : > { %2856 = vmatprep.mubr.msk.bf16.mxu1 %vm1979_vm11, %v1950_v34 }
 0x1fe   : > { %v1934_v58 = vsel %vm1903_vm10, %v1901_v37, %v3585_v30  ;;  %v1935_v42 = vsel %vm1903_vm10, %v1902_v12, %v3586_v61  ;;  %2841 = vmatmul.mubr.msk.bf16.gmra.mrb[12].mxu0 %vm1979_vm11, %v1943_v26 }
 0x1ff   : > { %v1951_v23 = vpack.c.bf16 %v1935_v42, %v1934_v58 }
 0x201   : > { %2857 = vmatmul.mubr.msk.bf16.gmra.mrb[12].mxu1 %vm1979_vm11, %v1951_v23 }
 0x259   : > { %v2830_v22 = vpop.f32.mrb[0].mxu0 }
 0x25a   : > { %v2075_v20 = vadd.f32 %v2830_v22, %v5107_v36  ;;  %v2066_v35 = vpop.f32.mrb[1].mxu0 }
 0x25b   : > { %v2067_v29 = vadd.f32 %v5107_v36, %v2066_v35  ;;  %v2831_v18 = vpop.f32.mrb[2].mxu0 }
 0x25c   : > { %v2195_v3 = vadd.f32 3.0, %v2075_v20  ;;  %v2078_v47 = vadd.f32 %v2831_v18, %v5107_v36  ;;  %v2069_v60 = vpop.f32.mrb[3].mxu0  ;;  %v2846_v5 = vpop.f32.mrb[0].mxu1 }
 0x25d   : > { %v2193_v41 = vadd.f32 3.0, %v2067_v29  ;;  %v2070_v9 = vadd.f32 %v5107_v36, %v2069_v60  ;;  %v2139_v31 = vadd.f32 %v2846_v5, %v5107_v36  ;;  %v2130_v33 = vpop.f32.mrb[1].mxu1 }
 0x25e   : > { %v2227_v17 = vmax.f32 %v2195_v3, 0.0  ;;  %v2196_v50 = vadd.f32 3.0, %v2078_v47  ;;  %v2131_v13 = vadd.f32 %v5107_v36, %v2130_v33  ;;  %v2847_v2 = vpop.f32.mrb[2].mxu1 }
 0x25f   : > { %v2225_v27 = vmax.f32 %v2193_v41, 0.0  ;;  %v2194_v25 = vadd.f32 3.0, %v2070_v9  ;;  %v2211_v32 = vadd.f32 3.0, %v2139_v31  ;;  %v2142_v4 = vadd.f32 %v2847_v2, %v5107_v36  ;;  %v2133_v38 = vpop.f32.mrb[3].mxu1 }
 0x260   : > { %v2259_v49 = vmin.f32 %v2227_v17, 6.0  ;;  %v2228_v56 = vmax.f32 %v2196_v50, 0.0  ;;  %v2209_v28 = vadd.f32 3.0, %v2131_v13  ;;  %v2134_v52 = vadd.f32 %v5107_v36, %v2133_v38 }
 0x261   : > { %v2257_v24 = vmin.f32 %v2225_v27, 6.0  ;;  %v2226_v59 = vmax.f32 %v2194_v25, 0.0  ;;  %v2243_v53 = vmax.f32 %v2211_v32, 0.0  ;;  %v2212_v19 = vadd.f32 3.0, %v2142_v4 }
 0x262   : > { %v2291_v7 = vmul.f32 %v2259_v49, %v2075_v20  ;;  %v2260_v48 = vmin.f32 %v2228_v56, 6.0  ;;  %v2241_v15 = vmax.f32 %v2209_v28, 0.0  ;;  %v2210_v40 = vadd.f32 3.0, %v2134_v52 }
 0x263   : > { %v2289_v43 = vmul.f32 %v2257_v24, %v2067_v29  ;;  %v2258_v14 = vmin.f32 %v2226_v59, 6.0  ;;  %v2275_v45 = vmin.f32 %v2243_v53, 6.0  ;;  %v2244_v54 = vmax.f32 %v2212_v19, 0.0 }
 0x264   : > { %v2323_v16 = vmul.f32 0.16666667, %v2291_v7  ;;  %v2292_v55 = vmul.f32 %v2260_v48, %v2078_v47  ;;  %v2273_v8 = vmin.f32 %v2241_v15, 6.0  ;;  %v2242_v57 = vmax.f32 %v2210_v40, 0.0 }
 0x265   : > { %v2321_v6 = vmul.f32 0.16666667, %v2289_v43  ;;  %v2290_v11 = vmul.f32 %v2258_v14, %v2070_v9  ;;  %v2307_v62 = vmul.f32 %v2275_v45, %v2139_v31  ;;  %v2276_v46 = vmin.f32 %v2244_v54, 6.0 }
 0x266   : > { %v2693_v63 = vpack.c.bf16 %v2323_v16, %v2323_v16  ;;  %v2324_v10 = vmul.f32 0.16666667, %v2292_v55  ;;  %v2305_v44 = vmul.f32 %v2273_v8, %v2131_v13  ;;  %v2274_v0 = vmin.f32 %v2242_v57, 6.0 }
 0x267   : > { %v2691_v34 = vpack.c.bf16 %v2321_v6, %v2321_v6  ;;  %v2322_v39 = vmul.f32 0.16666667, %v2290_v11  ;;  %v2339_v51 = vmul.f32 0.16666667, %v2307_v62  ;;  %v2308_v1 = vmul.f32 %v2276_v46, %v2142_v4 }
 0x268   : > { %2484 = vst.msk [vmem:[%s5119_s17 + $0x8] sm:$0xf] %vm2481_vm12, %v2693_v63  ;;  %v2694_v21 = vpack.c.bf16 %v2324_v10, %v2324_v10  ;;  %v2337_v26 = vmul.f32 0.16666667, %v2305_v44  ;;  %v2306_v61 = vmul.f32 %v2274_v0, %v2134_v52 }
 0x269   : > { %2482 = vst.msk [vmem:[%s5119_s17] sm:$0xf] %vm2481_vm12, %v2691_v34  ;;  %v2692_v30 = vpack.c.bf16 %v2322_v39, %v2322_v39  ;;  %v2709_v37 = vpack.c.bf16 %v2339_v51, %v2339_v51  ;;  %v2340_v12 = vmul.f32 0.16666667, %v2308_v1 }
 0x26a   : > { %2485 = vst.msk [vmem:[%s5119_s17 + $0xc] sm:$0xf] %vm2481_vm12, %v2694_v21  ;;  %v2707_v58 = vpack.c.bf16 %v2337_v26, %v2337_v26  ;;  %v2338_v42 = vmul.f32 0.16666667, %v2306_v61 }
 0x26b   : > { %2483 = vst.msk [vmem:[%s5119_s17 + $0x4] sm:$0xf] %vm2481_vm12, %v2692_v30  ;;  %2500 = vst.msk [vmem:[%s5119_s17 + $0x48] sm:$0xf] %vm2481_vm12, %v2709_v37  ;;  %v2710_v23 = vpack.c.bf16 %v2340_v12, %v2340_v12 }
 0x26c   : > { %2498 = vst.msk [vmem:[%s5119_s17 + $0x40] sm:$0xf] %vm2481_vm12, %v2707_v58  ;;  %v2708_v22 = vpack.c.bf16 %v2338_v42, %v2338_v42 }
 0x26d   : > { %2501 = vst.msk [vmem:[%s5119_s17 + $0x4c] sm:$0xf] %vm2481_vm12, %v2710_v23 }
 0x26e   : > { %2499 = vst.msk [vmem:[%s5119_s17 + $0x44] sm:$0xf] %vm2481_vm12, %v2708_v22 }
 0x281   : > { %v2834_v20 = vpop.f32.mrb[4].mxu0 }
 0x282   : > { %v2091_v35 = vadd.f32 %v2834_v20, %v5107_v36  ;;  %v2082_v29 = vpop.f32.mrb[5].mxu0 }
 0x283   : > { %v2083_v18 = vadd.f32 %v5107_v36, %v2082_v29  ;;  %v2835_v3 = vpop.f32.mrb[6].mxu0 }
 0x284   : > { %v2199_v47 = vadd.f32 3.0, %v2091_v35  ;;  %v2094_v60 = vadd.f32 %v2835_v3, %v5107_v36  ;;  %v2085_v5 = vpop.f32.mrb[7].mxu0  ;;  %v2850_v41 = vpop.f32.mrb[4].mxu1 }
 0x285   : > { %v2197_v9 = vadd.f32 3.0, %v2083_v18  ;;  %v2086_v31 = vadd.f32 %v5107_v36, %v2085_v5  ;;  %v2155_v33 = vadd.f32 %v2850_v41, %v5107_v36  ;;  %v2146_v17 = vpop.f32.mrb[5].mxu1 }
 0x286   : > { %v2231_v50 = vmax.f32 %v2199_v47, 0.0  ;;  %v2200_v13 = vadd.f32 3.0, %v2094_v60  ;;  %v2147_v2 = vadd.f32 %v5107_v36, %v2146_v17  ;;  %v2851_v27 = vpop.f32.mrb[6].mxu1 }
 0x287   : > { %v2229_v25 = vmax.f32 %v2197_v9, 0.0  ;;  %v2198_v32 = vadd.f32 3.0, %v2086_v31  ;;  %v2215_v4 = vadd.f32 3.0, %v2155_v33  ;;  %v2158_v38 = vadd.f32 %v2851_v27, %v5107_v36  ;;  %v2149_v49 = vpop.f32.mrb[7].mxu1 }
 0x288   : > { %v2263_v56 = vmin.f32 %v2231_v50, 6.0  ;;  %v2232_v28 = vmax.f32 %v2200_v13, 0.0  ;;  %v2213_v52 = vadd.f32 3.0, %v2147_v2  ;;  %v2150_v24 = vadd.f32 %v5107_v36, %v2149_v49 }
 0x289   : > { %v2261_v59 = vmin.f32 %v2229_v25, 6.0  ;;  %v2230_v53 = vmax.f32 %v2198_v32, 0.0  ;;  %v2247_v19 = vmax.f32 %v2215_v4, 0.0  ;;  %v2216_v7 = vadd.f32 3.0, %v2158_v38 }
 0x28a   : > { %v2295_v48 = vmul.f32 %v2263_v56, %v2091_v35  ;;  %v2264_v15 = vmin.f32 %v2232_v28, 6.0  ;;  %v2245_v40 = vmax.f32 %v2213_v52, 0.0  ;;  %v2214_v43 = vadd.f32 3.0, %v2150_v24 }
 0x28b   : > { %v2293_v14 = vmul.f32 %v2261_v59, %v2083_v18  ;;  %v2262_v45 = vmin.f32 %v2230_v53, 6.0  ;;  %v2279_v54 = vmin.f32 %v2247_v19, 6.0  ;;  %v2248_v16 = vmax.f32 %v2216_v7, 0.0 }
 0x28c   : > { %v2327_v55 = vmul.f32 0.16666667, %v2295_v48  ;;  %v2296_v8 = vmul.f32 %v2264_v15, %v2094_v60  ;;  %v2277_v57 = vmin.f32 %v2245_v40, 6.0  ;;  %v2246_v6 = vmax.f32 %v2214_v43, 0.0 }
 0x28d   : > { %v2325_v11 = vmul.f32 0.16666667, %v2293_v14  ;;  %v2294_v62 = vmul.f32 %v2262_v45, %v2086_v31  ;;  %v2311_v46 = vmul.f32 %v2279_v54, %v2155_v33  ;;  %v2280_v63 = vmin.f32 %v2248_v16, 6.0 }
 0x28e   : > { %v2697_v10 = vpack.c.bf16 %v2327_v55, %v2327_v55  ;;  %v2328_v44 = vmul.f32 0.16666667, %v2296_v8  ;;  %v2309_v0 = vmul.f32 %v2277_v57, %v2147_v2  ;;  %v2278_v34 = vmin.f32 %v2246_v6, 6.0 }
 0x28f   : > { %v2695_v39 = vpack.c.bf16 %v2325_v11, %v2325_v11  ;;  %v2326_v51 = vmul.f32 0.16666667, %v2294_v62  ;;  %v2343_v1 = vmul.f32 0.16666667, %v2311_v46  ;;  %v2312_v21 = vmul.f32 %v2280_v63, %v2158_v38 }
 0x290   : > { %2488 = vst.msk [vmem:[%s5119_s17 + $0x18] sm:$0xf] %vm2481_vm12, %v2697_v10  ;;  %v2698_v26 = vpack.c.bf16 %v2328_v44, %v2328_v44  ;;  %v2341_v61 = vmul.f32 0.16666667, %v2309_v0  ;;  %v2310_v30 = vmul.f32 %v2278_v34, %v2150_v24 }
 0x291   : > { %2486 = vst.msk [vmem:[%s5119_s17 + $0x10] sm:$0xf] %vm2481_vm12, %v2695_v39  ;;  %v2696_v37 = vpack.c.bf16 %v2326_v51, %v2326_v51  ;;  %v2713_v12 = vpack.c.bf16 %v2343_v1, %v2343_v1  ;;  %v2344_v58 = vmul.f32 0.16666667, %v2312_v21 }
 0x292   : > { %2489 = vst.msk [vmem:[%s5119_s17 + $0x1c] sm:$0xf] %vm2481_vm12, %v2698_v26  ;;  %v2711_v42 = vpack.c.bf16 %v2341_v61, %v2341_v61  ;;  %v2342_v23 = vmul.f32 0.16666667, %v2310_v30 }
 0x293   : > { %2487 = vst.msk [vmem:[%s5119_s17 + $0x14] sm:$0xf] %vm2481_vm12, %v2696_v37  ;;  %2504 = vst.msk [vmem:[%s5119_s17 + $0x58] sm:$0xf] %vm2481_vm12, %v2713_v12  ;;  %v2714_v22 = vpack.c.bf16 %v2344_v58, %v2344_v58 }
 0x294   : > { %2502 = vst.msk [vmem:[%s5119_s17 + $0x50] sm:$0xf] %vm2481_vm12, %v2711_v42  ;;  %v2712_v20 = vpack.c.bf16 %v2342_v23, %v2342_v23 }
 0x295   : > { %2505 = vst.msk [vmem:[%s5119_s17 + $0x5c] sm:$0xf] %vm2481_vm12, %v2714_v22 }
 0x296   : > { %2503 = vst.msk [vmem:[%s5119_s17 + $0x54] sm:$0xf] %vm2481_vm12, %v2712_v20 }
 0x2a9   : > { %v2838_v35 = vpop.f32.mrb[8].mxu0 }
 0x2aa   : > { %v2107_v29 = vadd.f32 %v2838_v35, %v5107_v36  ;;  %v2098_v18 = vpop.f32.mrb[9].mxu0 }
 0x2ab   : > { %v2099_v3 = vadd.f32 %v5107_v36, %v2098_v18  ;;  %v2839_v47 = vpop.f32.mrb[10].mxu0 }
 0x2ac   : > { %v2203_v60 = vadd.f32 3.0, %v2107_v29  ;;  %v2110_v5 = vadd.f32 %v2839_v47, %v5107_v36  ;;  %v2101_v41 = vpop.f32.mrb[11].mxu0  ;;  %v2854_v9 = vpop.f32.mrb[8].mxu1 }
 0x2ad   : > { %v2201_v31 = vadd.f32 3.0, %v2099_v3  ;;  %v2102_v33 = vadd.f32 %v5107_v36, %v2101_v41  ;;  %v2171_v17 = vadd.f32 %v2854_v9, %v5107_v36  ;;  %v2162_v50 = vpop.f32.mrb[9].mxu1 }
 0x2ae   : > { %v2235_v13 = vmax.f32 %v2203_v60, 0.0  ;;  %v2204_v2 = vadd.f32 3.0, %v2110_v5  ;;  %v2163_v27 = vadd.f32 %v5107_v36, %v2162_v50  ;;  %v2855_v25 = vpop.f32.mrb[10].mxu1 }
 0x2af   : > { %v2233_v32 = vmax.f32 %v2201_v31, 0.0  ;;  %v2202_v4 = vadd.f32 3.0, %v2102_v33  ;;  %v2219_v38 = vadd.f32 3.0, %v2171_v17  ;;  %v2174_v49 = vadd.f32 %v2855_v25, %v5107_v36  ;;  %v2165_v56 = vpop.f32.mrb[11].mxu1 }
 0x2b0   : > { %v2267_v28 = vmin.f32 %v2235_v13, 6.0  ;;  %v2236_v52 = vmax.f32 %v2204_v2, 0.0  ;;  %v2217_v24 = vadd.f32 3.0, %v2163_v27  ;;  %v2166_v59 = vadd.f32 %v5107_v36, %v2165_v56 }
 0x2b1   : > { %v2265_v53 = vmin.f32 %v2233_v32, 6.0  ;;  %v2234_v19 = vmax.f32 %v2202_v4, 0.0  ;;  %v2251_v7 = vmax.f32 %v2219_v38, 0.0  ;;  %v2220_v48 = vadd.f32 3.0, %v2174_v49 }
 0x2b2   : > { %v2299_v15 = vmul.f32 %v2267_v28, %v2107_v29  ;;  %v2268_v40 = vmin.f32 %v2236_v52, 6.0  ;;  %v2249_v43 = vmax.f32 %v2217_v24, 0.0  ;;  %v2218_v14 = vadd.f32 3.0, %v2166_v59 }
 0x2b3   : > { %v2297_v45 = vmul.f32 %v2265_v53, %v2099_v3  ;;  %v2266_v54 = vmin.f32 %v2234_v19, 6.0  ;;  %v2283_v16 = vmin.f32 %v2251_v7, 6.0  ;;  %v2252_v55 = vmax.f32 %v2220_v48, 0.0 }
 0x2b4   : > { %v2331_v8 = vmul.f32 0.16666667, %v2299_v15  ;;  %v2300_v57 = vmul.f32 %v2268_v40, %v2110_v5  ;;  %v2281_v6 = vmin.f32 %v2249_v43, 6.0  ;;  %v2250_v11 = vmax.f32 %v2218_v14, 0.0 }
 0x2b5   : > { %v2329_v62 = vmul.f32 0.16666667, %v2297_v45  ;;  %v2298_v46 = vmul.f32 %v2266_v54, %v2102_v33  ;;  %v2315_v63 = vmul.f32 %v2283_v16, %v2171_v17  ;;  %v2284_v10 = vmin.f32 %v2252_v55, 6.0 }
 0x2b6   : > { %v2701_v44 = vpack.c.bf16 %v2331_v8, %v2331_v8  ;;  %v2332_v0 = vmul.f32 0.16666667, %v2300_v57  ;;  %v2313_v34 = vmul.f32 %v2281_v6, %v2163_v27  ;;  %v2282_v39 = vmin.f32 %v2250_v11, 6.0 }
 0x2b7   : > { %v2699_v51 = vpack.c.bf16 %v2329_v62, %v2329_v62  ;;  %v2330_v1 = vmul.f32 0.16666667, %v2298_v46  ;;  %v2347_v21 = vmul.f32 0.16666667, %v2315_v63  ;;  %v2316_v26 = vmul.f32 %v2284_v10, %v2174_v49 }
 0x2b8   : > { %2492 = vst.msk [vmem:[%s5119_s17 + $0x28] sm:$0xf] %vm2481_vm12, %v2701_v44  ;;  %v2702_v61 = vpack.c.bf16 %v2332_v0, %v2332_v0  ;;  %v2345_v30 = vmul.f32 0.16666667, %v2313_v34  ;;  %v2314_v37 = vmul.f32 %v2282_v39, %v2166_v59 }
 0x2b9   : > { %2490 = vst.msk [vmem:[%s5119_s17 + $0x20] sm:$0xf] %vm2481_vm12, %v2699_v51  ;;  %v2700_v12 = vpack.c.bf16 %v2330_v1, %v2330_v1  ;;  %v2717_v58 = vpack.c.bf16 %v2347_v21, %v2347_v21  ;;  %v2348_v42 = vmul.f32 0.16666667, %v2316_v26 }
 0x2ba   : > { %2493 = vst.msk [vmem:[%s5119_s17 + $0x2c] sm:$0xf] %vm2481_vm12, %v2702_v61  ;;  %v2715_v23 = vpack.c.bf16 %v2345_v30, %v2345_v30  ;;  %v2346_v22 = vmul.f32 0.16666667, %v2314_v37 }
 0x2bb   : > { %2491 = vst.msk [vmem:[%s5119_s17 + $0x24] sm:$0xf] %vm2481_vm12, %v2700_v12  ;;  %2508 = vst.msk [vmem:[%s5119_s17 + $0x68] sm:$0xf] %vm2481_vm12, %v2717_v58  ;;  %v2718_v20 = vpack.c.bf16 %v2348_v42, %v2348_v42 }
 0x2bc   : > { %2506 = vst.msk [vmem:[%s5119_s17 + $0x60] sm:$0xf] %vm2481_vm12, %v2715_v23  ;;  %v2716_v35 = vpack.c.bf16 %v2346_v22, %v2346_v22 }
 0x2bd   : > { %2509 = vst.msk [vmem:[%s5119_s17 + $0x6c] sm:$0xf] %vm2481_vm12, %v2718_v20 }
 0x2be   : > { %2507 = vst.msk [vmem:[%s5119_s17 + $0x64] sm:$0xf] %vm2481_vm12, %v2716_v35 }
 0x2d1   : > { %v2842_v29 = vpop.f32.mrb[12].mxu0 }
 0x2d2   : > { %v2123_v18 = vadd.f32 %v2842_v29, %v5107_v36  ;;  %v2114_v3 = vpop.f32.mrb[13].mxu0 }
 0x2d3   : > { %v2115_v47 = vadd.f32 %v5107_v36, %v2114_v3  ;;  %v2843_v60 = vpop.f32.mrb[14].mxu0 }
 0x2d4   : > { %v2207_v5 = vadd.f32 3.0, %v2123_v18  ;;  %v2126_v41 = vadd.f32 %v2843_v60, %v5107_v36  ;;  %v2117_v9 = vpop.f32.mrb[15].mxu0  ;;  %v2858_v31 = vpop.f32.mrb[12].mxu1 }
 0x2d5   : > { %v2205_v33 = vadd.f32 3.0, %v2115_v47  ;;  %v2118_v17 = vadd.f32 %v5107_v36, %v2117_v9  ;;  %v2187_v50 = vadd.f32 %v2858_v31, %v5107_v36  ;;  %v2178_v13 = vpop.f32.mrb[13].mxu1 }
 0x2d6   : > { %v2239_v2 = vmax.f32 %v2207_v5, 0.0  ;;  %v2208_v27 = vadd.f32 3.0, %v2126_v41  ;;  %v2179_v25 = vadd.f32 %v5107_v36, %v2178_v13  ;;  %v2859_v32 = vpop.f32.mrb[14].mxu1 }
 0x2d7   : > { %v2237_v4 = vmax.f32 %v2205_v33, 0.0  ;;  %v2206_v38 = vadd.f32 3.0, %v2118_v17  ;;  %v2223_v49 = vadd.f32 3.0, %v2187_v50  ;;  %v2190_v56 = vadd.f32 %v2859_v32, %v5107_v36  ;;  %v2181_v28 = vpop.f32.mrb[15].mxu1 }
 0x2d8   : > { %v2271_v52 = vmin.f32 %v2239_v2, 6.0  ;;  %v2240_v24 = vmax.f32 %v2208_v27, 0.0  ;;  %v2221_v59 = vadd.f32 3.0, %v2179_v25  ;;  %v2182_v53 = vadd.f32 %v5107_v36, %v2181_v28 }
 0x2d9   : > { %v2269_v19 = vmin.f32 %v2237_v4, 6.0  ;;  %v2238_v7 = vmax.f32 %v2206_v38, 0.0  ;;  %v2255_v48 = vmax.f32 %v2223_v49, 0.0  ;;  %v2224_v15 = vadd.f32 3.0, %v2190_v56 }
 0x2da   : > { %v2303_v40 = vmul.f32 %v2271_v52, %v2123_v18  ;;  %v2272_v43 = vmin.f32 %v2240_v24, 6.0  ;;  %v2253_v14 = vmax.f32 %v2221_v59, 0.0  ;;  %v2222_v45 = vadd.f32 3.0, %v2182_v53 }
 0x2db   : > { %v2301_v54 = vmul.f32 %v2269_v19, %v2115_v47  ;;  %v2270_v16 = vmin.f32 %v2238_v7, 6.0  ;;  %v2287_v55 = vmin.f32 %v2255_v48, 6.0  ;;  %v2256_v8 = vmax.f32 %v2224_v15, 0.0 }
 0x2dc   : > { %v2335_v57 = vmul.f32 0.16666667, %v2303_v40  ;;  %v2304_v6 = vmul.f32 %v2272_v43, %v2126_v41  ;;  %v2285_v11 = vmin.f32 %v2253_v14, 6.0  ;;  %v2254_v62 = vmax.f32 %v2222_v45, 0.0 }
 0x2dd   : > { %v2333_v46 = vmul.f32 0.16666667, %v2301_v54  ;;  %v2302_v36 = vmul.f32 %v2270_v16, %v2118_v17  ;;  %v2319_v63 = vmul.f32 %v2287_v55, %v2187_v50  ;;  %v2288_v10 = vmin.f32 %v2256_v8, 6.0 }
 0x2de   : > { %v2705_v44 = vpack.c.bf16 %v2335_v57, %v2335_v57  ;;  %v2336_v0 = vmul.f32 0.16666667, %v2304_v6  ;;  %v2317_v34 = vmul.f32 %v2285_v11, %v2179_v25  ;;  %v2286_v39 = vmin.f32 %v2254_v62, 6.0 }
 0x2df   : > { %v2703_v51 = vpack.c.bf16 %v2333_v46, %v2333_v46  ;;  %v2334_v1 = vmul.f32 0.16666667, %v2302_v36  ;;  %v2351_v21 = vmul.f32 0.16666667, %v2319_v63  ;;  %v2320_v26 = vmul.f32 %v2288_v10, %v2190_v56 }
 0x2e0   : > { %2496 = vst.msk [vmem:[%s5119_s17 + $0x38] sm:$0xf] %vm2481_vm12, %v2705_v44  ;;  %v2706_v61 = vpack.c.bf16 %v2336_v0, %v2336_v0  ;;  %v2349_v30 = vmul.f32 0.16666667, %v2317_v34  ;;  %v2318_v37 = vmul.f32 %v2286_v39, %v2182_v53 }
 0x2e1   : > { %2494 = vst.msk [vmem:[%s5119_s17 + $0x30] sm:$0xf] %vm2481_vm12, %v2703_v51  ;;  %v2704_v12 = vpack.c.bf16 %v2334_v1, %v2334_v1  ;;  %v2721_v58 = vpack.c.bf16 %v2351_v21, %v2351_v21  ;;  %v2352_v42 = vmul.f32 0.16666667, %v2320_v26 }
 0x2e2   : > { %2497 = vst.msk [vmem:[%s5119_s17 + $0x3c] sm:$0xf] %vm2481_vm12, %v2706_v61  ;;  %v2719_v23 = vpack.c.bf16 %v2349_v30, %v2349_v30  ;;  %v2350_v22 = vmul.f32 0.16666667, %v2318_v37 }
 0x2e3   : > { %2495 = vst.msk [vmem:[%s5119_s17 + $0x34] sm:$0xf] %vm2481_vm12, %v2704_v12  ;;  %2512 = vst.msk [vmem:[%s5119_s17 + $0x78] sm:$0xf] %vm2481_vm12, %v2721_v58  ;;  %v2722_v20 = vpack.c.bf16 %v2352_v42, %v2352_v42 }
 0x2e4   : > { %2510 = vst.msk [vmem:[%s5119_s17 + $0x70] sm:$0xf] %vm2481_vm12, %v2719_v23  ;;  %v2720_v35 = vpack.c.bf16 %v2350_v22, %v2350_v22 }
 0x2e5   : > { %2513 = vst.msk [vmem:[%s5119_s17 + $0x7c] sm:$0xf] %vm2481_vm12, %v2722_v20 }
 0x2e6   : > { %2511 = vst.msk [vmem:[%s5119_s17 + $0x74] sm:$0xf] %vm2481_vm12, %v2720_v35 }
 0x2e7   : > { %3697 = shalt.err (!%p3694_p1)
}
 0x2e8   : > { %s3698_s7 = scalar_lea.hbm %s5208_s24, 2048  ;;  %s3702_s28 = scalar_lea.hbm %s5264_s3, 4096 }
 0x2e9   : > { %p3699_p13 = scmp.ne.s32.totalorder %s5208_s24, %s3698_s7  ;;  %p3703_p4 = scmp.lt.u32.totalorder %s5208_s24, %s5264_s3 }
 0x2ea   : > { %p3704_p5 = scmp.lt.u32.totalorder %s3702_s28, %s3698_s7  ;;  %p3706_p11 = scmp.lt.u32.totalorder %s3698_s7, %s5208_s24 }
 0x2eb   : > { %p3700_p6 = pnand %p3699_p13, %p5350_p0 }
 0x2ec   : > { %p3705_p8 = por %p3704_p5, %p3703_p4 }
 0x2ed   : > { %p3701_p10 = pneg %p3700_p6 }
 0x2ee   : > { %p3707_p2 = por %p3706_p11, %p3705_p8 }
 0x2f0   : > { %p3708_p3 = pnand %p3707_p2, %p3701_p10 }
 0x2f2   : > { %3711 = shalt.err (!%p3708_p3)
}
 0x2f3   : > { %s3771_s17 = smov 64  }
 0x2f4   : > { %2878 = dma.vmem_to_hbm [thread:$0]  (%p5350_p0), %s5212_s11, 2048, %s5208_s24, %s2515_s27, %s3771_s17, %s3771_s17, %s3762_s18  }
 0x2f5 PF: > { %s2543_s25 = sand.u32 1, %s3742_s12   ;;  %p5351_p7 = scmp.ne.s32.totalorder %s5282_s19, 0 }
 0x2f6   : > { %p5352_p9 = scmp.ge.s32.totalorder %s3754_s15, 2  ;;  %s2544_s16 = scalar_lea.sflag [#allocation5], %s2543_s25 }
 0x2f8   : > { %p2892_p12 = pnand %p5352_p9, %p5351_p7 }
 0x2fa   : > { %3737 = dma.done.wait (!%p2892_p12), %s2544_s16, 2048  }
 0x2fb   : > { %3739 = vsyncadd (!%p2892_p12), %s2544_s16, 4294965248  ;;  %p17_p1 = scmp.ge.s32.totalorder %s3906_s5, 4   ;;  %s5353_s12 = smov %s3746_s13 }
 0x2fc   : > { %s5354_s13 = smov %s3750_s14  ;;  %s5355_s14 = smov %s3922_s10 }
 0x2fd   : > { %s5356_s15 = smov %s3906_s5  ;;  %19 = sbr.rel (!%p17_p1) target bundleno = 6 (0x6), region = 88 }
 0x304   :  { %2549 = vsyncpa [#allocation4], 1 }
 0x305   :  { %2551 = vsyncpa [#allocation4 + $0x1], 1 }
 0x306   :  { %2552 = vsyncpa [#allocation7], 1 }
 0x307   :  { %2553 = vsyncpa [#allocation5], 1 }
 0x308   :  { %2555 = vsyncpa [#allocation5 + $0x1], 1 }

</bundles_post_ra>
